<compile_context>
chip_gen: v6e
topology: v6e:2x2x1
jax: 0.10.0
libtpu: 0.0.40
codegen_flags: <defaults>
</compile_context>

<pallas_src>
import jax
import jax.numpy as jnp
from jax.experimental import pallas as pl
from jax.experimental.pallas import tpu as pltpu


# Matmul operands are cast to this dtype (f32 accumulation via
# preferred_element_type).  bf16 is MXU-native on v5e/v6e/v7x.
MATMUL_DTYPE = jnp.bfloat16


# ----------------------------------------------------------------------------- kernel


def _fused_attention_kernel(xy_ref, wpw_ref, wdw_ref, temp_ref, mask_ref,
                            wproj_ref, o_ref, pw_ref, dw_ref):
    """One batch element per grid step; everything stays pixel-major (HW, C).

    xy_ref   : (1, HW, 2C)   [x | y] pixels
    wpw_ref  : (2C, 3C)      block-diag(w_q^T, w_kv^T)  -> fused 1x1 convs
    wdw_ref  : (9, 3C)       fused depthwise 3x3 weights, tap = 3*dy + dx
    temp_ref : (1, C)        per-channel (head-expanded) temperature
    mask_ref : (C, C)        additive block-diagonal head mask (0 / -1e30)
    wproj_ref: (C, C)        projection weights, (Cin, Cout)
    o_ref    : (1, HW, C)
    pw_ref   : (H, W, 3C) f32 VMEM scratch (1x1-conv output)
    dw_ref   : (H, W, 3C) f32 VMEM scratch (depthwise-conv output)
    """
    H, W, C3 = dw_ref.shape
    HW = H * W
    C = o_ref.shape[2]

    # ---- fused 1x1 convs (q path + kv path) as one lane-dense matmul ----------
    xy = xy_ref[0].astype(MATMUL_DTYPE)                           # (HW, 2C)
    pw = jnp.dot(xy, wpw_ref[...].astype(MATMUL_DTYPE),
                 preferred_element_type=jnp.float32)              # (HW, 3C) f32
    pw_ref[...] = pw.reshape(H, W, C3)

    # ---- fused depthwise 3x3 conv, zero padding = 1, f32 on the VPU -----------
    # dy shifts: leading-dim row ranges; dx shifts: XLU sublane roll + edge mask.
    w9 = wdw_ref[...]                                             # (9, 3C)
    col = jax.lax.broadcasted_iota(jnp.int32, (1, W, 1), 1)
    for oy in (0, -1, 1):                                         # oy = dy - 1
        n = H - abs(oy)
        dst0, src0 = max(0, -oy), max(0, oy)
        rows0 = pw_ref[pl.ds(src0, n)]                            # (n, W, 3C)
        acc = rows0 * w9[3 * (oy + 1) + 1]                        # ox = 0 tap
        for ox in (-1, 1):                                        # ox = dx - 1
            rolled = pltpu.roll(rows0, shift=(-ox) % W, axis=1)
            edge = 0 if ox == -1 else W - 1
            rolled = jnp.where(col == edge, 0.0, rolled)
            acc = acc + rolled * w9[3 * (oy + 1) + (ox + 1)]
        if oy == 0:
            dw_ref[...] = acc                                     # init full scratch
        else:
            dw_ref[pl.ds(dst0, n)] += acc

    # ---- channel attention on (HW, C) slabs ------------------------------------
    dwv = dw_ref[...].reshape(HW, C3)
    q = dwv[:, :C]
    k = dwv[:, C:2 * C]
    v = dwv[:, 2 * C:]

    # torch F.normalize over HW (eps = 1e-12); temperature folded into q scale.
    eps2 = 1e-24
    q_scale = temp_ref[...] * jax.lax.rsqrt(
        jnp.maximum(jnp.sum(q * q, axis=0, keepdims=True), eps2))   # (1, C)
    k_scale = jax.lax.rsqrt(
        jnp.maximum(jnp.sum(k * k, axis=0, keepdims=True), eps2))   # (1, C)
    qn = (q * q_scale).astype(MATMUL_DTYPE)
    kn = (k * k_scale).astype(MATMUL_DTYPE)

    # Dense Gram over all channels (contract the HW/sublane axis directly),
    # mask cross-head entries, numerically-stable softmax over the row.
    g = jax.lax.dot_general(qn, kn, (((0,), (0,)), ((), ())),
                            preferred_element_type=jnp.float32)     # (C, C)
    scores = g + mask_ref[...]
    scores = scores - jnp.max(scores, axis=-1, keepdims=True)
    p = jnp.exp(scores)
    p = p * pl.reciprocal(jnp.sum(p, axis=-1, keepdims=True), approx=True)

    # out[n, c] = sum_e p[c, e] * v[n, e]   (still pixel-major)
    out = jax.lax.dot_general(v.astype(MATMUL_DTYPE), p.astype(MATMUL_DTYPE),
                              (((1,), (1,)), ((), ())),
                              preferred_element_type=jnp.float32)   # (HW, C)

    # ---- output 1x1 projection --------------------------------------------------
    o_ref[0] = jnp.dot(out.astype(MATMUL_DTYPE),
                       wproj_ref[...].astype(MATMUL_DTYPE),
                       preferred_element_type=jnp.float32).astype(o_ref.dtype)


# ----------------------------------------------------------------------------- wrappers


def prepare_params(params):
    """One-time conversion of torch-layout weights into kernel-ready layouts."""
    dim = params['w_q'].shape[0]
    heads = params['temperature'].shape[0]
    ch = dim // heads

    # Block-diagonal fused 1x1-conv weight: [x|y] (HW, 2C) @ (2C, 3C) -> [q|k|v].
    w_pw = jnp.zeros((2 * dim, 3 * dim), jnp.float32)
    w_pw = w_pw.at[:dim, :dim].set(jnp.transpose(params['w_q']))
    w_pw = w_pw.at[dim:, dim:].set(jnp.transpose(params['w_kv']))

    # Fused depthwise weights, tap-major (tap = 3*dy + dx), channels [q|k|v].
    w_dw = jnp.concatenate(
        [jnp.transpose(params['w_q_dw'].reshape(dim, 9)),
         jnp.transpose(params['w_kv_dw'].reshape(2 * dim, 9))], axis=1)

    temp_c = jnp.repeat(params['temperature'].astype(jnp.float32),
                        ch).reshape(1, dim)

    head_id = jnp.arange(dim, dtype=jnp.int32) // ch
    mask_add = jnp.where(head_id[:, None] == head_id[None, :],
                         0.0, -1e30).astype(jnp.float32)

    return {'w_pw': w_pw, 'w_dw': w_dw,
            'w_proj': jnp.transpose(params['w_proj']),
            'temp_c': temp_c, 'mask_add': mask_add}


def attention_forward(x, y, kp):
    """Forward of the PyTorch Attention module. x, y: (B, C, H, W) NCHW."""
    b, c, h, w = x.shape
    hw = h * w

    # NCHW -> pixel-major (B, HW, C); concat x and y for the fused 1x1 conv.
    x_pm = jnp.transpose(x.reshape(b, c, hw), (0, 2, 1))
    y_pm = jnp.transpose(y.reshape(b, c, hw), (0, 2, 1))
    xy = jnp.concatenate([x_pm, y_pm], axis=-1)                   # (B, HW, 2C)

    out_pm = pl.pallas_call(
        _fused_attention_kernel,
        out_shape=jax.ShapeDtypeStruct((b, hw, c), x.dtype),
        grid_spec=pltpu.PrefetchScalarGridSpec(
            num_scalar_prefetch=0,
            grid=(b,),
            in_specs=[
                pl.BlockSpec((1, hw, 2 * c), lambda i: (i, 0, 0)),
                pl.BlockSpec((2 * c, 3 * c), lambda i: (0, 0)),
                pl.BlockSpec((9, 3 * c), lambda i: (0, 0)),
                pl.BlockSpec((1, c), lambda i: (0, 0)),
                pl.BlockSpec((c, c), lambda i: (0, 0)),
                pl.BlockSpec((c, c), lambda i: (0, 0)),
            ],
            out_specs=pl.BlockSpec((1, hw, c), lambda i: (i, 0, 0)),
            scratch_shapes=[pltpu.VMEM((h, w, 3 * c), jnp.float32),
                            pltpu.VMEM((h, w, 3 * c), jnp.float32)],
        ),
        compiler_params=pltpu.CompilerParams(
            dimension_semantics=("parallel",),
            vmem_limit_bytes=32 * 1024 * 1024,
        ),
    )(xy, kp['w_pw'], kp['w_dw'], kp['temp_c'], kp['mask_add'], kp['w_proj'])

    # (B, HW, C) -> NCHW
    return jnp.transpose(out_pm, (0, 2, 1)).reshape(b, c, h, w)


# ----------------------------------------------------------------------------- reference


def ref_forward(x, y, params):
    heads = params['temperature'].shape[0]
    b, c, h, w = x.shape
    prec = jax.lax.Precision.HIGHEST

    def conv1x1(t, wgt):
        return jnp.einsum('oc,bchw->bohw', wgt, t, precision=prec)

    def dwconv(t, wgt):
        return jax.lax.conv_general_dilated(
            t, wgt[:, None, :, :], window_strides=(1, 1),
            padding=((1, 1), (1, 1)),
            dimension_numbers=('NCHW', 'OIHW', 'NCHW'),
            feature_group_count=t.shape[1], precision=prec)

    kv = dwconv(conv1x1(y, params['w_kv']), params['w_kv_dw'])
    k, v = jnp.split(kv, 2, axis=1)
    q = dwconv(conv1x1(x, params['w_q']), params['w_q_dw'])

    def heads_view(t):
        return t.reshape(b, heads, c // heads, h * w)

    q, k, v = heads_view(q), heads_view(k), heads_view(v)

    def l2n(t):
        n = jnp.sqrt(jnp.sum(t * t, axis=-1, keepdims=True))
        return t / jnp.maximum(n, 1e-12)

    q, k = l2n(q), l2n(k)
    attn = jnp.einsum('bhcd,bhed->bhce', q, k, precision=prec)
    attn = attn * params['temperature'].reshape(1, heads, 1, 1)
    attn = jax.nn.softmax(attn, axis=-1)
    out = jnp.einsum('bhce,bhed->bhcd', attn, v, precision=prec)
    out = out.reshape(b, c, h, w)
    return conv1x1(out, params['w_proj'])


# ----------------------------------------------------------------------------- main


if __name__ == "__main__":
    key = jax.random.PRNGKey(0)
    keys = jax.random.split(key, 8)

    dim, heads = 64, 8
    B, H, W = 2, 16, 16
    scale = 0.05

    params = {
        'w_q':     scale * jax.random.normal(keys[0], (dim, dim), jnp.float32),
        'w_q_dw':  scale * jax.random.normal(keys[1], (dim, 3, 3), jnp.float32),
        'w_kv':    scale * jax.random.normal(keys[2], (2 * dim, dim), jnp.float32),
        'w_kv_dw': scale * jax.random.normal(keys[3], (2 * dim, 3, 3), jnp.float32),
        'w_proj':  scale * jax.random.normal(keys[4], (dim, dim), jnp.float32),
        # learnable per-head temperature (init ones in torch); use non-trivial values
        'temperature': 0.5 + jax.random.uniform(keys[5], (heads,), jnp.float32),
    }

    x = jax.random.normal(keys[6], (B, dim, H, W), jnp.float32)
    y = jax.random.normal(keys[7], (B, dim, H, W), jnp.float32)

    kparams = prepare_params(params)            # one-time, kernel-ready layouts
    out = jax.jit(attention_forward)(x, y, kparams)
    out = jax.block_until_ready(out)

    ref = ref_forward(x, y, params)

    assert out.shape == (B, dim, H, W)
    assert out.dtype == jnp.float32
    max_err = float(jnp.max(jnp.abs(out - ref)))
    # bf16 MXU operands with f32 accumulation -> slightly looser tolerance than
    # the pure-f32 variant; structural bugs would be orders of magnitude larger.
    assert jnp.allclose(out, ref, atol=5e-3, rtol=2e-2), f"max abs err = {max_err}"

    print("KERNEL_OK")
</pallas_src>

<mosaic_0001>
module attributes {stable_mosaic.version = 11 : i64} {
  func.func @_fused_attention_kernel(%arg0: i32, %arg1: memref<1x256x128xf32, #tpu.memory_space<vmem>>, %arg2: memref<128x192xf32, #tpu.memory_space<vmem>>, %arg3: memref<9x192xf32, #tpu.memory_space<vmem>>, %arg4: memref<1x64xf32, #tpu.memory_space<vmem>>, %arg5: memref<64x64xf32, #tpu.memory_space<vmem>>, %arg6: memref<64x64xf32, #tpu.memory_space<vmem>>, %arg7: memref<1x256x64xf32, #tpu.memory_space<vmem>>, %arg8: memref<16x16x192xf32, #tpu.memory_space<vmem>>, %arg9: memref<16x16x192xf32, #tpu.memory_space<vmem>>) attributes {dimension_semantics = [#tpu.dimension_semantics<parallel>], iteration_bounds = array<i64: 2>, scalar_prefetch = 0 : i64, scratch_operands = 2 : i64, tpu.core_type = #tpu.core_type<tc>, window_params = [{transform_indices = @transform_0, window_bounds = array<i64: 1, 256, 128>}, {pipeline_mode = #tpu.pipeline_mode<synchronous>, transform_indices = @transform_1, window_bounds = array<i64: 128, 192>}, {pipeline_mode = #tpu.pipeline_mode<synchronous>, transform_indices = @transform_2, window_bounds = array<i64: 9, 192>}, {pipeline_mode = #tpu.pipeline_mode<synchronous>, transform_indices = @transform_3, window_bounds = array<i64: 1, 64>}, {pipeline_mode = #tpu.pipeline_mode<synchronous>, transform_indices = @transform_4, window_bounds = array<i64: 64, 64>}, {pipeline_mode = #tpu.pipeline_mode<synchronous>, transform_indices = @transform_5, window_bounds = array<i64: 64, 64>}, {transform_indices = @transform_6, window_bounds = array<i64: 1, 256, 64>}]} {
    %c0 = arith.constant 0 : index
    %c0_0 = arith.constant 0 : index
    %c0_1 = arith.constant 0 : index
    %0 = vector.load %arg1[%c0, %c0_0, %c0_1] : memref<1x256x128xf32, #tpu.memory_space<vmem>>, vector<1x256x128xf32>
    %1 = vector.shape_cast %0 : vector<1x256x128xf32> to vector<256x128xf32>
    %2 = arith.truncf %1 : vector<256x128xf32> to vector<256x128xbf16>
    %c0_2 = arith.constant 0 : index
    %c0_3 = arith.constant 0 : index
    %3 = vector.load %arg2[%c0_2, %c0_3] : memref<128x192xf32, #tpu.memory_space<vmem>>, vector<128x192xf32>
    %4 = arith.truncf %3 : vector<128x192xf32> to vector<128x192xbf16>
    %cst = arith.constant dense<0.000000e+00> : vector<256x192xf32>
    %5 = tpu.matmul %2, %4, %cst {dimension_numbers = #tpu.dot_dimension_numbers<[1], [0], [0], [1], [0, 0, 1, 1], [], []>} : vector<256x128xbf16>, vector<128x192xbf16>, vector<256x192xf32> -> vector<256x192xf32>
    %6 = vector.shape_cast %5 : vector<256x192xf32> to vector<16x16x192xf32>
    %c0_4 = arith.constant 0 : index
    %c0_5 = arith.constant 0 : index
    %c0_6 = arith.constant 0 : index
    %7 = vector.load %arg8[%c0_4, %c0_5, %c0_6] : memref<16x16x192xf32, #tpu.memory_space<vmem>>, vector<16x16x192xf32>
    tpu.vector_store %arg8[%c0_4, %c0_5, %c0_6], %6 {strides = array<i32>} : memref<16x16x192xf32, #tpu.memory_space<vmem>>, vector<16x16x192xf32>,
    %c0_7 = arith.constant 0 : index
    %c0_8 = arith.constant 0 : index
    %8 = vector.load %arg3[%c0_7, %c0_8] : memref<9x192xf32, #tpu.memory_space<vmem>>, vector<9x192xf32>
    %9 = tpu.iota {dimensions = array<i32: 1>} : vector<1x16x1xi32>
    %c0_9 = arith.constant 0 : index
    %c0_10 = arith.constant 0 : index
    %c0_11 = arith.constant 0 : index
    %10 = vector.load %arg8[%c0_9, %c0_10, %c0_11] : memref<16x16x192xf32, #tpu.memory_space<vmem>>, vector<16x16x192xf32>
    %11 = vector.extract_strided_slice %8 {offsets = [4, 0], sizes = [1, 192], strides = [1, 1]} : vector<9x192xf32> to vector<1x192xf32>
    %12 = vector.shape_cast %11 : vector<1x192xf32> to vector<192xf32>
    %13 = vector.shape_cast %12 : vector<192xf32> to vector<1x1x192xf32>
    %14 = vector.broadcast %13 : vector<1x1x192xf32> to vector<16x16x192xf32>
    %15 = arith.mulf %10, %14 : vector<16x16x192xf32>
    %c1_i32 = arith.constant 1 : i32
    %16 = tpu.dynamic_rotate %10 by %c1_i32 dim 1 : vector<16x16x192xf32>, i32 -> vector<16x16x192xf32>
    %c0_i32 = arith.constant 0 : i32
    %17 = vector.broadcast %c0_i32 : i32 to vector<1x16x1xi32>
    %18 = arith.cmpi eq, %9, %17 : vector<1x16x1xi32>
    %cst_12 = arith.constant 0.000000e+00 : f32
    %19 = vector.shape_cast %18 : vector<1x16x1xi1> to vector<1x16x1xi1>
    %20 = vector.broadcast %19 : vector<1x16x1xi1> to vector<16x16x192xi1>
    %21 = vector.broadcast %cst_12 : f32 to vector<16x16x192xf32>
    %22 = arith.select %20, %21, %16 : vector<16x16x192xi1>, vector<16x16x192xf32>
    %23 = vector.extract_strided_slice %8 {offsets = [3, 0], sizes = [1, 192], strides = [1, 1]} : vector<9x192xf32> to vector<1x192xf32>
    %24 = vector.shape_cast %23 : vector<1x192xf32> to vector<192xf32>
    %25 = vector.shape_cast %24 : vector<192xf32> to vector<1x1x192xf32>
    %26 = vector.broadcast %25 : vector<1x1x192xf32> to vector<16x16x192xf32>
    %27 = arith.mulf %22, %26 : vector<16x16x192xf32>
    %28 = arith.addf %15, %27 : vector<16x16x192xf32>
    %c15_i32 = arith.constant 15 : i32
    %29 = tpu.dynamic_rotate %10 by %c15_i32 dim 1 : vector<16x16x192xf32>, i32 -> vector<16x16x192xf32>
    %c15_i32_13 = arith.constant 15 : i32
    %30 = vector.broadcast %c15_i32_13 : i32 to vector<1x16x1xi32>
    %31 = arith.cmpi eq, %9, %30 : vector<1x16x1xi32>
    %cst_14 = arith.constant 0.000000e+00 : f32
    %32 = vector.shape_cast %31 : vector<1x16x1xi1> to vector<1x16x1xi1>
    %33 = vector.broadcast %32 : vector<1x16x1xi1> to vector<16x16x192xi1>
    %34 = vector.broadcast %cst_14 : f32 to vector<16x16x192xf32>
    %35 = arith.select %33, %34, %29 : vector<16x16x192xi1>, vector<16x16x192xf32>
    %36 = vector.extract_strided_slice %8 {offsets = [5, 0], sizes = [1, 192], strides = [1, 1]} : vector<9x192xf32> to vector<1x192xf32>
    %37 = vector.shape_cast %36 : vector<1x192xf32> to vector<192xf32>
    %38 = vector.shape_cast %37 : vector<192xf32> to vector<1x1x192xf32>
    %39 = vector.broadcast %38 : vector<1x1x192xf32> to vector<16x16x192xf32>
    %40 = arith.mulf %35, %39 : vector<16x16x192xf32>
    %41 = arith.addf %28, %40 : vector<16x16x192xf32>
    %c0_15 = arith.constant 0 : index
    %c0_16 = arith.constant 0 : index
    %c0_17 = arith.constant 0 : index
    %42 = vector.load %arg9[%c0_15, %c0_16, %c0_17] : memref<16x16x192xf32, #tpu.memory_space<vmem>>, vector<16x16x192xf32>
    tpu.vector_store %arg9[%c0_15, %c0_16, %c0_17], %41 {strides = array<i32>} : memref<16x16x192xf32, #tpu.memory_space<vmem>>, vector<16x16x192xf32>,
    %c0_18 = arith.constant 0 : index
    %c0_19 = arith.constant 0 : index
    %c0_20 = arith.constant 0 : index
    %43 = vector.load %arg8[%c0_18, %c0_19, %c0_20] : memref<16x16x192xf32, #tpu.memory_space<vmem>>, vector<15x16x192xf32>
    %44 = vector.extract_strided_slice %8 {offsets = [1, 0], sizes = [1, 192], strides = [1, 1]} : vector<9x192xf32> to vector<1x192xf32>
    %45 = vector.shape_cast %44 : vector<1x192xf32> to vector<192xf32>
    %46 = vector.shape_cast %45 : vector<192xf32> to vector<1x1x192xf32>
    %47 = vector.broadcast %46 : vector<1x1x192xf32> to vector<15x16x192xf32>
    %48 = arith.mulf %43, %47 : vector<15x16x192xf32>
    %c1_i32_21 = arith.constant 1 : i32
    %49 = tpu.dynamic_rotate %43 by %c1_i32_21 dim 1 : vector<15x16x192xf32>, i32 -> vector<15x16x192xf32>
    %c0_i32_22 = arith.constant 0 : i32
    %50 = vector.broadcast %c0_i32_22 : i32 to vector<1x16x1xi32>
    %51 = arith.cmpi eq, %9, %50 : vector<1x16x1xi32>
    %cst_23 = arith.constant 0.000000e+00 : f32
    %52 = vector.shape_cast %51 : vector<1x16x1xi1> to vector<1x16x1xi1>
    %53 = vector.broadcast %52 : vector<1x16x1xi1> to vector<15x16x192xi1>
    %54 = vector.broadcast %cst_23 : f32 to vector<15x16x192xf32>
    %55 = arith.select %53, %54, %49 : vector<15x16x192xi1>, vector<15x16x192xf32>
    %56 = vector.extract_strided_slice %8 {offsets = [0, 0], sizes = [1, 192], strides = [1, 1]} : vector<9x192xf32> to vector<1x192xf32>
    %57 = vector.shape_cast %56 : vector<1x192xf32> to vector<192xf32>
    %58 = vector.shape_cast %57 : vector<192xf32> to vector<1x1x192xf32>
    %59 = vector.broadcast %58 : vector<1x1x192xf32> to vector<15x16x192xf32>
    %60 = arith.mulf %55, %59 : vector<15x16x192xf32>
    %61 = arith.addf %48, %60 : vector<15x16x192xf32>
    %c15_i32_24 = arith.constant 15 : i32
    %62 = tpu.dynamic_rotate %43 by %c15_i32_24 dim 1 : vector<15x16x192xf32>, i32 -> vector<15x16x192xf32>
    %c15_i32_25 = arith.constant 15 : i32
    %63 = vector.broadcast %c15_i32_25 : i32 to vector<1x16x1xi32>
    %64 = arith.cmpi eq, %9, %63 : vector<1x16x1xi32>
    %cst_26 = arith.constant 0.000000e+00 : f32
    %65 = vector.shape_cast %64 : vector<1x16x1xi1> to vector<1x16x1xi1>
    %66 = vector.broadcast %65 : vector<1x16x1xi1> to vector<15x16x192xi1>
    %67 = vector.broadcast %cst_26 : f32 to vector<15x16x192xf32>
    %68 = arith.select %66, %67, %62 : vector<15x16x192xi1>, vector<15x16x192xf32>
    %69 = vector.extract_strided_slice %8 {offsets = [2, 0], sizes = [1, 192], strides = [1, 1]} : vector<9x192xf32> to vector<1x192xf32>
    %70 = vector.shape_cast %69 : vector<1x192xf32> to vector<192xf32>
    %71 = vector.shape_cast %70 : vector<192xf32> to vector<1x1x192xf32>
    %72 = vector.broadcast %71 : vector<1x1x192xf32> to vector<15x16x192xf32>
    %73 = arith.mulf %68, %72 : vector<15x16x192xf32>
    %74 = arith.addf %61, %73 : vector<15x16x192xf32>
    %c1 = arith.constant 1 : index
    %c0_27 = arith.constant 0 : index
    %c0_28 = arith.constant 0 : index
    %75 = vector.load %arg9[%c1, %c0_27, %c0_28] : memref<16x16x192xf32, #tpu.memory_space<vmem>>, vector<15x16x192xf32>
    %76 = arith.addf %75, %74 : vector<15x16x192xf32>
    %c1_29 = arith.constant 1 : index
    %c0_30 = arith.constant 0 : index
    %c0_31 = arith.constant 0 : index
    %77 = vector.load %arg9[%c1_29, %c0_30, %c0_31] : memref<16x16x192xf32, #tpu.memory_space<vmem>>, vector<15x16x192xf32>
    tpu.vector_store %arg9[%c1_29, %c0_30, %c0_31], %76 {strides = array<i32>} : memref<16x16x192xf32, #tpu.memory_space<vmem>>, vector<15x16x192xf32>,
    %c1_32 = arith.constant 1 : index
    %c0_33 = arith.constant 0 : index
    %c0_34 = arith.constant 0 : index
    %78 = vector.load %arg8[%c1_32, %c0_33, %c0_34] : memref<16x16x192xf32, #tpu.memory_space<vmem>>, vector<15x16x192xf32>
    %79 = vector.extract_strided_slice %8 {offsets = [7, 0], sizes = [1, 192], strides = [1, 1]} : vector<9x192xf32> to vector<1x192xf32>
    %80 = vector.shape_cast %79 : vector<1x192xf32> to vector<192xf32>
    %81 = vector.shape_cast %80 : vector<192xf32> to vector<1x1x192xf32>
    %82 = vector.broadcast %81 : vector<1x1x192xf32> to vector<15x16x192xf32>
    %83 = arith.mulf %78, %82 : vector<15x16x192xf32>
    %c1_i32_35 = arith.constant 1 : i32
    %84 = tpu.dynamic_rotate %78 by %c1_i32_35 dim 1 : vector<15x16x192xf32>, i32 -> vector<15x16x192xf32>
    %c0_i32_36 = arith.constant 0 : i32
    %85 = vector.broadcast %c0_i32_36 : i32 to vector<1x16x1xi32>
    %86 = arith.cmpi eq, %9, %85 : vector<1x16x1xi32>
    %cst_37 = arith.constant 0.000000e+00 : f32
    %87 = vector.shape_cast %86 : vector<1x16x1xi1> to vector<1x16x1xi1>
    %88 = vector.broadcast %87 : vector<1x16x1xi1> to vector<15x16x192xi1>
    %89 = vector.broadcast %cst_37 : f32 to vector<15x16x192xf32>
    %90 = arith.select %88, %89, %84 : vector<15x16x192xi1>, vector<15x16x192xf32>
    %91 = vector.extract_strided_slice %8 {offsets = [6, 0], sizes = [1, 192], strides = [1, 1]} : vector<9x192xf32> to vector<1x192xf32>
    %92 = vector.shape_cast %91 : vector<1x192xf32> to vector<192xf32>
    %93 = vector.shape_cast %92 : vector<192xf32> to vector<1x1x192xf32>
    %94 = vector.broadcast %93 : vector<1x1x192xf32> to vector<15x16x192xf32>
    %95 = arith.mulf %90, %94 : vector<15x16x192xf32>
    %96 = arith.addf %83, %95 : vector<15x16x192xf32>
    %c15_i32_38 = arith.constant 15 : i32
    %97 = tpu.dynamic_rotate %78 by %c15_i32_38 dim 1 : vector<15x16x192xf32>, i32 -> vector<15x16x192xf32>
    %c15_i32_39 = arith.constant 15 : i32
    %98 = vector.broadcast %c15_i32_39 : i32 to vector<1x16x1xi32>
    %99 = arith.cmpi eq, %9, %98 : vector<1x16x1xi32>
    %cst_40 = arith.constant 0.000000e+00 : f32
    %100 = vector.shape_cast %99 : vector<1x16x1xi1> to vector<1x16x1xi1>
    %101 = vector.broadcast %100 : vector<1x16x1xi1> to vector<15x16x192xi1>
    %102 = vector.broadcast %cst_40 : f32 to vector<15x16x192xf32>
    %103 = arith.select %101, %102, %97 : vector<15x16x192xi1>, vector<15x16x192xf32>
    %104 = vector.extract_strided_slice %8 {offsets = [8, 0], sizes = [1, 192], strides = [1, 1]} : vector<9x192xf32> to vector<1x192xf32>
    %105 = vector.shape_cast %104 : vector<1x192xf32> to vector<192xf32>
    %106 = vector.shape_cast %105 : vector<192xf32> to vector<1x1x192xf32>
    %107 = vector.broadcast %106 : vector<1x1x192xf32> to vector<15x16x192xf32>
    %108 = arith.mulf %103, %107 : vector<15x16x192xf32>
    %109 = arith.addf %96, %108 : vector<15x16x192xf32>
    %c0_41 = arith.constant 0 : index
    %c0_42 = arith.constant 0 : index
    %c0_43 = arith.constant 0 : index
    %110 = vector.load %arg9[%c0_41, %c0_42, %c0_43] : memref<16x16x192xf32, #tpu.memory_space<vmem>>, vector<15x16x192xf32>
    %111 = arith.addf %110, %109 : vector<15x16x192xf32>
    %c0_44 = arith.constant 0 : index
    %c0_45 = arith.constant 0 : index
    %c0_46 = arith.constant 0 : index
    %112 = vector.load %arg9[%c0_44, %c0_45, %c0_46] : memref<16x16x192xf32, #tpu.memory_space<vmem>>, vector<15x16x192xf32>
    tpu.vector_store %arg9[%c0_44, %c0_45, %c0_46], %111 {strides = array<i32>} : memref<16x16x192xf32, #tpu.memory_space<vmem>>, vector<15x16x192xf32>,
    %c0_47 = arith.constant 0 : index
    %c0_48 = arith.constant 0 : index
    %c0_49 = arith.constant 0 : index
    %113 = vector.load %arg9[%c0_47, %c0_48, %c0_49] : memref<16x16x192xf32, #tpu.memory_space<vmem>>, vector<16x16x192xf32>
    %114 = vector.shape_cast %113 : vector<16x16x192xf32> to vector<256x192xf32>
    %115 = vector.extract_strided_slice %114 {offsets = [0, 0], sizes = [256, 64], strides = [1, 1]} : vector<256x192xf32> to vector<256x64xf32>
    %116 = vector.extract_strided_slice %114 {offsets = [0, 64], sizes = [256, 64], strides = [1, 1]} : vector<256x192xf32> to vector<256x64xf32>
    %117 = vector.extract_strided_slice %114 {offsets = [0, 128], sizes = [256, 64], strides = [1, 1]} : vector<256x192xf32> to vector<256x64xf32>
    %c0_50 = arith.constant 0 : index
    %c0_51 = arith.constant 0 : index
    %118 = vector.load %arg4[%c0_50, %c0_51] : memref<1x64xf32, #tpu.memory_space<vmem>>, vector<1x64xf32>
    %119 = arith.mulf %115, %115 : vector<256x64xf32>
    %cst_52 = arith.constant dense<0.000000e+00> : vector<64xf32>
    %120 = vector.multi_reduction <add>, %119, %cst_52 [0] : vector<256x64xf32> to vector<64xf32>
    %121 = vector.shape_cast %120 : vector<64xf32> to vector<1x64xf32>
    %cst_53 = arith.constant 1.000000e-24 : f32
    %122 = vector.broadcast %cst_53 : f32 to vector<1x64xf32>
    %123 = arith.maximumf %121, %122 : vector<1x64xf32>
    %124 = math.rsqrt %123 : vector<1x64xf32>
    %125 = arith.mulf %118, %124 : vector<1x64xf32>
    %126 = arith.mulf %116, %116 : vector<256x64xf32>
    %cst_54 = arith.constant dense<0.000000e+00> : vector<64xf32>
    %127 = vector.multi_reduction <add>, %126, %cst_54 [0] : vector<256x64xf32> to vector<64xf32>
    %128 = vector.shape_cast %127 : vector<64xf32> to vector<1x64xf32>
    %cst_55 = arith.constant 1.000000e-24 : f32
    %129 = vector.broadcast %cst_55 : f32 to vector<1x64xf32>
    %130 = arith.maximumf %128, %129 : vector<1x64xf32>
    %131 = math.rsqrt %130 : vector<1x64xf32>
    %132 = vector.broadcast %125 : vector<1x64xf32> to vector<256x64xf32>
    %133 = arith.mulf %115, %132 : vector<256x64xf32>
    %134 = arith.truncf %133 : vector<256x64xf32> to vector<256x64xbf16>
    %135 = vector.broadcast %131 : vector<1x64xf32> to vector<256x64xf32>
    %136 = arith.mulf %116, %135 : vector<256x64xf32>
    %137 = arith.truncf %136 : vector<256x64xf32> to vector<256x64xbf16>
    %cst_56 = arith.constant dense<0.000000e+00> : vector<64x64xf32>
    %138 = tpu.matmul %134, %137, %cst_56 {dimension_numbers = #tpu.dot_dimension_numbers<[0], [0], [1], [1], [0, 1, 1, 1], [], []>} : vector<256x64xbf16>, vector<256x64xbf16>, vector<64x64xf32> -> vector<64x64xf32>
    %c0_57 = arith.constant 0 : index
    %c0_58 = arith.constant 0 : index
    %139 = vector.load %arg5[%c0_57, %c0_58] : memref<64x64xf32, #tpu.memory_space<vmem>>, vector<64x64xf32>
    %140 = arith.addf %138, %139 : vector<64x64xf32>
    %cst_59 = arith.constant dense<0xFF800000> : vector<64xf32>
    %141 = vector.multi_reduction <maximumf>, %140, %cst_59 [1] : vector<64x64xf32> to vector<64xf32>
    %142 = vector.shape_cast %141 : vector<64xf32> to vector<64x1xf32>
    %143 = vector.broadcast %142 : vector<64x1xf32> to vector<64x64xf32>
    %144 = arith.subf %140, %143 : vector<64x64xf32>
    %145 = math.exp %144 : vector<64x64xf32>
    %cst_60 = arith.constant dense<0.000000e+00> : vector<64xf32>
    %146 = vector.multi_reduction <add>, %145, %cst_60 [1] : vector<64x64xf32> to vector<64xf32>
    %147 = vector.shape_cast %146 : vector<64xf32> to vector<64x1xf32>
    %148 = tpu.reciprocal %147 {approx = true} : vector<64x1xf32> -> vector<64x1xf32>
    %149 = vector.broadcast %148 : vector<64x1xf32> to vector<64x64xf32>
    %150 = arith.mulf %145, %149 : vector<64x64xf32>
    %151 = arith.truncf %117 : vector<256x64xf32> to vector<256x64xbf16>
    %152 = arith.truncf %150 : vector<64x64xf32> to vector<64x64xbf16>
    %cst_61 = arith.constant dense<0.000000e+00> : vector<256x64xf32>
    %153 = tpu.matmul %151, %152, %cst_61 {dimension_numbers = #tpu.dot_dimension_numbers<[1], [1], [0], [0], [0, 0, 1, 0], [], []>} : vector<256x64xbf16>, vector<64x64xbf16>, vector<256x64xf32> -> vector<256x64xf32>
    %154 = arith.truncf %153 : vector<256x64xf32> to vector<256x64xbf16>
    %c0_62 = arith.constant 0 : index
    %c0_63 = arith.constant 0 : index
    %155 = vector.load %arg6[%c0_62, %c0_63] : memref<64x64xf32, #tpu.memory_space<vmem>>, vector<64x64xf32>
    %156 = arith.truncf %155 : vector<64x64xf32> to vector<64x64xbf16>
    %cst_64 = arith.constant dense<0.000000e+00> : vector<256x64xf32>
    %157 = tpu.matmul %154, %156, %cst_64 {dimension_numbers = #tpu.dot_dimension_numbers<[1], [0], [0], [1], [0, 0, 1, 1], [], []>} : vector<256x64xbf16>, vector<64x64xbf16>, vector<256x64xf32> -> vector<256x64xf32>
    %c0_65 = arith.constant 0 : index
    %c0_66 = arith.constant 0 : index
    %c0_67 = arith.constant 0 : index
    %158 = vector.load %arg7[%c0_65, %c0_66, %c0_67] : memref<1x256x64xf32, #tpu.memory_space<vmem>>, vector<1x256x64xf32>
    %159 = vector.shape_cast %158 : vector<1x256x64xf32> to vector<256x64xf32>
    %160 = vector.shape_cast %157 : vector<256x64xf32> to vector<1x256x64xf32>
    tpu.vector_store %arg7[%c0_65, %c0_66, %c0_67], %160 {strides = array<i32>} : memref<1x256x64xf32, #tpu.memory_space<vmem>>, vector<1x256x64xf32>,
    return
  }
  func.func @transform_0(%arg0: i32) -> (i32, i32, i32) {
    %c0_i32 = arith.constant 0 : i32
    %c0_i32_0 = arith.constant 0 : i32
    %c0_i32_1 = arith.constant 0 : i32
    return %arg0, %c0_i32, %c0_i32_0 : i32, i32, i32
  }
  func.func @transform_1(%arg0: i32) -> (i32, i32) {
    %c0_i32 = arith.constant 0 : i32
    %c0_i32_0 = arith.constant 0 : i32
    %c0_i32_1 = arith.constant 0 : i32
    return %c0_i32, %c0_i32_0 : i32, i32
  }
  func.func @transform_2(%arg0: i32) -> (i32, i32) {
    %c0_i32 = arith.constant 0 : i32
    %c0_i32_0 = arith.constant 0 : i32
    %c0_i32_1 = arith.constant 0 : i32
    return %c0_i32, %c0_i32_0 : i32, i32
  }
  func.func @transform_3(%arg0: i32) -> (i32, i32) {
    %c0_i32 = arith.constant 0 : i32
    %c0_i32_0 = arith.constant 0 : i32
    %c0_i32_1 = arith.constant 0 : i32
    return %c0_i32, %c0_i32_0 : i32, i32
  }
  func.func @transform_4(%arg0: i32) -> (i32, i32) {
    %c0_i32 = arith.constant 0 : i32
    %c0_i32_0 = arith.constant 0 : i32
    %c0_i32_1 = arith.constant 0 : i32
    return %c0_i32, %c0_i32_0 : i32, i32
  }
  func.func @transform_5(%arg0: i32) -> (i32, i32) {
    %c0_i32 = arith.constant 0 : i32
    %c0_i32_0 = arith.constant 0 : i32
    %c0_i32_1 = arith.constant 0 : i32
    return %c0_i32, %c0_i32_0 : i32, i32
  }
  func.func @transform_6(%arg0: i32) -> (i32, i32, i32) {
    %c0_i32 = arith.constant 0 : i32
    %c0_i32_0 = arith.constant 0 : i32
    %c0_i32_1 = arith.constant 0 : i32
    return %arg0, %c0_i32, %c0_i32_0 : i32, i32, i32
  }
}

</mosaic_0001>

<bundles_post_ra>
// kernel: attention_forward.1
= control target key start
LH: loop header
LB: loop body
LE: loop exit
PB: predicated region body
PF: predicated region fallthrough
CT: control target
= control target key end

     0   :  { %11 = vsyncpa [#allocation5], 0  ;;  %s7509_s0 = inlined_call_operand.vmem [shape: f32[2,256,128], index: 0, kind: input, shape index: {}]   ;;  %s7510_s1 = inlined_call_operand.vmem [shape: f32[128,192], index: 1, kind: input, shape index: {}]   ;;  %s7511_s2 = inlined_call_operand.vmem [shape: f32[9,192], index: 2, kind: input, shape index: {}]   ;;  %s7512_s3 = inlined_call_operand.vmem [shape: f32[1,64], index: 3, kind: input, shape index: {}]   ;;  %s7513_s4 = inlined_call_operand.vmem [shape: f32[64,64], index: 4, kind: input, shape index: {}]   ;;  %s7514_s5 = inlined_call_operand.vmem [shape: f32[64,64], index: 5, kind: input, shape index: {}]   ;;  %s7515_s6 = inlined_call_operand.hbm [shape: f32[2,256,64], index: 6, kind: output, shape index: {}]  }
   0x1   :  { %13 = vsyncpa [#allocation5 + $0x1], 0  ;;  %s4945_s21 = smov 0   ;;  %s4947_s22 = smov 0  }
   0x2   :  { %s4949_s23 = smov 0   ;;  %s4951_s24 = smov 0  }
   0x3 LB: > { %s4966_s25 = sadd.s32 4294967295, %s4903_s24   ;;  %s4518_s26 = sadd.s32 4294967294, %s4903_s24   ;;  %s4903_s24 = sphi %s4951_s24, %s7562_s24   ;;  %s4899_s23 = sphi %s4949_s23, %s7561_s23   ;;  %s4895_s22 = sphi %s4947_s22, %s7560_s22   ;;  %s4891_s21 = sphi %s4945_s21, %s7559_s21  }
   0x4   : > { %s4970_s27 = sadd.s32 1, %s4903_s24   ;;  %s157_s28 = sadd.s32 1, %s4899_s23 }
   0x5   : > { %s154_s29 = ssub.s32 %s4903_s24, %s4970_s27  ;;  %p167_p0 = scmp.ne.s32.totalorder %s4899_s23, %s4895_s22 }
   0x6   : > { %p155_p1 = scmp.eq.s32.totalorder %s154_s29, 0  ;;  %p168_p2 = scmp.eq.s32.totalorder %s4966_s25, 1 }
   0x7   : > { %p173_p3 = scmp.ne.s32.totalorder %s4895_s22, %s4891_s21  ;;  %p174_p4 = scmp.eq.s32.totalorder %s4518_s26, 1 }
   0x8   : > { %s4981_s30 = scalar_select %p155_p1, %s4899_s23, %s157_s28  }
   0x9   : > { %p4983_p5 = por %p168_p2, %p167_p0  ;;  %p4987_p6 = por %p174_p4, %p173_p3 }
   0xa   : > { %p4521_p7 = scmp.ge.s32.totalorder %s4903_s24, 1  ;;  %p215_p8 = scmp.lt.s32.totalorder %s4903_s24, 3 }
   0xc   : > { %p216_p9 = pnand %p4521_p7, %p215_p8 }
   0xe   : > { %219 = sbr.rel (%p216_p9) target bundleno = 1893 (0x765), region = 44 }
  0x13   : > { %v328_v0 = vld [vmem:[%s7510_s1 + $0xe8] sm:$0xff]  ;;  %v330_v1 = vld [vmem:[%s7510_s1 + $0xf8] sm:$0xff]  ;;  %v327_v2 = vld [vmem:[%s7510_s1 + $0xe0] sm:$0xff]  ;;  %v4905_v7 = vmov 0   ;;  %p245_p10 = scmp.lt.s32.totalorder %s4966_s25, 1  ;;  %vm541_vm0 = vcmask 523264  }
  0x14   : > { %v346_v3 = vpack.c.bf16 %v330_v1, %v328_v0  ;;  %v329_v4 = vld [vmem:[%s7510_s1 + $0xf0] sm:$0xff]  ;;  %v324_v5 = vld [vmem:[%s7510_s1 + $0xc8] sm:$0xff]  ;;  %v326_v6 = vld [vmem:[%s7510_s1 + $0xd8] sm:$0xff]  ;;  %379 = vmatprep.mubr.bf16.mxu0 %v4905_v7  ;;  %vm3501_vm5 = vcmask 1048064   ;;  %s4906_s19 = smov 64   ;;  %s242_s9 = sand.u32 1, %s4895_s22  }
  0x15   : > { %v345_v8 = vpack.c.bf16 %v329_v4, %v327_v2  ;;  %v344_v9 = vpack.c.bf16 %v326_v6, %v324_v5  ;;  %v323_v10 = vld [vmem:[%s7510_s1 + $0xc0] sm:$0xff]  ;;  %v325_v11 = vld [vmem:[%s7510_s1 + $0xd0] sm:$0xff]  ;;  %v320_v12 = vld [vmem:[%s7510_s1 + $0xa8] sm:$0xff]  ;;  %s246_s16 = scalar_select %p245_p10, %s4966_s25, 1 }
  0x16   : > { %347 = vmatprep.subr.bf16.mxu0 %v346_v3  ;;  %v322_v13 = vld [vmem:[%s7510_s1 + $0xb8] sm:$0xff]  ;;  %v343_v14 = vpack.c.bf16 %v325_v11, %v323_v10  ;;  %v319_v16 = vld [vmem:[%s7510_s1 + $0xa0] sm:$0xff]  ;;  %v321_v17 = vld [vmem:[%s7510_s1 + $0xb0] sm:$0xff]  ;;  %s4565_s12 = sshll.u32 %s4966_s25, 12  ;;  %s7469_s25 = scalar_lea.sflag [#allocation5], %s242_s9 }
  0x17   : > { %348 = vmatpush1.bf16.msra.mxu0 %v345_v8  ;;  %v342_v15 = vpack.c.bf16 %v322_v13, %v320_v12  ;;  %v316_v18 = vld [vmem:[%s7510_s1 + $0x88] sm:$0xff]  ;;  %v318_v19 = vld [vmem:[%s7510_s1 + $0x98] sm:$0xff]  ;;  %v341_v20 = vpack.c.bf16 %v321_v17, %v319_v16  ;;  %v315_v22 = vld [vmem:[%s7510_s1 + $0x80] sm:$0xff]  ;;  %s4564_s10 = sshll.u32 %s246_s16, 8  ;;  %s7459_s17 = scalar_lea.hbm %s7515_s6, %s4565_s12 }
  0x18   : > { %349 = vmatprep.subr.bf16.mxu0 %v344_v9  ;;  %v340_v21 = vpack.c.bf16 %v318_v19, %v316_v18  ;;  %v317_v23 = vld [vmem:[%s7510_s1 + $0x90] sm:$0xff]  ;;  %v312_v24 = vld [vmem:[%s7510_s1 + $0x68] sm:$0xff]  ;;  %v314_v25 = vld [vmem:[%s7510_s1 + $0x78] sm:$0xff]  ;;  %s5095_s18 = scalar_lea.vmem %s7509_s0, %s4564_s10  ;;  %s4522_s10 = sshll.u32 %s242_s9, 8 }
  0x19   : > { %v339_v26 = vpack.c.bf16 %v317_v23, %v315_v22  ;;  %v338_v27 = vpack.c.bf16 %v314_v25, %v312_v24  ;;  %v311_v28 = vld [vmem:[%s7510_s1 + $0x60] sm:$0xff]  ;;  %v313_v29 = vld [vmem:[%s7510_s1 + $0x70] sm:$0xff]  ;;  %v308_v30 = vld [vmem:[%s7510_s1 + $0x48] sm:$0xff]  ;;  %s7392_s11 = scalar_lea.vmem [#allocation4], %s4522_s10  ;;  %s4907_s16 = smov [#allocation4]  }
  0x1a   : > { %v310_v31 = vld [vmem:[%s7510_s1 + $0x58] sm:$0xff]  ;;  %v337_v32 = vpack.c.bf16 %v313_v29, %v311_v28  ;;  %v307_v34 = vld [vmem:[%s7510_s1 + $0x40] sm:$0xff]  ;;  %v309_v35 = vld [vmem:[%s7510_s1 + $0x50] sm:$0xff]  ;;  %s4456_s13 = sshll.u32 %s7392_s11, 4  ;;  %s7461_s13 = int_to_ptr.vmem [resolvable:$true] %s4456_s13 }
  0x1b   : > { %350 = vmatpush1.bf16.msra.mxu0 %v343_v14  ;;  %v336_v33 = vpack.c.bf16 %v310_v31, %v308_v30  ;;  %v304_v36 = vld [vmem:[%s7510_s1 + $0x28] sm:$0xff]  ;;  %v306_v37 = vld [vmem:[%s7510_s1 + $0x38] sm:$0xff]  ;;  %v335_v38 = vpack.c.bf16 %v309_v35, %v307_v34  ;;  %v303_v40 = vld [vmem:[%s7510_s1 + $0x20] sm:$0xff]  ;;  %v609_v34 = vlaneseq }
  0x1c   : > { %351 = vmatprep.subr.bf16.mxu0 %v342_v15  ;;  %v334_v39 = vpack.c.bf16 %v306_v37, %v304_v36  ;;  %v305_v41 = vld [vmem:[%s7510_s1 + $0x30] sm:$0xff]  ;;  %v300_v42 = vld [vmem:[%s7510_s1 + $0x8] sm:$0xff]  ;;  %v302_v43 = vld [vmem:[%s7510_s1 + $0x18] sm:$0xff] }
  0x1d   : > { %v333_v44 = vpack.c.bf16 %v305_v41, %v303_v40  ;;  %v332_v45 = vpack.c.bf16 %v302_v43, %v300_v42  ;;  %v299_v46 = vld [vmem:[%s7510_s1] sm:$0xff]  ;;  %v301_v47 = vld [vmem:[%s7510_s1 + $0x10] sm:$0xff]  ;;  %v252_v50 = vld [vmem:[%s5095_s18 + $0x8] sm:$0xff]  ;;  %v5144_v35 = vshrl.u32 %v609_v34, 7 }
  0x1e   : > { %v331_v48 = vpack.c.bf16 %v301_v47, %v299_v46  ;;  %v251_v49 = vld [vmem:[%s5095_s18] sm:$0xff]  ;;  %v253_v52 = vld [vmem:[%s5095_s18 + $0x10] sm:$0xff]  ;;  %v254_v53 = vld [vmem:[%s5095_s18 + $0x18] sm:$0xff] }
  0x1f   : > { %352 = vmatpush1.bf16.msra.mxu0 %v341_v20  ;;  %v283_v51 = vpack.c.bf16 %v252_v50, %v251_v49  ;;  %v284_v54 = vpack.c.bf16 %v254_v53, %v253_v52  ;;  %v255_v55 = vld [vmem:[%s5095_s18 + $0x20] sm:$0xff]  ;;  %v256_v56 = vld [vmem:[%s5095_s18 + $0x28] sm:$0xff]  ;;  %v257_v58 = vld [vmem:[%s5095_s18 + $0x30] sm:$0xff]  ;;  %v678_v36 = vsub.s32 4, %v5144_v35  ;;  %v1284_v40 = vsub.s32 5, %v5144_v35 }
  0x20   : > { %353 = vmatprep.subr.bf16.mxu0 %v340_v21  ;;  %v285_v57 = vpack.c.bf16 %v256_v56, %v255_v55  ;;  %v258_v59 = vld [vmem:[%s5095_s18 + $0x38] sm:$0xff]  ;;  %v259_v61 = vld [vmem:[%s5095_s18 + $0x40] sm:$0xff]  ;;  %v260_v62 = vld [vmem:[%s5095_s18 + $0x48] sm:$0xff]  ;;  %v5157_v42 = vadd.s32 8, %v5144_v35  ;;  %v2100_v43 = vsub.s32 2, %v5144_v35  ;;  %vm812_vm1 = vcmp.lt.s32.totalorder %v5144_v35, 1 }
  0x21   : > { %v286_v60 = vpack.c.bf16 %v258_v59, %v257_v58  ;;  %v287_v63 = vpack.c.bf16 %v260_v62, %v259_v61  ;;  %v261_v0 = vld [vmem:[%s5095_s18 + $0x50] sm:$0xff]  ;;  %v262_v1 = vld [vmem:[%s5095_s18 + $0x58] sm:$0xff]  ;;  %v263_v3 = vld [vmem:[%s5095_s18 + $0x60] sm:$0xff]  ;;  %v2470_v49 = vsub.s32 7, %v5144_v35  ;;  %vm877_vm2 = vcmp.eq.s32.totalorder %v5144_v35, 0 }
  0x22   : > { %v288_v2 = vpack.c.bf16 %v262_v1, %v261_v0  ;;  %v264_v4 = vld [vmem:[%s5095_s18 + $0x68] sm:$0xff]  ;;  %v265_v6 = vld [vmem:[%s5095_s18 + $0x70] sm:$0xff]  ;;  %v266_v8 = vld [vmem:[%s5095_s18 + $0x78] sm:$0xff]  ;;  %vm1147_vm3 = vcmp.lt.s32.totalorder %v5144_v35, 7  ;;  %vm1213_vm4 = vcmp.eq.s32.totalorder %v5157_v42, 15 }
  0x23   : > { %354 = vmatpush1.bf16.msra.mxu0 %v339_v26  ;;  %v289_v5 = vpack.c.bf16 %v264_v4, %v263_v3  ;;  %v290_v9 = vpack.c.bf16 %v266_v8, %v265_v6  ;;  %v267_v10 = vld [vmem:[%s5095_s18 + $0x80] sm:$0xff]  ;;  %v268_v11 = vld [vmem:[%s5095_s18 + $0x88] sm:$0xff]  ;;  %v269_v13 = vld [vmem:[%s5095_s18 + $0x90] sm:$0xff]  ;;  %v2718_v4 = vsub.s32 6, %v5144_v35 }
  0x24   : > { %355 = vmatprep.subr.bf16.mxu0 %v338_v27  ;;  %v291_v12 = vpack.c.bf16 %v268_v11, %v267_v10  ;;  %v270_v14 = vld [vmem:[%s5095_s18 + $0x98] sm:$0xff]  ;;  %v271_v16 = vld [vmem:[%s5095_s18 + $0xa0] sm:$0xff]  ;;  %v272_v17 = vld [vmem:[%s5095_s18 + $0xa8] sm:$0xff] }
  0x25   : > { %v292_v15 = vpack.c.bf16 %v270_v14, %v269_v13  ;;  %v293_v18 = vpack.c.bf16 %v272_v17, %v271_v16  ;;  %v273_v19 = vld [vmem:[%s5095_s18 + $0xb0] sm:$0xff]  ;;  %v274_v20 = vld [vmem:[%s5095_s18 + $0xb8] sm:$0xff]  ;;  %v275_v22 = vld [vmem:[%s5095_s18 + $0xc0] sm:$0xff] }
  0x26   : > { %v294_v21 = vpack.c.bf16 %v274_v20, %v273_v19  ;;  %v276_v23 = vld [vmem:[%s5095_s18 + $0xc8] sm:$0xff]  ;;  %v277_v25 = vld [vmem:[%s5095_s18 + $0xd0] sm:$0xff]  ;;  %v278_v26 = vld [vmem:[%s5095_s18 + $0xd8] sm:$0xff] }
  0x27   : > { %356 = vmatpush1.bf16.msra.mxu0 %v337_v32  ;;  %v295_v24 = vpack.c.bf16 %v276_v23, %v275_v22  ;;  %v296_v27 = vpack.c.bf16 %v278_v26, %v277_v25  ;;  %v279_v28 = vld [vmem:[%s5095_s18 + $0xe0] sm:$0xff]  ;;  %v280_v29 = vld [vmem:[%s5095_s18 + $0xe8] sm:$0xff]  ;;  %v281_v31 = vld [vmem:[%s5095_s18 + $0xf0] sm:$0xff] }
  0x28   : > { %357 = vmatprep.subr.bf16.mxu0 %v336_v33  ;;  %v297_v30 = vpack.c.bf16 %v280_v29, %v279_v28  ;;  %v282_v32 = vld [vmem:[%s5095_s18 + $0xf8] sm:$0xff]  ;;  %v605_v37 = vld [vmem:[%s7511_s2] sm:$0xff]  ;;  %s4843_s18 = scalar_lea.vmem %s7461_s13, 4096 }
  0x29   : > { %v298_v33 = vpack.c.bf16 %v282_v32, %v281_v31  ;;  %v5174_v50 = vrot.slane %v605_v37, %v1284_v40  ;;  %v5184_v55 = vrot.slane %v605_v37, %v2100_v43  ;;  %v5193_v0 = vrot.slane %v605_v37, %v2470_v49  ;;  %p4844_p11 = scmp.ne.s32.totalorder %s7461_s13, %s4843_s18 }
  0x2a   : > { %v5224_v23 = vrot.slane %v605_v37, %v2718_v4 }
  0x2b   : > { %358 = vmatpush1.bf16.msra.mxu0 %v335_v38  ;;  %v1544_v38 = vsub.s32 1, %v5144_v35  ;;  %7537 = vst [vmem:[#allocation9_spill] sm:$0xff] %v5174_v50  ;;  %7540 = vst [vmem:[#allocation12_spill] sm:$0xff] %v5193_v0  ;;  %p4845_p12 = pnand %p4844_p11, %p4983_p5 }
  0x2c   : > { %359 = vmatprep.subr.bf16.mxu0 %v334_v39  ;;  %v949_v39 = vsub.s32 3, %v5144_v35 }
  0x2d   : > { %v5165_v46 = vrot.slane %v605_v37, %v1544_v38  ;;  %p4846_p13 = pneg %p4845_p12 }
  0x2f   : > { %360 = vmatpush1.bf16.msra.mxu0 %v333_v44  ;;  %v5160_v44 = vrot.slane %v605_v37, %v678_v36 }
  0x30   : > { %361 = vmatprep.subr.bf16.mxu0 %v332_v45  ;;  %v606_v45 = vld [vmem:[%s7511_s2 + $0x8] sm:$0xff] }
  0x31   : > { %v5179_v52 = vrot.slane %v606_v45, %v678_v36  ;;  %v5181_v53 = vrot.slane %v606_v45, %v1544_v38  ;;  %v5186_v61 = vrot.slane %v606_v45, %v949_v39  ;;  %v5188_v62 = vrot.slane %v606_v45, %v1284_v40 }
  0x32   : > { %v5214_v13 = vrot.slane %v606_v45, %v2100_v43  ;;  %v5216_v14 = vrot.slane %v606_v45, %v2470_v49 }
  0x33   : > { %362 = vmatpush1.bf16.msra.mxu0 %v331_v48  ;;  %v5168_v48 = vrot.slane %v605_v37, %v949_v39  ;;  %7539 = vst [vmem:[#allocation11_spill] sm:$0xff] %v5179_v52 }
  0x35   : > { %7536 = vst [vmem:[#allocation8_spill] sm:$0xff] %v5168_v48 }
  0x36   : > { %380 = vmatmul.mubr.bf16.vlgmr.msra.gmra.mxu0 %v283_v51 }
  0x37   : > { %389 = vmatprep.mubr.bf16.mxu0 %v4905_v7 }
  0x3e   : > { %390 = vmatmul.mubr.bf16.gmra.mxu0 %v284_v54 }
  0x3f   : > { %399 = vmatprep.mubr.bf16.mxu0 %v4905_v7 }
  0x46   : > { %400 = vmatmul.mubr.bf16.gmra.mxu0 %v285_v57 }
  0x47   : > { %409 = vmatprep.mubr.bf16.mxu0 %v4905_v7 }
  0x4e   : > { %410 = vmatmul.mubr.bf16.gmra.mxu0 %v286_v60 }
  0x4f   : > { %419 = vmatprep.mubr.bf16.mxu0 %v4905_v7 }
  0x56   : > { %420 = vmatmul.mubr.bf16.gmra.mxu0 %v287_v63 }
  0x57   : > { %429 = vmatprep.mubr.bf16.mxu0 %v4905_v7 }
  0x5e   : > { %430 = vmatmul.mubr.bf16.gmra.mxu0 %v288_v2 }
  0x5f   : > { %439 = vmatprep.mubr.bf16.mxu0 %v4905_v7 }
  0x66   : > { %440 = vmatmul.mubr.bf16.gmra.mxu0 %v289_v5 }
  0x67   : > { %449 = vmatprep.mubr.bf16.mxu0 %v4905_v7 }
  0x6e   : > { %450 = vmatmul.mubr.bf16.gmra.mxu0 %v290_v9 }
  0x6f   : > { %459 = vmatprep.mubr.bf16.mxu0 %v4905_v7 }
  0x76   : > { %460 = vmatmul.mubr.bf16.gmra.mxu0 %v291_v12 }
  0x77   : > { %469 = vmatprep.mubr.bf16.mxu0 %v4905_v7 }
  0x7e   : > { %470 = vmatmul.mubr.bf16.gmra.mxu0 %v292_v15 }
  0x7f   : > { %479 = vmatprep.mubr.bf16.mxu0 %v4905_v7 }
  0x86   : > { %480 = vmatmul.mubr.bf16.gmra.mxu0 %v293_v18 }
  0x87   : > { %489 = vmatprep.mubr.bf16.mxu0 %v4905_v7 }
  0x8e   : > { %490 = vmatmul.mubr.bf16.gmra.mxu0 %v294_v21 }
  0x8f   : > { %499 = vmatprep.mubr.bf16.mxu0 %v4905_v7 }
  0x96   : > { %500 = vmatmul.mubr.bf16.gmra.mxu0 %v295_v24  ;;  %v5226_v24 = vrot.slane %v606_v45, %v2718_v4 }
  0x97   : > { %509 = vmatprep.mubr.bf16.mxu0 %v4905_v7 }
  0x9e   : > { %510 = vmatmul.mubr.bf16.gmra.mxu0 %v296_v27 }
  0x9f   : > { %519 = vmatprep.mubr.bf16.mxu0 %v4905_v7 }
  0xa6   : > { %520 = vmatmul.mubr.bf16.gmra.mxu0 %v297_v30 }
  0xa7   : > { %529 = vmatprep.mubr.bf16.mxu0 %v4905_v7  ;;  %v5154_v7 = vsub.s32 0, %v5144_v35 }
  0xa9   : > { %7535 = vst [vmem:[#allocation7_spill] sm:$0xff] %v5154_v7  ;;  %v5177_v51 = vrot.slane %v605_v37, %v5154_v7  ;;  %v5191_v63 = vrot.slane %v606_v45, %v5154_v7 }
  0xab   : > { %7538 = vst [vmem:[#allocation10_spill] sm:$0xff] %v5177_v51 }
  0xae   : > { %530 = vmatmul.mubr.bf16.gmra.mxu0 %v298_v33 }
  0xf6   : > { %v381_v41 = vpop.f32.mrf.mxu0 }
  0xf7   : > { %v748_v56 = vrot.slane %v381_v41, 7  ;;  %v1083_v57 = vrot.slane %v381_v41, 1  ;;  %v684_v15 = vmul.f32 %v5160_v44, %v381_v41  ;;  %v1550_v21 = vmul.f32 %v5165_v46, %v381_v41 }
  0xf8   : > { %v383_v47 = vpop.f32.mrf.mxu0 }
  0xf9   : > { %542 = vst.msk [vmem:[#allocation2 + $0x8] sm:$0xff] %vm541_vm0, %v383_v47 }
  0xfa   : > { %v385_v54 = vpop.f32.mrf.mxu0 }
  0xfb   : > { %v780_v58 = vrot.slane %v385_v54, 7  ;;  %v1115_v59 = vrot.slane %v385_v54, 1  ;;  %v686_v5 = vmul.f32 %v5160_v44, %v385_v54  ;;  %v1552_v27 = vmul.f32 %v5165_v46, %v385_v54 }
  0xfc   : > { %v387_v60 = vpop.f32.mrf.mxu0 }
  0xfd   : > { %v813_v1 = vsel %vm812_vm1, %v748_v56, %v780_v58  ;;  %v845_v2 = vsel %vm812_vm1, %v780_v58, %v748_v56  ;;  %v1180_v3 = vsel %vm1147_vm3, %v1115_v59, %v1083_v57  ;;  %544 = vst.msk [vmem:[#allocation2 + $0x18] sm:$0xff] %vm541_vm0, %v387_v60  ;;  %v1148_v12 = vsel %vm1147_vm3, %v1083_v57, %v1115_v59 }
  0xfe   : > { %v883_v6 = vsel %vm877_vm2, 0.0, %v845_v2  ;;  %v957_v8 = vmul.f32 %v5168_v48, %v813_v1  ;;  %v1220_v9 = vsel %vm1213_vm4, 0.0, %v1180_v3  ;;  %v5209_v10 = vpop.f32.mrf.mxu0  ;;  %v1800_v22 = vmul.f32 %v5177_v51, %v813_v1 }
  0xff   : > { %v955_v11 = vmul.f32 %v5168_v48, %v883_v6  ;;  %v1292_v18 = vmul.f32 %v5174_v50, %v1220_v9  ;;  %v1798_v19 = vmul.f32 %v5177_v51, %v883_v6  ;;  %v1290_v26 = vmul.f32 %v5174_v50, %v1148_v12 }
 0x100   : > { %v613_v16 = vld [vmem:[#allocation2 + $0x8] sm:$0xff]  ;;  %v1021_v17 = vadd.f32 %v957_v8, %v686_v5  ;;  %v393_v20 = vpop.f32.mrf.mxu0  ;;  %v2106_v28 = vmul.f32 %v5184_v55, %v1148_v12  ;;  %v2108_v32 = vmul.f32 %v5184_v55, %v1220_v9  ;;  %v5237_v33 = vmul.f32 %v5160_v44, %v5209_v10 }
 0x101   : > { %546 = vst.msk [vmem:[#allocation2 + $0x28] sm:$0xff] %vm541_vm0, %v393_v20  ;;  %v1019_v25 = vadd.f32 %v955_v11, %v684_v15  ;;  %v685_v30 = vmul.f32 %v5179_v52, %v613_v16  ;;  %v749_v31 = vrot.slane %v613_v16, 7  ;;  %v1084_v34 = vrot.slane %v613_v16, 1 }
 0x102   : > { %v5231_v29 = vpop.f32.mrf.mxu0  ;;  %v1551_v36 = vmul.f32 %v5181_v53, %v613_v16  ;;  %v5240_v37 = vadd.f32 %v1292_v18, %v1021_v17  ;;  %v1858_v38 = vadd.f32 %v1798_v19, %v1550_v21  ;;  %v1860_v41 = vadd.f32 %v1800_v22, %v1552_v27 }
 0x103   : > { %v750_v47 = vrot.slane %v5209_v10, 7  ;;  %v5244_v49 = vadd.f32 %v1290_v26, %v1019_v25  ;;  %v1085_v54 = vrot.slane %v5209_v10, 1  ;;  %v5249_v56 = vmul.f32 %v5165_v46, %v5209_v10 }
 0x104   : > { %v615_v39 = vld [vmem:[#allocation2 + $0x18] sm:$0xff]  ;;  %v397_v40 = vpop.f32.mrf.mxu0  ;;  %v5253_v57 = vmul.f32 %v5193_v0, %v5209_v10  ;;  %v782_v12 = vrot.slane %v5231_v29, 7  ;;  %v5276_v15 = vadd.f32 %v2106_v28, %v1858_v38  ;;  %v1117_v18 = vrot.slane %v5231_v29, 1 }
 0x105   : > { %v781_v43 = vrot.slane %v615_v39, 7  ;;  %v1116_v45 = vrot.slane %v615_v39, 1  ;;  %548 = vst.msk [vmem:[#allocation2 + $0x38] sm:$0xff] %vm541_vm0, %v397_v40  ;;  %v687_v59 = vmul.f32 %v5179_v52, %v615_v39  ;;  %v5282_v20 = vadd.f32 %v2108_v32, %v1860_v41 }
 0x106   : > { %v5255_v58 = vpop.f32.mrf.mxu0  ;;  %v690_v25 = vmul.f32 %v5160_v44, %v5231_v29  ;;  %v1553_v27 = vmul.f32 %v5181_v53, %v615_v39  ;;  %v815_v41 = vsel %vm812_vm1, %v750_v47, %v782_v12 }
 0x107   : > { %v814_v60 = vsel %vm812_vm1, %v749_v31, %v781_v43  ;;  %v846_v1 = vsel %vm812_vm1, %v781_v43, %v749_v31  ;;  %v1181_v2 = vsel %vm1147_vm3, %v1116_v45, %v1084_v34  ;;  %v1149_v5 = vsel %vm1147_vm3, %v1084_v34, %v1116_v45 }
 0x108   : > { %v884_v3 = vsel %vm877_vm2, 0.0, %v846_v1  ;;  %v958_v4 = vmul.f32 %v5186_v61, %v814_v60  ;;  %v1221_v6 = vsel %vm1213_vm4, 0.0, %v1181_v2  ;;  %v403_v8 = vpop.f32.mrf.mxu0  ;;  %v1801_v17 = vmul.f32 %v5191_v63, %v814_v60  ;;  %v5288_v28 = vld [vmem:[#allocation2 + $0x28] sm:$0xff] }
 0x109   : > { %v956_v9 = vmul.f32 %v5186_v61, %v884_v3  ;;  %v1293_v10 = vmul.f32 %v5188_v62, %v1221_v6  ;;  %v1799_v11 = vmul.f32 %v5191_v63, %v884_v3  ;;  %550 = vst.msk [vmem:[#allocation2 + $0x48] sm:$0xff] %vm541_vm0, %v403_v8  ;;  %v1291_v22 = vmul.f32 %v5188_v62, %v1149_v5 }
 0x10a   : > { %v1022_v16 = vadd.f32 %v958_v4, %v687_v59  ;;  %v5280_v19 = vpop.f32.mrf.mxu0  ;;  %v1556_v31 = vmul.f32 %v5165_v46, %v5231_v29  ;;  %v2478_v34 = vmul.f32 %v5193_v0, %v5231_v29  ;;  %v1861_v39 = vadd.f32 %v1801_v17, %v1553_v27  ;;  %v5319_v4 = vld [vmem:[%s7511_s2 + $0x10] ss:$0 sm:$0xff] }
 0x10b   : > { %v1020_v21 = vadd.f32 %v956_v9, %v685_v30  ;;  %v1859_v40 = vadd.f32 %v1799_v11, %v1551_v36  ;;  %v2107_v30 = vmul.f32 %v5214_v13, %v1149_v5  ;;  %v2109_v43 = vmul.f32 %v5214_v13, %v1221_v6 }
 0x10c   : > { %v1357_v26 = vadd.f32 %v1293_v10, %v1022_v16  ;;  %v407_v38 = vpop.f32.mrf.mxu0  ;;  %v847_v45 = vsel %vm812_vm1, %v782_v12, %v750_v47  ;;  %v1182_v29 = vsel %vm1147_vm3, %v1117_v18, %v1085_v54  ;;  %v689_v36 = vmul.f32 %v5179_v52, %v5288_v28 }
 0x10d   : > { %v1355_v32 = vadd.f32 %v1291_v22, %v1020_v21  ;;  %552 = vst.msk [vmem:[#allocation2 + $0x58] sm:$0xff] %vm541_vm0, %v407_v38  ;;  %v887_v60 = vsel %vm877_vm2, 0.0, %v847_v45  ;;  %v961_v1 = vmul.f32 %v5168_v48, %v815_v41  ;;  %v1150_v2 = vsel %vm1147_vm3, %v1085_v54, %v1117_v18  ;;  %v619_v21 = vld [vmem:[#allocation2 + $0x38] sm:$0xff] }
 0x10e   : > { %1421 = vst.msk [vmem:[#allocation3 + $0x18] sm:$0xff] %vm541_vm0, %v1357_v26  ;;  %v5304_v59 = vpop.f32.mrf.mxu0  ;;  %v751_v47 = vrot.slane %v5288_v28, 7  ;;  %v1086_v3 = vrot.slane %v5288_v28, 1  ;;  %v1224_v5 = vsel %vm1213_vm4, 0.0, %v1182_v29  ;;  %v1804_v6 = vmul.f32 %v5177_v51, %v815_v41 }
 0x10f   : > { %1419 = vst.msk [vmem:[#allocation3 + $0x8] sm:$0xff] %vm541_vm0, %v1355_v32  ;;  %v5324_v9 = vadd.f32 %v2107_v30, %v1859_v40  ;;  %v5328_v54 = vmul.f32 %v5181_v53, %v5288_v28  ;;  %v2477_v10 = vmul.f32 %v5216_v14, %v5288_v28  ;;  %v2724_v11 = vmul.f32 %v5224_v23, %v887_v60 }
 0x110   : > { %v413_v8 = vpop.f32.mrf.mxu0  ;;  %v5334_v12 = vadd.f32 %v2109_v43, %v1861_v39  ;;  %v959_v16 = vmul.f32 %v5168_v48, %v887_v60  ;;  %v1294_v17 = vmul.f32 %v5174_v50, %v1150_v2  ;;  %v2726_v18 = vmul.f32 %v5224_v23, %v815_v41 }
 0x111   : > { %554 = vst.msk [vmem:[#allocation2 + $0x68] sm:$0xff] %vm541_vm0, %v413_v8  ;;  %v1025_v26 = vadd.f32 %v961_v1, %v690_v25  ;;  %v2784_v27 = vadd.f32 %v2724_v11, %v5253_v57  ;;  %v3032_v28 = vmul.f32 %v5319_v4, %v1150_v2  ;;  %v3034_v38 = vmul.f32 %v5319_v4, %v1224_v5 }
 0x112   : > { %v5339_v22 = vpop.f32.mrf.mxu0  ;;  %v1296_v32 = vmul.f32 %v5174_v50, %v1224_v5  ;;  %v1802_v40 = vmul.f32 %v5177_v51, %v887_v60  ;;  %v1864_v30 = vadd.f32 %v1804_v6, %v1556_v31  ;;  %v2786_v39 = vadd.f32 %v2726_v18, %v2478_v34 }
 0x113   : > { %v5347_v45 = vmul.f32 %v5184_v55, %v1150_v2  ;;  %v3092_v41 = vadd.f32 %v3032_v28, %v2784_v27  ;;  %v783_v29 = vrot.slane %v619_v21, 7  ;;  %v1118_v8 = vrot.slane %v619_v21, 1 }
 0x114   : > { %v417_v43 = vpop.f32.mrf.mxu0  ;;  %v1023_v57 = vadd.f32 %v959_v16, %v5237_v33  ;;  %v2112_v25 = vmul.f32 %v5184_v55, %v1224_v5  ;;  %v3094_v1 = vadd.f32 %v3034_v38, %v2786_v39  ;;  %v691_v11 = vmul.f32 %v5179_v52, %v619_v21 }
 0x115   : > { %556 = vst.msk [vmem:[#allocation2 + $0x78] sm:$0xff] %vm541_vm0, %v417_v43  ;;  %v3212_v31 = vadd.f32 %v3092_v41, %v5244_v49  ;;  %v816_v34 = vsel %vm812_vm1, %v751_v47, %v783_v29  ;;  %v848_v60 = vsel %vm812_vm1, %v783_v29, %v751_v47  ;;  %v1151_v2 = vsel %vm1147_vm3, %v1086_v3, %v1118_v8 }
 0x116   : > { %v5353_v7 = vpop.f32.mrf.mxu0  ;;  %v3214_v33 = vadd.f32 %v3094_v1, %v5240_v37  ;;  %v888_v5 = vsel %vm877_vm2, 0.0, %v848_v60  ;;  %v962_v6 = vmul.f32 %v5186_v61, %v816_v34  ;;  %v1183_v16 = vsel %vm1147_vm3, %v1118_v8, %v1086_v3  ;;  %v5380_v3 = vld [vmem:[%s7511_s2 + $0x18] ss:$0 sm:$0xff] }
 0x117   : > { %7541 = vst [vmem:[#allocation13_spill] sm:$0xff] %v5353_v7  ;;  %v1360_v18 = vadd.f32 %v1296_v32, %v1025_v26  ;;  %v5369_v27 = vadd.f32 %v1802_v40, %v5249_v56  ;;  %3272 = vst [vmem:[#allocation3] sm:$0xff] %v3212_v31  ;;  %v960_v47 = vmul.f32 %v5186_v61, %v888_v5  ;;  %v1225_v28 = vsel %vm1213_vm4, 0.0, %v1183_v16 }
 0x118   : > { %v423_v49 = vpop.f32.mrf.mxu0  ;;  %v1358_v37 = vadd.f32 %v1294_v17, %v1023_v57  ;;  %v5375_v38 = vadd.f32 %v2112_v25, %v1864_v30  ;;  %3274 = vst [vmem:[#allocation3 + $0x10] sm:$0xff] %v3214_v33  ;;  %v1026_v26 = vadd.f32 %v962_v6, %v691_v11  ;;  %v1297_v56 = vmul.f32 %v5188_v62, %v1225_v28 }
 0x119   : > { %558 = vst.msk [vmem:[#allocation2 + $0x88] sm:$0xff] %vm541_vm0, %v423_v49  ;;  %v1024_v40 = vadd.f32 %v960_v47, %v689_v36  ;;  %v1295_v39 = vmul.f32 %v5188_v62, %v1151_v2  ;;  %v1803_v43 = vmul.f32 %v5191_v63, %v888_v5  ;;  %v2725_v17 = vmul.f32 %v5226_v24, %v888_v5  ;;  %v3153_v5 = vld [vmem:[#allocation3 + $0x8] sm:$0xff]  ;;  %v3155_v49 = vld [vmem:[#allocation3 + $0x18] sm:$0xff] }
 0x11a   : > { %v5383_v32 = vpop.f32.mrf.mxu0  ;;  %v1361_v30 = vadd.f32 %v1297_v56, %v1026_v26  ;;  %v1805_v41 = vmul.f32 %v5191_v63, %v816_v34  ;;  %v2479_v29 = vmul.f32 %v5216_v14, %v619_v21  ;;  %v2727_v8 = vmul.f32 %v5226_v24, %v816_v34 }
 0x11b   : > { %7542 = vst [vmem:[#allocation14_spill] sm:$0xff] %v5383_v32  ;;  %v1359_v25 = vadd.f32 %v1295_v39, %v1024_v40  ;;  %v2785_v1 = vadd.f32 %v2725_v17, %v2477_v10  ;;  %v3033_v11 = vmul.f32 %v5380_v3, %v1151_v2  ;;  %v3035_v36 = vmul.f32 %v5380_v3, %v1225_v28 }
 0x11c   : > { %v427_v57 = vpop.f32.mrf.mxu0  ;;  %v5395_v31 = vadd.f32 %v5276_v15, %v1358_v37  ;;  %v5398_v60 = vadd.f32 %v5282_v20, %v1360_v18  ;;  %1425 = vst.msk [vmem:[#allocation3 + $0x38] sm:$0xff] %vm541_vm0, %v1361_v30  ;;  %v1557_v33 = vmul.f32 %v5181_v53, %v619_v21  ;;  %v2787_v34 = vadd.f32 %v2727_v8, %v2479_v29  ;;  %v5414_v18 = vld [vmem:[#allocation2 + $0x48] sm:$0xff] }
 0x11d   : > { %560 = vst.msk [vmem:[#allocation2 + $0x98] sm:$0xff] %vm541_vm0, %v427_v57  ;;  %1423 = vst.msk [vmem:[#allocation3 + $0x28] sm:$0xff] %vm541_vm0, %v1359_v25  ;;  %v5406_v10 = vadd.f32 %v1803_v43, %v5328_v54  ;;  %v5409_v16 = vmul.f32 %v5214_v13, %v1151_v2  ;;  %v5412_v15 = vmul.f32 %v5214_v13, %v1225_v28  ;;  %v752_v26 = vrot.slane %v5255_v58, 7 }
 0x11e   : > { %v5402_v6 = vpop.f32.mrf.mxu0  ;;  %v3093_v20 = vadd.f32 %v3033_v11, %v2785_v1  ;;  %v5416_v21 = vadd.f32 %v1805_v41, %v1557_v33  ;;  %v3095_v47 = vadd.f32 %v3035_v36, %v2787_v34  ;;  %v692_v37 = vmul.f32 %v5160_v44, %v5255_v58  ;;  %v5455_v33 = vld [vmem:[#allocation2 + $0x58] sm:$0xff] }
 0x11f   : > { %7543 = vst [vmem:[#allocation15_spill] sm:$0xff] %v5402_v6  ;;  %v1087_v2 = vrot.slane %v5255_v58, 1  ;;  %v1558_v28 = vmul.f32 %v5165_v46, %v5255_v58  ;;  %v2480_v40 = vmul.f32 %v5193_v0, %v5255_v58  ;;  %v5429_v43 = vmul.f32 %v5179_v52, %v5414_v18 }
 0x120   : > { %v433_v54 = vpop.f32.mrf.mxu0  ;;  %v3213_v56 = vadd.f32 %v3153_v5, %v3093_v20  ;;  %v3215_v39 = vadd.f32 %v3155_v49, %v3095_v47  ;;  %v784_v17 = vrot.slane %v5280_v19, 7  ;;  %v1119_v30 = vrot.slane %v5280_v19, 1 }
 0x121   : > { %562 = vst.msk [vmem:[#allocation2 + $0xa8] sm:$0xff] %vm541_vm0, %v433_v54  ;;  %v753_v29 = vrot.slane %v5414_v18, 7  ;;  %v1088_v8 = vrot.slane %v5414_v18, 1  ;;  %v5440_v58 = vmul.f32 %v5181_v53, %v5414_v18  ;;  %v5444_v57 = vmul.f32 %v5216_v14, %v5414_v18 }
 0x122   : > { %v5433_v41 = vpop.f32.mrf.mxu0  ;;  %3273 = vst.msk [vmem:[#allocation3 + $0x8] sm:$0xff] %vm541_vm0, %v3213_v56  ;;  %3275 = vst.msk [vmem:[#allocation3 + $0x18] sm:$0xff] %vm541_vm0, %v3215_v39  ;;  %v694_v25 = vmul.f32 %v5160_v44, %v5280_v19  ;;  %v817_v1 = vsel %vm812_vm1, %v752_v26, %v784_v17  ;;  %v849_v11 = vsel %vm812_vm1, %v784_v17, %v752_v26  ;;  %v785_v6 = vrot.slane %v5455_v33, 7 }
 0x123   : > { %7544 = vst [vmem:[#allocation16_spill] sm:$0xff] %v5433_v41  ;;  %v1184_v36 = vsel %vm1147_vm3, %v1119_v30, %v1087_v2  ;;  %v2230_v5 = vld [vmem:[#allocation3 + $0x38] sm:$0xff]  ;;  %v891_v20 = vsel %vm877_vm2, 0.0, %v849_v11  ;;  %v965_v49 = vmul.f32 %v5168_v48, %v817_v1  ;;  %v1560_v47 = vmul.f32 %v5165_v46, %v5280_v19 }
 0x124   : > { %v437_v34 = vpop.f32.mrf.mxu0  ;;  %v1228_v18 = vsel %vm1213_vm4, 0.0, %v1184_v36  ;;  %v2228_v26 = vld [vmem:[#allocation3 + $0x28] sm:$0xff]  ;;  %v2290_v54 = vadd.f32 %v2230_v5, %v5334_v12  ;;  %v963_v56 = vmul.f32 %v5168_v48, %v891_v20  ;;  %v1152_v39 = vsel %vm1147_vm3, %v1087_v2, %v1119_v30 }
 0x125   : > { %564 = vst.msk [vmem:[#allocation2 + $0xb8] sm:$0xff] %vm541_vm0, %v437_v34  ;;  %v2482_v17 = vmul.f32 %v5193_v0, %v5280_v19  ;;  %v2288_v36 = vadd.f32 %v2228_v26, %v5324_v9  ;;  %v1806_v41 = vmul.f32 %v5177_v51, %v891_v20  ;;  %v695_v34 = vmul.f32 %v5179_v52, %v5455_v33 }
 0x126   : > { %v5471_v11 = vpop.f32.mrf.mxu0  ;;  %2350 = vst.msk [vmem:[#allocation3 + $0x38] sm:$0xff] %vm541_vm0, %v2290_v54  ;;  %v1029_v12 = vadd.f32 %v965_v49, %v694_v25  ;;  %v1300_v5 = vmul.f32 %v5174_v50, %v1228_v18  ;;  %v2728_v2 = vmul.f32 %v5224_v23, %v891_v20  ;;  %v1120_v19 = vrot.slane %v5455_v33, 1 }
 0x127   : > { %7545 = vst [vmem:[#allocation17_spill] sm:$0xff] %v5471_v11  ;;  %2348 = vst.msk [vmem:[#allocation3 + $0x28] sm:$0xff] %vm541_vm0, %v2288_v36  ;;  %v1298_v9 = vmul.f32 %v5174_v50, %v1152_v39  ;;  %v1808_v26 = vmul.f32 %v5177_v51, %v817_v1  ;;  %v2114_v11 = vmul.f32 %v5184_v55, %v1152_v39 }
 0x128   : > { %v443_v30 = vpop.f32.mrf.mxu0  ;;  %v2730_v32 = vmul.f32 %v5224_v23, %v817_v1  ;;  %v1027_v25 = vadd.f32 %v963_v56, %v692_v37  ;;  %v2788_v49 = vadd.f32 %v2728_v2, %v2480_v40  ;;  %v3036_v54 = vmul.f32 %v5319_v4, %v1152_v39 }
 0x129   : > { %566 = vst.msk [vmem:[#allocation2 + $0xc8] sm:$0xff] %vm541_vm0, %v443_v30  ;;  %v3038_v20 = vmul.f32 %v5319_v4, %v1228_v18  ;;  %v1866_v48 = vadd.f32 %v1806_v41, %v1558_v28  ;;  %v2116_v36 = vmul.f32 %v5184_v55, %v1228_v18  ;;  %v818_v51 = vsel %vm812_vm1, %v753_v29, %v785_v6 }
 0x12a   : > { %v5490_v7 = vpop.f32.mrf.mxu0  ;;  %v2790_v50 = vadd.f32 %v2730_v32, %v2482_v17  ;;  %v1364_v52 = vadd.f32 %v1300_v5, %v1029_v12  ;;  %v3096_v0 = vadd.f32 %v3036_v54, %v2788_v49  ;;  %v850_v1 = vsel %vm812_vm1, %v785_v6, %v753_v29 }
 0x12b   : > { %v966_v37 = vmul.f32 %v5186_v61, %v818_v51  ;;  %v892_v39 = vsel %vm877_vm2, 0.0, %v850_v1  ;;  %v1153_v28 = vsel %vm1147_vm3, %v1088_v8, %v1120_v19  ;;  %v1185_v32 = vsel %vm1147_vm3, %v1120_v19, %v1088_v8 }
 0x12c   : > { %v447_v40 = vpop.f32.mrf.mxu0  ;;  %v3098_v56 = vadd.f32 %v3038_v20, %v2790_v50  ;;  %v3216_v41 = vadd.f32 %v3096_v0, %v5395_v31  ;;  %v964_v18 = vmul.f32 %v5186_v61, %v892_v39  ;;  %v1229_v29 = vsel %vm1213_vm4, 0.0, %v1185_v32 }
 0x12d   : > { %568 = vst.msk [vmem:[#allocation2 + $0xd8] sm:$0xff] %vm541_vm0, %v447_v40  ;;  %v1030_v6 = vadd.f32 %v966_v37, %v695_v34  ;;  %v1362_v17 = vadd.f32 %v1298_v9, %v1027_v25  ;;  %v1868_v12 = vadd.f32 %v1808_v26, %v1560_v47  ;;  %v1301_v2 = vmul.f32 %v5188_v62, %v1229_v29 }
 0x12e   : > { %v5509_v50 = vpop.f32.mrf.mxu0  ;;  %v3218_v5 = vadd.f32 %v3098_v56, %v5398_v60  ;;  %3276 = vst [vmem:[#allocation3 + $0x20] sm:$0xff] %v3216_v41  ;;  %v1028_v8 = vadd.f32 %v964_v18, %v5429_v43  ;;  %v1299_v19 = vmul.f32 %v5188_v62, %v1153_v28  ;;  %v1807_v0 = vmul.f32 %v5191_v63, %v892_v39 }
 0x12f   : > { %v1809_v31 = vmul.f32 %v5191_v63, %v818_v51  ;;  %v1365_v30 = vadd.f32 %v1301_v2, %v1030_v6  ;;  %v1561_v9 = vmul.f32 %v5181_v53, %v5455_v33  ;;  %v2117_v47 = vmul.f32 %v5214_v13, %v1229_v29 }
 0x130   : > { %v453_v34 = vpop.f32.mrf.mxu0  ;;  %3278 = vst [vmem:[#allocation3 + $0x30] sm:$0xff] %v3218_v5  ;;  %v2729_v60 = vmul.f32 %v5226_v24, %v892_v39  ;;  %v1363_v26 = vadd.f32 %v1299_v19, %v1028_v8  ;;  %v1867_v43 = vadd.f32 %v1807_v0, %v5440_v58  ;;  %v2483_v25 = vmul.f32 %v5216_v14, %v5455_v33  ;;  %v3157_v39 = vld [vmem:[#allocation3 + $0x28] sm:$0xff]  ;;  %v7548_v0 = vld [vmem:[#allocation11_spill] sm:$0xff] }
 0x131   : > { %570 = vst.msk [vmem:[#allocation2 + $0xe8] sm:$0xff] %vm541_vm0, %v453_v34  ;;  %v2731_v49 = vmul.f32 %v5226_v24, %v818_v51  ;;  %1429 = vst.msk [vmem:[#allocation3 + $0x58] sm:$0xff] %vm541_vm0, %v1365_v30  ;;  %v1869_v20 = vadd.f32 %v1809_v31, %v1561_v9  ;;  %v3037_v37 = vmul.f32 %v5380_v3, %v1153_v28  ;;  %v7547_v8 = vld [vmem:[#allocation12_spill] sm:$0xff] }
 0x132   : > { %v5526_v54 = vpop.f32.mrf.mxu0  ;;  %v2789_v1 = vadd.f32 %v2729_v60, %v5444_v57  ;;  %v3039_v40 = vmul.f32 %v5380_v3, %v1229_v29  ;;  %v2170_v56 = vadd.f32 %v5347_v45, %v5369_v27  ;;  %v2171_v58 = vadd.f32 %v5409_v16, %v5406_v10  ;;  %1427 = vst.msk [vmem:[#allocation3 + $0x48] sm:$0xff] %vm541_vm0, %v1363_v26  ;;  %v3159_v29 = vld [vmem:[#allocation3 + $0x38] sm:$0xff] }
 0x133   : > { %7546 = vst [vmem:[#allocation18_spill] sm:$0xff] %v5526_v54  ;;  %v2173_v51 = vadd.f32 %v5412_v15, %v5416_v21  ;;  %v2791_v33 = vadd.f32 %v2731_v49, %v2483_v25  ;;  %v5539_v41 = vadd.f32 %v2114_v11, %v1866_v48  ;;  %v5541_v57 = vadd.f32 %v2116_v36, %v1868_v12  ;;  %v5552_v15 = vld [vmem:[#allocation2 + $0x68] sm:$0xff]  ;;  %v5583_v26 = vld [vmem:[#allocation2 + $0x78] sm:$0xff] }
 0x134   : > { %v457_v32 = vpop.f32.mrf.mxu0  ;;  %v2115_v18 = vmul.f32 %v5214_v13, %v1153_v28  ;;  %v3097_v6 = vadd.f32 %v3037_v37, %v2789_v1  ;;  %v5545_v45 = vadd.f32 %v2170_v56, %v1362_v17  ;;  %v5548_v27 = vadd.f32 %v5375_v38, %v1364_v52 }
 0x135   : > { %572 = vst.msk [vmem:[#allocation2 + $0xf8] sm:$0xff] %vm541_vm0, %v457_v32  ;;  %v3099_v10 = vadd.f32 %v3039_v40, %v2791_v33  ;;  %v696_v16 = vmul.f32 %v5160_v44, %v5304_v59  ;;  %v5556_v11 = vadd.f32 %v2117_v47, %v1869_v20  ;;  %v754_v28 = vrot.slane %v5304_v59, 7  ;;  %v7549_v33 = vld [vmem:[#allocation8_spill] sm:$0xff] }
 0x136   : > { %v461_v48 = vpop.f32.mrf.mxu0  ;;  %v5554_v21 = vadd.f32 %v2115_v18, %v1867_v43  ;;  %v3217_v36 = vadd.f32 %v3157_v39, %v3097_v6  ;;  %v1089_v12 = vrot.slane %v5304_v59, 1  ;;  %v786_v52 = vrot.slane %v5339_v22, 7 }
 0x137   : > { %573 = vst [vmem:[#allocation2 + $0x100] sm:$0xff] %v461_v48  ;;  %v3219_v17 = vadd.f32 %v3159_v29, %v3099_v10  ;;  %v1121_v38 = vrot.slane %v5339_v22, 1  ;;  %v5565_v2 = vmul.f32 %v5165_v46, %v5304_v59  ;;  %v2484_v19 = vmul.f32 %v7547_v8, %v5304_v59  ;;  %v7550_v48 = vld [vmem:[#allocation9_spill] sm:$0xff] }
 0x138   : > { %v463_v5 = vpop.f32.mrf.mxu0  ;;  %3277 = vst.msk [vmem:[#allocation3 + $0x28] sm:$0xff] %vm541_vm0, %v3217_v36  ;;  %v5571_v31 = vmul.f32 %v7548_v0, %v5552_v15  ;;  %v755_v34 = vrot.slane %v5552_v15, 7  ;;  %v2234_v30 = vld [vmem:[#allocation3 + $0x58] sm:$0xff]  ;;  %v1090_v9 = vrot.slane %v5552_v15, 1  ;;  %v819_v47 = vsel %vm812_vm1, %v754_v28, %v786_v52 }
 0x139   : > { %574 = vst.msk [vmem:[#allocation2 + $0x108] sm:$0xff] %vm541_vm0, %v463_v5  ;;  %3279 = vst.msk [vmem:[#allocation3 + $0x38] sm:$0xff] %vm541_vm0, %v3219_v17  ;;  %v851_v60 = vsel %vm812_vm1, %v786_v52, %v754_v28  ;;  %v1186_v59 = vsel %vm1147_vm3, %v1121_v38, %v1089_v12  ;;  %v2232_v25 = vld [vmem:[#allocation3 + $0x48] sm:$0xff]  ;;  %v2294_v49 = vadd.f32 %v2234_v30, %v2173_v51  ;;  %v1122_v5 = vrot.slane %v5583_v26, 1 }
 0x13a   : > { %v465_v43 = vpop.f32.mrf.mxu0  ;;  %v5587_v20 = vmul.f32 %v5216_v14, %v5552_v15  ;;  %v895_v1 = vsel %vm877_vm2, 0.0, %v851_v60  ;;  %v1154_v37 = vsel %vm1147_vm3, %v1089_v12, %v1121_v38  ;;  %v2292_v40 = vadd.f32 %v2232_v25, %v2171_v58 }
 0x13b   : > { %575 = vst [vmem:[#allocation2 + $0x110] sm:$0xff] %v465_v43  ;;  %v698_v56 = vmul.f32 %v5160_v44, %v5339_v22  ;;  %v967_v39 = vmul.f32 %v7549_v33, %v895_v1  ;;  %v1232_v51 = vsel %vm1213_vm4, 0.0, %v1186_v59  ;;  %2354 = vst.msk [vmem:[#allocation3 + $0x58] sm:$0xff] %vm541_vm0, %v2294_v49  ;;  %v969_v18 = vmul.f32 %v7549_v33, %v819_v47  ;;  %v7551_v49 = vld [vmem:[#allocation10_spill] sm:$0xff] }
 0x13c   : > { %v467_v32 = vpop.f32.mrf.mxu0  ;;  %v1564_v6 = vmul.f32 %v5165_v46, %v5339_v22  ;;  %v2486_v29 = vmul.f32 %v7547_v8, %v5339_v22  ;;  %v787_v58 = vrot.slane %v5583_v26, 7  ;;  %2352 = vst.msk [vmem:[#allocation3 + $0x48] sm:$0xff] %vm541_vm0, %v2292_v40  ;;  %v1302_v36 = vmul.f32 %v7550_v48, %v1154_v37 }
 0x13d   : > { %576 = vst.msk [vmem:[#allocation2 + $0x118] sm:$0xff] %vm541_vm0, %v467_v32  ;;  %v1031_v10 = vadd.f32 %v967_v39, %v696_v16  ;;  %v2732_v28 = vmul.f32 %v5224_v23, %v895_v1  ;;  %v2734_v17 = vmul.f32 %v5224_v23, %v819_v47  ;;  %v1304_v52 = vmul.f32 %v7550_v48, %v1232_v51 }
 0x13e   : > { %v471_v12 = vpop.f32.mrf.mxu0  ;;  %v3040_v38 = vmul.f32 %v5319_v4, %v1154_v37  ;;  %v699_v22 = vmul.f32 %v7548_v0, %v5583_v26  ;;  %v3042_v59 = vmul.f32 %v5319_v4, %v1232_v51  ;;  %v1033_v25 = vadd.f32 %v969_v18, %v698_v56 }
 0x13f   : > { %577 = vst [vmem:[#allocation2 + $0x120] sm:$0xff] %v471_v12  ;;  %v1366_v30 = vadd.f32 %v1302_v36, %v1031_v10  ;;  %v2792_v60 = vadd.f32 %v2732_v28, %v2484_v19  ;;  %v2794_v16 = vadd.f32 %v2734_v17, %v2486_v29  ;;  %v1810_v40 = vmul.f32 %v7551_v49, %v895_v1 }
 0x140   : > { %v473_v43 = vpop.f32.mrf.mxu0  ;;  %v1812_v39 = vmul.f32 %v7551_v49, %v819_v47  ;;  %v820_v32 = vsel %vm812_vm1, %v755_v34, %v787_v58  ;;  %v852_v19 = vsel %vm812_vm1, %v787_v58, %v755_v34  ;;  %v1155_v47 = vsel %vm1147_vm3, %v1090_v9, %v1122_v5 }
 0x141   : > { %578 = vst.msk [vmem:[#allocation2 + $0x128] sm:$0xff] %vm541_vm0, %v473_v43  ;;  %v5622_v54 = vadd.f32 %v5539_v41, %v1366_v30  ;;  %v3100_v12 = vadd.f32 %v3040_v38, %v2792_v60  ;;  %v3102_v10 = vadd.f32 %v3042_v59, %v2794_v16  ;;  %v896_v56 = vsel %vm877_vm2, 0.0, %v852_v19 }
 0x142   : > { %v475_v29 = vpop.f32.mrf.mxu0  ;;  %v970_v1 = vmul.f32 %v5186_v61, %v820_v32  ;;  %v1187_v18 = vsel %vm1147_vm3, %v1122_v5, %v1090_v9  ;;  %v968_v28 = vmul.f32 %v5186_v61, %v896_v56  ;;  %v2118_v17 = vmul.f32 %v5184_v55, %v1154_v37 }
 0x143   : > { %579 = vst [vmem:[#allocation2 + $0x130] sm:$0xff] %v475_v29  ;;  %v3220_v41 = vadd.f32 %v3100_v12, %v5545_v45  ;;  %v3222_v36 = vadd.f32 %v3102_v10, %v5548_v27  ;;  %v1233_v34 = vsel %vm1213_vm4, 0.0, %v1187_v18  ;;  %v2120_v38 = vmul.f32 %v5184_v55, %v1232_v51  ;;  %v3161_v29 = vld [vmem:[#allocation3 + $0x48] sm:$0xff]  ;;  %v3163_v18 = vld [vmem:[#allocation3 + $0x58] sm:$0xff] }
 0x144   : > { %v477_v58 = vpop.f32.mrf.mxu0  ;;  %v1034_v30 = vadd.f32 %v970_v1, %v699_v22  ;;  %v1305_v60 = vmul.f32 %v5188_v62, %v1233_v34  ;;  %v1870_v9 = vadd.f32 %v1810_v40, %v5565_v2  ;;  %v1872_v45 = vadd.f32 %v1812_v39, %v1564_v6 }
 0x145   : > { %580 = vst.msk [vmem:[#allocation2 + $0x138] sm:$0xff] %vm541_vm0, %v477_v58  ;;  %3280 = vst [vmem:[#allocation3 + $0x40] sm:$0xff] %v3220_v41  ;;  %v1032_v27 = vadd.f32 %v968_v28, %v5571_v31  ;;  %v1303_v5 = vmul.f32 %v5188_v62, %v1155_v47  ;;  %v1368_v59 = vadd.f32 %v1304_v52, %v1033_v25  ;;  %v7552_v58 = vld [vmem:[#allocation13_spill] sm:$0xff] }
 0x146   : > { %3282 = vst [vmem:[#allocation3 + $0x50] sm:$0xff] %v3222_v36  ;;  %v481_v16 = vpop.f32.mrf.mxu0  ;;  %v1369_v43 = vadd.f32 %v1305_v60, %v1034_v30  ;;  %v1811_v37 = vmul.f32 %v5191_v63, %v896_v56  ;;  %v2733_v51 = vmul.f32 %v5226_v24, %v896_v56  ;;  %v1813_v12 = vmul.f32 %v5191_v63, %v820_v32 }
 0x147   : > { %581 = vst [vmem:[#allocation2 + $0x140] sm:$0xff] %v481_v16  ;;  %v1367_v22 = vadd.f32 %v1303_v5, %v1032_v27  ;;  %v2487_v2 = vmul.f32 %v5216_v14, %v5583_v26  ;;  %v2735_v6 = vmul.f32 %v5226_v24, %v820_v32  ;;  %v1563_v31 = vmul.f32 %v5181_v53, %v5552_v15 }
 0x148   : > { %1433 = vst.msk [vmem:[#allocation3 + $0x78] sm:$0xff] %vm541_vm0, %v1369_v43  ;;  %v2793_v52 = vadd.f32 %v2733_v51, %v5587_v20  ;;  %v3041_v25 = vmul.f32 %v5380_v3, %v1155_v47  ;;  %v3043_v40 = vmul.f32 %v5380_v3, %v1233_v34  ;;  %v5657_v39 = vadd.f32 %v2118_v17, %v1870_v9  ;;  %v5679_v17 = vld [vmem:[#allocation2 + $0x88] sm:$0xff]  ;;  %v7553_v9 = vld [vmem:[#allocation14_spill] sm:$0xff] }
 0x149   : > { %v5659_v10 = vadd.f32 %v2120_v38, %v1872_v45  ;;  %1431 = vst.msk [vmem:[#allocation3 + $0x68] sm:$0xff] %vm541_vm0, %v1367_v22  ;;  %v1565_v32 = vmul.f32 %v5181_v53, %v5583_v26  ;;  %v2795_v19 = vadd.f32 %v2735_v6, %v2487_v2  ;;  %v5665_v15 = vadd.f32 %v5541_v57, %v1368_v59  ;;  %v5711_v6 = vld [vmem:[#allocation2 + $0x98] sm:$0xff] }
 0x14a   : > { %v5668_v20 = vmul.f32 %v5214_v13, %v1155_v47  ;;  %v5671_v56 = vmul.f32 %v5214_v13, %v1233_v34  ;;  %v3101_v1 = vadd.f32 %v3041_v25, %v2793_v52  ;;  %v5673_v41 = vadd.f32 %v1811_v37, %v1563_v31  ;;  %v483_v31 = vpop.f32.mrf.mxu0 }
 0x14b   : > { %v5675_v36 = vadd.f32 %v1813_v12, %v1565_v32  ;;  %v3103_v28 = vadd.f32 %v3043_v40, %v2795_v19  ;;  %v700_v26 = vmul.f32 %v5160_v44, %v7552_v58  ;;  %v756_v38 = vrot.slane %v7552_v58, 7  ;;  %582 = vst.msk [vmem:[#allocation2 + $0x148] sm:$0xff] %vm541_vm0, %v483_v31 }
 0x14c   : > { %v3221_v57 = vadd.f32 %v3161_v29, %v3101_v1  ;;  %v1091_v47 = vrot.slane %v7552_v58, 1  ;;  %v5685_v34 = vmul.f32 %v5165_v46, %v7552_v58  ;;  %v2488_v60 = vmul.f32 %v7547_v8, %v7552_v58 }
 0x14d   : > { %v3223_v30 = vadd.f32 %v3163_v18, %v3103_v28  ;;  %v788_v45 = vrot.slane %v7553_v9, 7  ;;  %v1123_v27 = vrot.slane %v7553_v9, 1  ;;  %v5694_v5 = vmul.f32 %v7548_v0, %v5679_v17 }
 0x14e   : > { %3281 = vst.msk [vmem:[#allocation3 + $0x48] sm:$0xff] %vm541_vm0, %v3221_v57  ;;  %v757_v16 = vrot.slane %v5679_v17, 7  ;;  %v1092_v59 = vrot.slane %v5679_v17, 1  ;;  %v702_v43 = vmul.f32 %v5160_v44, %v7553_v9  ;;  %v1567_v1 = vmul.f32 %v5181_v53, %v5679_v17 }
 0x14f   : > { %v2238_v37 = vld [vmem:[#allocation3 + $0x78] sm:$0xff]  ;;  %3283 = vst.msk [vmem:[#allocation3 + $0x58] sm:$0xff] %vm541_vm0, %v3223_v30  ;;  %v821_v51 = vsel %vm812_vm1, %v756_v38, %v788_v45  ;;  %v853_v22 = vsel %vm812_vm1, %v788_v45, %v756_v38  ;;  %v5707_v12 = vsel %vm1147_vm3, %v1091_v47, %v1123_v27  ;;  %v1188_v2 = vsel %vm1147_vm3, %v1123_v27, %v1091_v47 }
 0x150   : > { %v2236_v52 = vld [vmem:[#allocation3 + $0x68] sm:$0xff]  ;;  %v2298_v25 = vadd.f32 %v2238_v37, %v5556_v11  ;;  %v899_v40 = vsel %vm877_vm2, 0.0, %v853_v22  ;;  %v973_v32 = vmul.f32 %v7549_v33, %v821_v51  ;;  %v1236_v19 = vsel %vm1213_vm4, 0.0, %v1188_v2  ;;  %v485_v11 = vpop.f32.mrf.mxu0 }
 0x151   : > { %v2296_v29 = vadd.f32 %v2236_v52, %v5554_v21  ;;  %v971_v18 = vmul.f32 %v7549_v33, %v899_v40  ;;  %v1308_v28 = vmul.f32 %v7550_v48, %v1236_v19  ;;  %v2489_v58 = vmul.f32 %v5216_v14, %v5679_v17  ;;  %583 = vst [vmem:[#allocation2 + $0x150] sm:$0xff] %v485_v11 }
 0x152   : > { %2358 = vst.msk [vmem:[#allocation3 + $0x78] sm:$0xff] %vm541_vm0, %v2298_v25  ;;  %v1037_v57 = vadd.f32 %v973_v32, %v702_v43  ;;  %v2490_v38 = vmul.f32 %v7547_v8, %v7553_v9  ;;  %v789_v47 = vrot.slane %v5711_v6, 7  ;;  %v1306_v30 = vmul.f32 %v7550_v48, %v5707_v12 }
 0x153   : > { %2356 = vst.msk [vmem:[#allocation3 + $0x68] sm:$0xff] %vm541_vm0, %v2296_v29  ;;  %v1035_v21 = vadd.f32 %v971_v18, %v700_v26  ;;  %v2736_v45 = vmul.f32 %v5224_v23, %v899_v40  ;;  %v2738_v27 = vmul.f32 %v5224_v23, %v821_v51  ;;  %v3044_v17 = vmul.f32 %v5319_v4, %v5707_v12 }
 0x154   : > { %v1372_v37 = vadd.f32 %v1308_v28, %v1037_v57  ;;  %v703_v43 = vmul.f32 %v7548_v0, %v5711_v6  ;;  %v1124_v22 = vrot.slane %v5711_v6, 1  ;;  %v3046_v26 = vmul.f32 %v5319_v4, %v1236_v19  ;;  %v487_v28 = vpop.f32.mrf.mxu0 }
 0x155   : > { %v1370_v2 = vadd.f32 %v1306_v30, %v1035_v21  ;;  %v2796_v31 = vadd.f32 %v2736_v45, %v2488_v60  ;;  %v2798_v52 = vadd.f32 %v2738_v27, %v2490_v38  ;;  %v1814_v25 = vmul.f32 %v7551_v49, %v899_v40  ;;  %584 = vst.msk [vmem:[#allocation2 + $0x158] sm:$0xff] %vm541_vm0, %v487_v28 }
 0x156   : > { %v1816_v32 = vmul.f32 %v7551_v49, %v821_v51  ;;  %v5745_v29 = vadd.f32 %v5659_v10, %v1372_v37  ;;  %v822_v18 = vsel %vm812_vm1, %v757_v16, %v789_v47  ;;  %v854_v60 = vsel %vm812_vm1, %v789_v47, %v757_v16 }
 0x157   : > { %v5750_v11 = vadd.f32 %v5657_v39, %v1370_v2  ;;  %v3104_v57 = vadd.f32 %v3044_v17, %v2796_v31  ;;  %v3106_v21 = vadd.f32 %v3046_v26, %v2798_v52  ;;  %v900_v51 = vsel %vm877_vm2, 0.0, %v854_v60  ;;  %v491_v2 = vpop.f32.mrf.mxu0 }
 0x158   : > { %v974_v10 = vmul.f32 %v5186_v61, %v822_v18  ;;  %v1157_v40 = vsel %vm1147_vm3, %v1092_v59, %v1124_v22  ;;  %v1189_v38 = vsel %vm1147_vm3, %v1124_v22, %v1092_v59  ;;  %v972_v45 = vmul.f32 %v5186_v61, %v900_v51  ;;  %585 = vst [vmem:[#allocation2 + $0x160] sm:$0xff] %v491_v2  ;;  %v5803_v2 = vld [vmem:[#allocation2 + $0xa8] sm:$0xff] }
 0x159   : > { %v3224_v39 = vadd.f32 %v3104_v57, %v5622_v54  ;;  %v3226_v30 = vadd.f32 %v3106_v21, %v5665_v15  ;;  %v1237_v16 = vsel %vm1213_vm4, 0.0, %v1189_v38  ;;  %v1568_v47 = vmul.f32 %v5165_v46, %v7553_v9  ;;  %v3167_v38 = vld [vmem:[#allocation3 + $0x78] sm:$0xff] }
 0x15a   : > { %v2124_v27 = vmul.f32 %v5184_v55, %v1236_v19  ;;  %v1038_v37 = vadd.f32 %v974_v10, %v703_v43  ;;  %v1309_v17 = vmul.f32 %v5188_v62, %v1237_v16  ;;  %v1874_v59 = vadd.f32 %v1814_v25, %v5685_v34 }
 0x15b   : > { %3284 = vst [vmem:[#allocation3 + $0x60] sm:$0xff] %v3224_v39  ;;  %3286 = vst [vmem:[#allocation3 + $0x70] sm:$0xff] %v3226_v30  ;;  %v1036_v54 = vadd.f32 %v972_v45, %v5694_v5  ;;  %v1307_v15 = vmul.f32 %v5188_v62, %v1157_v40  ;;  %v1815_v22 = vmul.f32 %v5191_v63, %v900_v51  ;;  %v3335_v45 = vld [vmem:[#allocation3 + $0x18] sm:$0xff] }
 0x15c   : > { %v1876_v31 = vadd.f32 %v1816_v32, %v1568_v47  ;;  %v1373_v52 = vadd.f32 %v1309_v17, %v1038_v37  ;;  %v1817_v9 = vmul.f32 %v5191_v63, %v822_v18  ;;  %v2737_v19 = vmul.f32 %v5226_v24, %v900_v51  ;;  %v7554_v17 = vld [vmem:[#allocation15_spill] sm:$0xff] }
 0x15d   : > { %v1371_v43 = vadd.f32 %v1307_v15, %v1036_v54  ;;  %v1569_v26 = vmul.f32 %v5181_v53, %v5711_v6  ;;  %v2491_v34 = vmul.f32 %v5216_v14, %v5711_v6  ;;  %v2739_v5 = vmul.f32 %v5226_v24, %v822_v18  ;;  %v3165_v6 = vld [vmem:[#allocation3 + $0x68] sm:$0xff] }
 0x15e   : > { %1437 = vst.msk [vmem:[#allocation3 + $0x98] sm:$0xff] %vm541_vm0, %v1373_v52  ;;  %v1875_v25 = vadd.f32 %v1815_v22, %v1567_v1  ;;  %v2797_v28 = vadd.f32 %v2737_v19, %v2489_v58  ;;  %v3045_v32 = vmul.f32 %v5380_v3, %v1157_v40  ;;  %v3047_v57 = vmul.f32 %v5380_v3, %v1237_v16 }
 0x15f   : > { %v2179_v21 = vadd.f32 %v5668_v20, %v5673_v41  ;;  %v2122_v60 = vmul.f32 %v5184_v55, %v5707_v12  ;;  %1435 = vst.msk [vmem:[#allocation3 + $0x88] sm:$0xff] %vm541_vm0, %v1371_v43  ;;  %v2799_v51 = vadd.f32 %v2739_v5, %v2491_v34  ;;  %v1877_v10 = vadd.f32 %v1817_v9, %v1569_v26  ;;  %v3333_v12 = vld [vmem:[#allocation3 + $0x8] sm:$0xff]  ;;  %v5828_v5 = vld [vmem:[#allocation2 + $0xb8] sm:$0xff] }
 0x160   : > { %v2123_v18 = vmul.f32 %v5214_v13, %v1157_v40  ;;  %v2125_v1 = vmul.f32 %v5214_v13, %v1237_v16  ;;  %v3105_v58 = vadd.f32 %v3045_v32, %v2797_v28  ;;  %v2181_v39 = vadd.f32 %v5671_v56, %v5675_v36  ;;  %v7555_v36 = vld [vmem:[#allocation16_spill] sm:$0xff] }
 0x161   : > { %v5794_v30 = vadd.f32 %v2122_v60, %v1874_v59  ;;  %v5796_v20 = vadd.f32 %v2124_v27, %v1876_v31  ;;  %v3107_v41 = vadd.f32 %v3047_v57, %v2799_v51  ;;  %v704_v40 = vmul.f32 %v5160_v44, %v7554_v17 }
 0x162   : > { %v5798_v47 = vadd.f32 %v2123_v18, %v1875_v25  ;;  %v3225_v37 = vadd.f32 %v3165_v6, %v3105_v58  ;;  %v758_v16 = vrot.slane %v7554_v17, 7  ;;  %v1093_v56 = vrot.slane %v7554_v17, 1  ;;  %v493_v25 = vpop.f32.mrf.mxu0 }
 0x163   : > { %v3227_v54 = vadd.f32 %v3167_v38, %v3107_v41  ;;  %v790_v59 = vrot.slane %v7555_v36, 7  ;;  %v1125_v27 = vrot.slane %v7555_v36, 1  ;;  %v5808_v15 = vadd.f32 %v2125_v1, %v1877_v10  ;;  %586 = vst.msk [vmem:[#allocation2 + $0x168] sm:$0xff] %vm541_vm0, %v493_v25 }
 0x164   : > { %3285 = vst.msk [vmem:[#allocation3 + $0x68] sm:$0xff] %vm541_vm0, %v3225_v37  ;;  %v5813_v22 = vmul.f32 %v5165_v46, %v7554_v17  ;;  %v2492_v31 = vmul.f32 %v7547_v8, %v7554_v17  ;;  %v3932_v52 = vpack.c.bf16 %v3335_v45, %v3333_v12  ;;  %v5820_v19 = vmul.f32 %v7548_v0, %v5803_v2  ;;  %v495_v58 = vpop.f32.mrf.mxu0 }
 0x165   : > { %v2242_v9 = vld [vmem:[#allocation3 + $0x98] sm:$0xff]  ;;  %3287 = vst.msk [vmem:[#allocation3 + $0x78] sm:$0xff] %vm541_vm0, %v3227_v54  ;;  %v823_v43 = vsel %vm812_vm1, %v758_v16, %v790_v59  ;;  %v855_v26 = vsel %vm812_vm1, %v790_v59, %v758_v16  ;;  %v1190_v34 = vsel %vm1147_vm3, %v1125_v27, %v1093_v56  ;;  %v759_v57 = vrot.slane %v5803_v2, 7  ;;  %587 = vst [vmem:[#allocation2 + $0x170] sm:$0xff] %v495_v58 }
 0x166   : > { %v2240_v28 = vld [vmem:[#allocation3 + $0x88] sm:$0xff]  ;;  %v2302_v32 = vadd.f32 %v2242_v9, %v2181_v39  ;;  %v1094_v60 = vrot.slane %v5803_v2, 1  ;;  %v903_v51 = vsel %vm877_vm2, 0.0, %v855_v26  ;;  %4654 = vmatprep.mubr.msk.bf16.mxu0 %vm541_vm0, %v3932_v52  ;;  %v5838_v10 = vmul.f32 %v5181_v53, %v5803_v2 }
 0x167   : > { %v2300_v6 = vadd.f32 %v2240_v28, %v2179_v21  ;;  %v1158_v18 = vsel %vm1147_vm3, %v1093_v56, %v1125_v27  ;;  %v1240_v1 = vsel %vm1213_vm4, 0.0, %v1190_v34  ;;  %v2493_v38 = vmul.f32 %v5216_v14, %v5803_v2  ;;  %v497_v28 = vpop.f32.mrf.mxu0 }
 0x168   : > { %2362 = vst.msk [vmem:[#allocation3 + $0x98] sm:$0xff] %vm541_vm0, %v2302_v32  ;;  %v706_v39 = vmul.f32 %v5160_v44, %v7555_v36  ;;  %v977_v21 = vmul.f32 %v7549_v33, %v823_v43  ;;  %v791_v41 = vrot.slane %v5828_v5, 7  ;;  %v1572_v12 = vmul.f32 %v5165_v46, %v7555_v36  ;;  %588 = vst.msk [vmem:[#allocation2 + $0x178] sm:$0xff] %vm541_vm0, %v497_v28 }
 0x169   : > { %2360 = vst.msk [vmem:[#allocation3 + $0x88] sm:$0xff] %vm541_vm0, %v2300_v6  ;;  %v2494_v45 = vmul.f32 %v7547_v8, %v7555_v36  ;;  %v2740_v37 = vmul.f32 %v5224_v23, %v903_v51  ;;  %v2742_v17 = vmul.f32 %v5224_v23, %v823_v43  ;;  %v975_v16 = vmul.f32 %v7549_v33, %v903_v51 }
 0x16a   : > { %v1310_v2 = vmul.f32 %v7550_v48, %v1158_v18  ;;  %v1312_v54 = vmul.f32 %v7550_v48, %v1240_v1  ;;  %v707_v56 = vmul.f32 %v7548_v0, %v5828_v5  ;;  %v3048_v52 = vmul.f32 %v5319_v4, %v1158_v18 }
 0x16b   : > { %v2800_v59 = vadd.f32 %v2740_v37, %v2492_v31  ;;  %v2802_v27 = vadd.f32 %v2742_v17, %v2494_v45  ;;  %v3050_v9 = vmul.f32 %v5319_v4, %v1240_v1  ;;  %v1041_v36 = vadd.f32 %v977_v21, %v706_v39 }
 0x16c   : > { %v1818_v26 = vmul.f32 %v7551_v49, %v903_v51  ;;  %v1820_v34 = vmul.f32 %v7551_v49, %v823_v43  ;;  %v824_v25 = vsel %vm812_vm1, %v759_v57, %v791_v41  ;;  %v2126_v32 = vmul.f32 %v5184_v55, %v1158_v18 }
 0x16d   : > { %v3108_v6 = vadd.f32 %v3048_v52, %v2800_v59  ;;  %v3110_v58 = vadd.f32 %v3050_v9, %v2802_v27  ;;  %v856_v31 = vsel %vm812_vm1, %v791_v41, %v759_v57  ;;  %v1039_v45 = vadd.f32 %v975_v16, %v704_v40  ;;  %v501_v16 = vpop.f32.mrf.mxu0 }
 0x16e   : > { %v904_v4 = vsel %vm877_vm2, 0.0, %v856_v31  ;;  %v978_v51 = vmul.f32 %v5186_v61, %v824_v25  ;;  %v1126_v43 = vrot.slane %v5828_v5, 1  ;;  %v2128_v39 = vmul.f32 %v5184_v55, %v1240_v1  ;;  %589 = vst [vmem:[#allocation2 + $0x180] sm:$0xff] %v501_v16 }
 0x16f   : > { %v3228_v21 = vadd.f32 %v3108_v6, %v5750_v11  ;;  %v3230_v18 = vadd.f32 %v3110_v58, %v5745_v29  ;;  %v976_v37 = vmul.f32 %v5186_v61, %v904_v4  ;;  %v1819_v41 = vmul.f32 %v5191_v63, %v904_v4 }
 0x170   : > { %v1042_v17 = vadd.f32 %v978_v51, %v707_v56  ;;  %v1159_v57 = vsel %vm1147_vm3, %v1094_v60, %v1126_v43  ;;  %v1191_v40 = vsel %vm1147_vm3, %v1126_v43, %v1094_v60  ;;  %v1376_v59 = vadd.f32 %v1312_v54, %v1041_v36 }
 0x171   : > { %3288 = vst [vmem:[#allocation3 + $0x80] sm:$0xff] %v3228_v21  ;;  %3290 = vst [vmem:[#allocation3 + $0x90] sm:$0xff] %v3230_v18  ;;  %v1040_v1 = vadd.f32 %v976_v37, %v5820_v19  ;;  %v1241_v29 = vsel %vm1213_vm4, 0.0, %v1191_v40  ;;  %v1311_v11 = vmul.f32 %v5188_v62, %v1159_v57  ;;  %v1878_v56 = vadd.f32 %v1818_v26, %v5813_v22  ;;  %v7556_v18 = vld [vmem:[#allocation17_spill] sm:$0xff] }
 0x172   : > { %v1880_v27 = vadd.f32 %v1820_v34, %v1572_v12  ;;  %v1313_v52 = vmul.f32 %v5188_v62, %v1241_v29  ;;  %v1821_v60 = vmul.f32 %v5191_v63, %v824_v25  ;;  %v2495_v54 = vmul.f32 %v5216_v14, %v5828_v5 }
 0x173   : > { %v1375_v9 = vadd.f32 %v1311_v11, %v1040_v1  ;;  %v2741_v36 = vmul.f32 %v5226_v24, %v904_v4  ;;  %v2743_v19 = vmul.f32 %v5226_v24, %v824_v25  ;;  %v1374_v28 = vadd.f32 %v1310_v2, %v1039_v45  ;;  %v3171_v4 = vld [vmem:[#allocation3 + $0x98] sm:$0xff] }
 0x174   : > { %v1377_v6 = vadd.f32 %v1313_v52, %v1042_v17  ;;  %v1573_v58 = vmul.f32 %v5181_v53, %v5828_v5  ;;  %v1879_v22 = vadd.f32 %v1819_v41, %v5838_v10  ;;  %v3049_v34 = vmul.f32 %v5380_v3, %v1159_v57  ;;  %v3169_v5 = vld [vmem:[#allocation3 + $0x88] sm:$0xff]  ;;  %v5944_v52 = vld [vmem:[#allocation2 + $0xd8] sm:$0xff] }
 0x175   : > { %1439 = vst.msk [vmem:[#allocation3 + $0xa8] sm:$0xff] %vm541_vm0, %v1375_v9  ;;  %v2801_v12 = vadd.f32 %v2741_v36, %v2493_v38  ;;  %v2803_v26 = vadd.f32 %v2743_v19, %v2495_v54  ;;  %v3051_v31 = vmul.f32 %v5380_v3, %v1241_v29  ;;  %v5903_v51 = vadd.f32 %v2126_v32, %v1878_v56 }
 0x176   : > { %1441 = vst.msk [vmem:[#allocation3 + $0xb8] sm:$0xff] %vm541_vm0, %v1377_v6  ;;  %v1881_v25 = vadd.f32 %v1821_v60, %v1573_v58  ;;  %v2127_v2 = vmul.f32 %v5214_v13, %v1159_v57  ;;  %v2129_v45 = vmul.f32 %v5214_v13, %v1241_v29  ;;  %v5908_v10 = vadd.f32 %v2128_v39, %v1880_v27  ;;  %v5920_v57 = vld [vmem:[#allocation2 + $0xc8] sm:$0xff]  ;;  %v503_v60 = vpop.f32.mrf.mxu0 }
 0x177   : > { %v5911_v38 = vadd.f32 %v5796_v20, %v1376_v59  ;;  %v3109_v43 = vadd.f32 %v3049_v34, %v2801_v12  ;;  %v3111_v21 = vadd.f32 %v3051_v31, %v2803_v26  ;;  %v5914_v3 = vadd.f32 %v5794_v30, %v1374_v28  ;;  %590 = vst.msk [vmem:[#allocation2 + $0x188] sm:$0xff] %vm541_vm0, %v503_v60 }
 0x178   : > { %v5916_v32 = vadd.f32 %v2127_v2, %v1879_v22  ;;  %v760_v37 = vrot.slane %v7556_v18, 7  ;;  %v1095_v17 = vrot.slane %v7556_v18, 1  ;;  %v792_v39 = vrot.slane %v5490_v7, 7  ;;  %v505_v34 = vpop.f32.mrf.mxu0 }
 0x179   : > { %v3229_v40 = vadd.f32 %v3169_v5, %v3109_v43  ;;  %v3231_v41 = vadd.f32 %v3171_v4, %v3111_v21  ;;  %v1127_v20 = vrot.slane %v5490_v7, 1  ;;  %v5924_v16 = vadd.f32 %v2129_v45, %v1881_v25  ;;  %591 = vst [vmem:[#allocation2 + $0x190] sm:$0xff] %v505_v34 }
 0x17a   : > { %v708_v30 = vmul.f32 %v5160_v44, %v7556_v18  ;;  %v1574_v59 = vmul.f32 %v5165_v46, %v7556_v18  ;;  %v2496_v1 = vmul.f32 %v7547_v8, %v7556_v18  ;;  %v5936_v29 = vmul.f32 %v7548_v0, %v5920_v57  ;;  %v507_v60 = vpop.f32.mrf.mxu0 }
 0x17b   : > { %3289 = vst.msk [vmem:[#allocation3 + $0x88] sm:$0xff] %vm541_vm0, %v3229_v40  ;;  %3291 = vst.msk [vmem:[#allocation3 + $0x98] sm:$0xff] %vm541_vm0, %v3231_v41  ;;  %v825_v11 = vsel %vm812_vm1, %v760_v37, %v792_v39  ;;  %v857_v56 = vsel %vm812_vm1, %v792_v39, %v760_v37  ;;  %v1192_v27 = vsel %vm1147_vm3, %v1127_v20, %v1095_v17  ;;  %v761_v54 = vrot.slane %v5920_v57, 7 }
 0x17c   : > { %v2244_v9 = vld [vmem:[#allocation3 + $0xa8] sm:$0xff]  ;;  %v1096_v36 = vrot.slane %v5920_v57, 1  ;;  %v5950_v19 = vmul.f32 %v5181_v53, %v5920_v57  ;;  %v907_v28 = vsel %vm877_vm2, 0.0, %v857_v56  ;;  %v5958_v22 = vmul.f32 %v5216_v14, %v5920_v57  ;;  %592 = vst.msk [vmem:[#allocation2 + $0x198] sm:$0xff] %vm541_vm0, %v507_v60 }
 0x17d   : > { %v2246_v6 = vld [vmem:[#allocation3 + $0xb8] sm:$0xff]  ;;  %v2304_v58 = vadd.f32 %v2244_v9, %v5798_v47  ;;  %v1160_v12 = vsel %vm1147_vm3, %v1095_v17, %v1127_v20  ;;  %v1244_v26 = vsel %vm1213_vm4, 0.0, %v1192_v27  ;;  %v710_v25 = vmul.f32 %v5160_v44, %v5490_v7 }
 0x17e   : > { %v2306_v31 = vadd.f32 %v2246_v6, %v5808_v15  ;;  %v981_v2 = vmul.f32 %v7549_v33, %v825_v11  ;;  %v793_v47 = vrot.slane %v5944_v52, 7  ;;  %v1576_v45 = vmul.f32 %v5165_v46, %v5490_v7 }
 0x17f   : > { %2364 = vst.msk [vmem:[#allocation3 + $0xa8] sm:$0xff] %vm541_vm0, %v2304_v58  ;;  %v2498_v5 = vmul.f32 %v7547_v8, %v5490_v7  ;;  %v2744_v4 = vmul.f32 %v5224_v23, %v907_v28  ;;  %v711_v15 = vmul.f32 %v7548_v0, %v5944_v52  ;;  %v979_v43 = vmul.f32 %v7549_v33, %v907_v28  ;;  %v5986_v7 = vld [vmem:[%s7511_s2 + $0x10] ss:$0 sm:$0xff] }
 0x180   : > { %2366 = vst.msk [vmem:[#allocation3 + $0xb8] sm:$0xff] %vm541_vm0, %v2306_v31  ;;  %v1314_v21 = vmul.f32 %v7550_v48, %v1160_v12  ;;  %v1316_v18 = vmul.f32 %v7550_v48, %v1244_v26  ;;  %v2746_v37 = vmul.f32 %v5224_v23, %v825_v11  ;;  %v1822_v17 = vmul.f32 %v7551_v49, %v907_v28 }
 0x181   : > { %v2804_v57 = vadd.f32 %v2744_v4, %v2496_v1  ;;  %v3052_v40 = vmul.f32 %v5986_v7, %v1160_v12  ;;  %v3054_v41 = vmul.f32 %v5986_v7, %v1244_v26  ;;  %v1045_v39 = vadd.f32 %v981_v2, %v710_v25 }
 0x182   : > { %v1824_v20 = vmul.f32 %v7551_v49, %v825_v11  ;;  %v2806_v56 = vadd.f32 %v2746_v37, %v2498_v5  ;;  %v826_v27 = vsel %vm812_vm1, %v761_v54, %v793_v47  ;;  %v2130_v9 = vmul.f32 %v5184_v55, %v1160_v12 }
 0x183   : > { %v3112_v1 = vadd.f32 %v3052_v40, %v2804_v57  ;;  %v858_v28 = vsel %vm812_vm1, %v793_v47, %v761_v54  ;;  %v982_v6 = vmul.f32 %v5186_v61, %v826_v27  ;;  %v1043_v58 = vadd.f32 %v979_v43, %v708_v30  ;;  %v511_v43 = vpop.f32.mrf.mxu0 }
 0x184   : > { %v3114_v34 = vadd.f32 %v3054_v41, %v2806_v56  ;;  %v908_v11 = vsel %vm877_vm2, 0.0, %v858_v28  ;;  %v1128_v31 = vrot.slane %v5944_v52, 1  ;;  %v1882_v25 = vadd.f32 %v1822_v17, %v1574_v59  ;;  %593 = vst [vmem:[#allocation2 + $0x1a0] sm:$0xff] %v511_v43 }
 0x185   : > { %v3232_v2 = vadd.f32 %v3112_v1, %v5914_v3  ;;  %v980_v12 = vmul.f32 %v5186_v61, %v908_v11  ;;  %v1046_v5 = vadd.f32 %v982_v6, %v711_v15  ;;  %v1823_v47 = vmul.f32 %v5191_v63, %v908_v11 }
 0x186   : > { %v3234_v4 = vadd.f32 %v3114_v34, %v5911_v38  ;;  %v1161_v54 = vsel %vm1147_vm3, %v1096_v36, %v1128_v31  ;;  %v1193_v30 = vsel %vm1147_vm3, %v1128_v31, %v1096_v36  ;;  %v2132_v37 = vmul.f32 %v5184_v55, %v1244_v26 }
 0x187   : > { %3292 = vst [vmem:[#allocation3 + $0xa0] sm:$0xff] %v3232_v2  ;;  %v1044_v59 = vadd.f32 %v980_v12, %v5936_v29  ;;  %v1245_v3 = vsel %vm1213_vm4, 0.0, %v1193_v30  ;;  %v1315_v15 = vmul.f32 %v5188_v62, %v1161_v54  ;;  %v1380_v38 = vadd.f32 %v1316_v18, %v1045_v39 }
 0x188   : > { %v1884_v17 = vadd.f32 %v1824_v20, %v1576_v45  ;;  %3294 = vst [vmem:[#allocation3 + $0xb0] sm:$0xff] %v3234_v4  ;;  %v1317_v57 = vmul.f32 %v5188_v62, %v1245_v3  ;;  %v1825_v36 = vmul.f32 %v5191_v63, %v826_v27  ;;  %v2499_v26 = vmul.f32 %v5216_v14, %v5944_v52  ;;  %v6028_v20 = vld [vmem:[%s7511_s2 + $0x18] ss:$0 sm:$0xff]  ;;  %v6049_v4 = vld [vmem:[#allocation2 + $0xe8] sm:$0xff] }
 0x189   : > { %v1379_v40 = vadd.f32 %v1315_v15, %v1044_v59  ;;  %v2745_v41 = vmul.f32 %v5226_v24, %v908_v11  ;;  %v2747_v29 = vmul.f32 %v5226_v24, %v826_v27  ;;  %v1378_v56 = vadd.f32 %v1314_v21, %v1043_v58  ;;  %v3175_v58 = vld [vmem:[#allocation3 + $0xb8] sm:$0xff] }
 0x18a   : > { %v1381_v60 = vadd.f32 %v1317_v57, %v1046_v5  ;;  %v1577_v1 = vmul.f32 %v5181_v53, %v5944_v52  ;;  %v1883_v45 = vadd.f32 %v1823_v47, %v5950_v19  ;;  %v3053_v28 = vmul.f32 %v6028_v20, %v1161_v54  ;;  %v7557_v47 = vld [vmem:[#allocation18_spill] sm:$0xff] }
 0x18b   : > { %1443 = vst.msk [vmem:[#allocation3 + $0xc8] sm:$0xff] %vm541_vm0, %v1379_v40  ;;  %v2805_v18 = vadd.f32 %v2745_v41, %v5958_v22  ;;  %v2807_v39 = vadd.f32 %v2747_v29, %v2499_v26  ;;  %v3055_v21 = vmul.f32 %v6028_v20, %v1245_v3  ;;  %v6032_v27 = vadd.f32 %v2130_v9, %v1882_v25  ;;  %v3173_v22 = vld [vmem:[#allocation3 + $0xa8] sm:$0xff]  ;;  %v513_v40 = vpop.f32.mrf.mxu0 }
 0x18c   : > { %1445 = vst.msk [vmem:[#allocation3 + $0xd8] sm:$0xff] %vm541_vm0, %v1381_v60  ;;  %v1885_v52 = vadd.f32 %v1825_v36, %v1577_v1  ;;  %v2131_v19 = vmul.f32 %v5214_v13, %v1161_v54  ;;  %v2133_v6 = vmul.f32 %v5214_v13, %v1245_v3  ;;  %v6037_v34 = vadd.f32 %v2132_v37, %v1884_v17  ;;  %v6071_v36 = vld [vmem:[#allocation2 + $0xf8] sm:$0xff] }
 0x18d   : > { %v6040_v11 = vadd.f32 %v5908_v10, %v1380_v38  ;;  %v3113_v31 = vadd.f32 %v3053_v28, %v2805_v18  ;;  %v3115_v2 = vadd.f32 %v3055_v21, %v2807_v39  ;;  %v6043_v12 = vadd.f32 %v5903_v51, %v1378_v56  ;;  %594 = vst.msk [vmem:[#allocation2 + $0x1a8] sm:$0xff] %vm541_vm0, %v513_v40  ;;  %v515_v28 = vpop.f32.mrf.mxu0 }
 0x18e   : > { %v6045_v9 = vadd.f32 %v2131_v19, %v1883_v45  ;;  %v762_v25 = vrot.slane %v5509_v50, 7  ;;  %v1097_v5 = vrot.slane %v5509_v50, 1  ;;  %v794_v43 = vrot.slane %v7557_v47, 7  ;;  %595 = vst [vmem:[#allocation2 + $0x1b0] sm:$0xff] %v515_v28 }
 0x18f   : > { %v3233_v54 = vadd.f32 %v3173_v22, %v3113_v31  ;;  %v3235_v30 = vadd.f32 %v3175_v58, %v3115_v2  ;;  %v1129_v10 = vrot.slane %v7557_v47, 1  ;;  %v6053_v37 = vadd.f32 %v2133_v6, %v1885_v52  ;;  %v517_v40 = vpop.f32.mrf.mxu0 }
 0x190   : > { %v712_v51 = vmul.f32 %v5160_v44, %v5509_v50  ;;  %v1578_v59 = vmul.f32 %v5165_v46, %v5509_v50  ;;  %v2500_v3 = vmul.f32 %v7547_v8, %v5509_v50  ;;  %v713_v15 = vmul.f32 %v7548_v0, %v6049_v4  ;;  %596 = vst.msk [vmem:[#allocation2 + $0x1b8] sm:$0xff] %vm541_vm0, %v517_v40 }
 0x191   : > { %3293 = vst.msk [vmem:[#allocation3 + $0xa8] sm:$0xff] %vm541_vm0, %v3233_v54  ;;  %3295 = vst.msk [vmem:[#allocation3 + $0xb8] sm:$0xff] %vm541_vm0, %v3235_v30  ;;  %v827_v38 = vsel %vm812_vm1, %v762_v25, %v794_v43  ;;  %v859_v17 = vsel %vm812_vm1, %v794_v43, %v762_v25  ;;  %v1194_v57 = vsel %vm1147_vm3, %v1129_v10, %v1097_v5  ;;  %v763_v26 = vrot.slane %v6049_v4, 7 }
 0x192   : > { %v2248_v50 = vld [vmem:[#allocation3 + $0xc8] sm:$0xff]  ;;  %v1098_v41 = vrot.slane %v6049_v4, 1  ;;  %v6077_v29 = vmul.f32 %v5181_v53, %v6049_v4  ;;  %v911_v56 = vsel %vm877_vm2, 0.0, %v859_v17  ;;  %v6085_v45 = vmul.f32 %v5216_v14, %v6049_v4 }
 0x193   : > { %v2250_v60 = vld [vmem:[#allocation3 + $0xd8] sm:$0xff]  ;;  %v2308_v1 = vadd.f32 %v2248_v50, %v5916_v32  ;;  %v1162_v18 = vsel %vm1147_vm3, %v1097_v5, %v1129_v10  ;;  %v1248_v39 = vsel %vm1213_vm4, 0.0, %v1194_v57  ;;  %v714_v52 = vmul.f32 %v5160_v44, %v7557_v47 }
 0x194   : > { %v2310_v21 = vadd.f32 %v2250_v60, %v5924_v16  ;;  %v985_v19 = vmul.f32 %v7549_v33, %v827_v38  ;;  %v795_v32 = vrot.slane %v6071_v36, 7  ;;  %v1580_v6 = vmul.f32 %v5165_v46, %v7557_v47 }
 0x195   : > { %2368 = vst.msk [vmem:[#allocation3 + $0xc8] sm:$0xff] %vm541_vm0, %v2308_v1  ;;  %v2502_v22 = vmul.f32 %v7547_v8, %v7557_v47  ;;  %v2748_v58 = vmul.f32 %v5224_v23, %v911_v56  ;;  %v715_v16 = vmul.f32 %v7548_v0, %v6071_v36  ;;  %v983_v31 = vmul.f32 %v7549_v33, %v911_v56 }
 0x196   : > { %2370 = vst.msk [vmem:[#allocation3 + $0xd8] sm:$0xff] %vm541_vm0, %v2310_v21  ;;  %v1318_v2 = vmul.f32 %v7550_v48, %v1162_v18  ;;  %v1320_v25 = vmul.f32 %v7550_v48, %v1248_v39  ;;  %v2750_v5 = vmul.f32 %v5224_v23, %v827_v38  ;;  %v1826_v4 = vmul.f32 %v7551_v49, %v911_v56 }
 0x197   : > { %v2808_v54 = vadd.f32 %v2748_v58, %v2500_v3  ;;  %v3056_v30 = vmul.f32 %v5986_v7, %v1162_v18  ;;  %v3058_v47 = vmul.f32 %v5986_v7, %v1248_v39  ;;  %v1049_v43 = vadd.f32 %v985_v19, %v714_v52 }
 0x198   : > { %v1828_v10 = vmul.f32 %v7551_v49, %v827_v38  ;;  %v2810_v17 = vadd.f32 %v2750_v5, %v2502_v22  ;;  %v828_v57 = vsel %vm812_vm1, %v763_v26, %v795_v32  ;;  %v2134_v50 = vmul.f32 %v5184_v55, %v1162_v18 }
 0x199   : > { %v3116_v60 = vadd.f32 %v3056_v30, %v2808_v54  ;;  %v860_v1 = vsel %vm812_vm1, %v795_v32, %v763_v26  ;;  %v986_v3 = vmul.f32 %v5186_v61, %v828_v57  ;;  %v1047_v56 = vadd.f32 %v983_v31, %v712_v51  ;;  %v521_v31 = vpop.f32.mrf.mxu0 }
 0x19a   : > { %v3118_v28 = vadd.f32 %v3058_v47, %v2810_v17  ;;  %v912_v38 = vsel %vm877_vm2, 0.0, %v860_v1  ;;  %v1130_v21 = vrot.slane %v6071_v36, 1  ;;  %v1886_v52 = vadd.f32 %v1826_v4, %v1578_v59  ;;  %597 = vst [vmem:[#allocation2 + $0x1c0] sm:$0xff] %v521_v31 }
 0x19b   : > { %v3236_v19 = vadd.f32 %v3116_v60, %v6043_v12  ;;  %v984_v18 = vmul.f32 %v5186_v61, %v912_v38  ;;  %v1050_v22 = vadd.f32 %v986_v3, %v715_v16  ;;  %v1827_v32 = vmul.f32 %v5191_v63, %v912_v38 }
 0x19c   : > { %v3238_v58 = vadd.f32 %v3118_v28, %v6040_v11  ;;  %v1163_v26 = vsel %vm1147_vm3, %v1098_v41, %v1130_v21  ;;  %v1195_v51 = vsel %vm1147_vm3, %v1130_v21, %v1098_v41  ;;  %v2136_v5 = vmul.f32 %v5184_v55, %v1248_v39 }
 0x19d   : > { %3296 = vst [vmem:[#allocation3 + $0xc0] sm:$0xff] %v3236_v19  ;;  %v1048_v59 = vadd.f32 %v984_v18, %v713_v15  ;;  %v1249_v12 = vsel %vm1213_vm4, 0.0, %v1195_v51  ;;  %v1319_v16 = vmul.f32 %v5188_v62, %v1163_v26  ;;  %v1384_v11 = vadd.f32 %v1320_v25, %v1049_v43 }
 0x19e   : > { %v1888_v4 = vadd.f32 %v1828_v10, %v1580_v6  ;;  %3298 = vst [vmem:[#allocation3 + $0xd0] sm:$0xff] %v3238_v58  ;;  %v1321_v54 = vmul.f32 %v5188_v62, %v1249_v12  ;;  %v1829_v41 = vmul.f32 %v5191_v63, %v828_v57  ;;  %v2503_v47 = vmul.f32 %v5216_v14, %v6071_v36  ;;  %v6163_v58 = vld [vmem:[#allocation2 + $0x108] sm:$0xff] }
 0x19f   : > { %v1383_v30 = vadd.f32 %v1319_v16, %v1048_v59  ;;  %v2749_v39 = vmul.f32 %v5226_v24, %v912_v38  ;;  %v2751_v15 = vmul.f32 %v5226_v24, %v828_v57  ;;  %v1382_v17 = vadd.f32 %v1318_v2, %v1047_v56  ;;  %v3177_v56 = vld [vmem:[#allocation3 + $0xc8] sm:$0xff] }
 0x1a0   : > { %v1385_v40 = vadd.f32 %v1321_v54, %v1050_v22  ;;  %v1581_v60 = vmul.f32 %v5181_v53, %v6071_v36  ;;  %v1887_v6 = vadd.f32 %v1827_v32, %v6077_v29  ;;  %v3057_v10 = vmul.f32 %v6028_v20, %v1163_v26  ;;  %v3179_v29 = vld [vmem:[#allocation3 + $0xd8] sm:$0xff]  ;;  %v4824_v32 = vld [vmem:[#allocation2 + $0x110] sm:$0xff] }
 0x1a1   : > { %1447 = vst.msk [vmem:[#allocation3 + $0xe8] sm:$0xff] %vm541_vm0, %v1383_v30  ;;  %v2809_v25 = vadd.f32 %v2749_v39, %v6085_v45  ;;  %v2811_v43 = vadd.f32 %v2751_v15, %v2503_v47  ;;  %v3059_v1 = vmul.f32 %v6028_v20, %v1249_v12  ;;  %v6148_v3 = vadd.f32 %v2134_v50, %v1886_v52  ;;  %v4823_v52 = vld [vmem:[#allocation2 + $0x100] sm:$0xff]  ;;  %v523_v30 = vpop.f32.mrf.mxu0 }
 0x1a2   : > { %1449 = vst.msk [vmem:[#allocation3 + $0xf8] sm:$0xff] %vm541_vm0, %v1385_v40  ;;  %v1889_v2 = vadd.f32 %v1829_v41, %v1581_v60  ;;  %v2135_v57 = vmul.f32 %v5214_v13, %v1163_v26  ;;  %v2137_v36 = vmul.f32 %v5214_v13, %v1249_v12  ;;  %v6153_v28 = vadd.f32 %v2136_v5, %v1888_v4  ;;  %v6180_v41 = vld [vmem:[#allocation2 + $0x118] sm:$0xff] }
 0x1a3   : > { %v6156_v45 = vadd.f32 %v6037_v34, %v1384_v11  ;;  %v3117_v38 = vadd.f32 %v3057_v10, %v2809_v25  ;;  %v3119_v21 = vadd.f32 %v3059_v1, %v2811_v43  ;;  %v6159_v19 = vadd.f32 %v6032_v27, %v1382_v17  ;;  %598 = vst.msk [vmem:[#allocation2 + $0x1c8] sm:$0xff] %vm541_vm0, %v523_v30  ;;  %v525_v1 = vpop.f32.mrf.mxu0 }
 0x1a4   : > { %v6161_v50 = vadd.f32 %v2135_v57, %v1887_v6  ;;  %v764_v18 = vrot.slane %v4823_v52, 7  ;;  %v1099_v22 = vrot.slane %v4823_v52, 1  ;;  %v796_v31 = vrot.slane %v4824_v32, 7  ;;  %599 = vst [vmem:[#allocation2 + $0x1d0] sm:$0xff] %v525_v1 }
 0x1a5   : > { %v3237_v26 = vadd.f32 %v3177_v56, %v3117_v38  ;;  %v3239_v51 = vadd.f32 %v3179_v29, %v3119_v21  ;;  %v1131_v5 = vrot.slane %v4824_v32, 1  ;;  %v6165_v59 = vadd.f32 %v2137_v36, %v1889_v2  ;;  %v527_v30 = vpop.f32.mrf.mxu0 }
 0x1a6   : > { %v716_v34 = vmul.f32 %v4823_v52, %v5160_v44  ;;  %v1582_v12 = vmul.f32 %v4823_v52, %v5165_v46  ;;  %v2504_v27 = vmul.f32 %v4823_v52, %v7547_v8  ;;  %v717_v16 = vmul.f32 %v7548_v0, %v6163_v58  ;;  %600 = vst.msk [vmem:[#allocation2 + $0x1d8] sm:$0xff] %vm541_vm0, %v527_v30 }
 0x1a7   : > { %3297 = vst.msk [vmem:[#allocation3 + $0xc8] sm:$0xff] %vm541_vm0, %v3237_v26  ;;  %3299 = vst.msk [vmem:[#allocation3 + $0xd8] sm:$0xff] %vm541_vm0, %v3239_v51  ;;  %v829_v11 = vsel %vm812_vm1, %v764_v18, %v796_v31  ;;  %v861_v4 = vsel %vm812_vm1, %v796_v31, %v764_v18  ;;  %v1196_v54 = vsel %vm1147_vm3, %v1131_v5, %v1099_v22  ;;  %v765_v39 = vrot.slane %v6163_v58, 7 }
 0x1a8   : > { %v2252_v47 = vld [vmem:[#allocation3 + $0xe8] sm:$0xff]  ;;  %v1100_v15 = vrot.slane %v6163_v58, 1  ;;  %v6186_v17 = vmul.f32 %v5181_v53, %v6163_v58  ;;  %v915_v40 = vsel %vm877_vm2, 0.0, %v861_v4  ;;  %v6194_v25 = vmul.f32 %v5216_v14, %v6163_v58 }
 0x1a9   : > { %v2254_v60 = vld [vmem:[#allocation3 + $0xf8] sm:$0xff]  ;;  %v2312_v6 = vadd.f32 %v2252_v47, %v6045_v9  ;;  %v1164_v43 = vsel %vm1147_vm3, %v1099_v22, %v1131_v5  ;;  %v1252_v10 = vsel %vm1213_vm4, 0.0, %v1196_v54  ;;  %v718_v57 = vmul.f32 %v4824_v32, %v5160_v44 }
 0x1aa   : > { %v2314_v2 = vadd.f32 %v2254_v60, %v6053_v37  ;;  %v989_v36 = vmul.f32 %v7549_v33, %v829_v11  ;;  %v797_v56 = vrot.slane %v6180_v41, 7  ;;  %v1584_v9 = vmul.f32 %v4824_v32, %v5165_v46 }
 0x1ab   : > { %2372 = vst.msk [vmem:[#allocation3 + $0xe8] sm:$0xff] %vm541_vm0, %v2312_v6  ;;  %v2506_v29 = vmul.f32 %v4824_v32, %v7547_v8  ;;  %v2752_v38 = vmul.f32 %v5224_v23, %v915_v40  ;;  %v719_v21 = vmul.f32 %v7548_v0, %v6180_v41  ;;  %v987_v37 = vmul.f32 %v7549_v33, %v915_v40 }
 0x1ac   : > { %2374 = vst.msk [vmem:[#allocation3 + $0xf8] sm:$0xff] %vm541_vm0, %v2314_v2  ;;  %v1322_v52 = vmul.f32 %v7550_v48, %v1164_v43  ;;  %v1324_v18 = vmul.f32 %v7550_v48, %v1252_v10  ;;  %v2754_v22 = vmul.f32 %v5224_v23, %v829_v11  ;;  %v1830_v58 = vmul.f32 %v7551_v49, %v915_v40 }
 0x1ad   : > { %v2812_v26 = vadd.f32 %v2752_v38, %v2504_v27  ;;  %v3060_v51 = vmul.f32 %v5986_v7, %v1164_v43  ;;  %v3062_v32 = vmul.f32 %v5986_v7, %v1252_v10  ;;  %v1053_v31 = vadd.f32 %v989_v36, %v718_v57 }
 0x1ae   : > { %v1832_v5 = vmul.f32 %v7551_v49, %v829_v11  ;;  %v2814_v4 = vadd.f32 %v2754_v22, %v2506_v29  ;;  %v830_v54 = vsel %vm812_vm1, %v765_v39, %v797_v56  ;;  %v2138_v47 = vmul.f32 %v5184_v55, %v1164_v43 }
 0x1af   : > { %v3120_v60 = vadd.f32 %v3060_v51, %v2812_v26  ;;  %v862_v6 = vsel %vm812_vm1, %v797_v56, %v765_v39  ;;  %v990_v27 = vmul.f32 %v5186_v61, %v830_v54  ;;  %v1051_v40 = vadd.f32 %v987_v37, %v716_v34  ;;  %v531_v37 = vpop.f32.mrf.mxu0 }
 0x1b0   : > { %v3122_v1 = vadd.f32 %v3062_v32, %v2814_v4  ;;  %v916_v11 = vsel %vm877_vm2, 0.0, %v862_v6  ;;  %v1132_v2 = vrot.slane %v6180_v41, 1  ;;  %v1890_v57 = vadd.f32 %v1830_v58, %v1582_v12  ;;  %601 = vst [vmem:[#allocation2 + $0x1e0] sm:$0xff] %v531_v37 }
 0x1b1   : > { %v3240_v36 = vadd.f32 %v3120_v60, %v6159_v19  ;;  %v988_v43 = vmul.f32 %v5186_v61, %v916_v11  ;;  %v1054_v29 = vadd.f32 %v990_v27, %v719_v21  ;;  %v1831_v56 = vmul.f32 %v5191_v63, %v916_v11 }
 0x1b2   : > { %v3242_v38 = vadd.f32 %v3122_v1, %v6156_v45  ;;  %v1165_v39 = vsel %vm1147_vm3, %v1100_v15, %v1132_v2  ;;  %v1197_v34 = vsel %vm1147_vm3, %v1132_v2, %v1100_v15  ;;  %v2140_v22 = vmul.f32 %v5184_v55, %v1252_v10 }
 0x1b3   : > { %3300 = vst [vmem:[#allocation3 + $0xe0] sm:$0xff] %v3240_v36  ;;  %v1052_v12 = vadd.f32 %v988_v43, %v717_v16  ;;  %v1253_v19 = vsel %vm1213_vm4, 0.0, %v1197_v34  ;;  %v1323_v21 = vmul.f32 %v5188_v62, %v1165_v39  ;;  %v1388_v45 = vadd.f32 %v1324_v18, %v1053_v31 }
 0x1b4   : > { %v1892_v58 = vadd.f32 %v1832_v5, %v1584_v9  ;;  %3302 = vst [vmem:[#allocation3 + $0xf0] sm:$0xff] %v3242_v38  ;;  %v1325_v26 = vmul.f32 %v5188_v62, %v1253_v19  ;;  %v1833_v15 = vmul.f32 %v5191_v63, %v830_v54  ;;  %v2507_v32 = vmul.f32 %v5216_v14, %v6180_v41  ;;  %v6269_v38 = vld [vmem:[#allocation2 + $0x128] sm:$0xff] }
 0x1b5   : > { %v1387_v51 = vadd.f32 %v1323_v21, %v1052_v12  ;;  %v2753_v10 = vmul.f32 %v5226_v24, %v916_v11  ;;  %v2755_v16 = vmul.f32 %v5226_v24, %v830_v54  ;;  %v1386_v4 = vadd.f32 %v1322_v52, %v1051_v40  ;;  %v3181_v40 = vld [vmem:[#allocation3 + $0xe8] sm:$0xff] }
 0x1b6   : > { %v1389_v30 = vadd.f32 %v1325_v26, %v1054_v29  ;;  %v1585_v60 = vmul.f32 %v5181_v53, %v6180_v41  ;;  %v1891_v9 = vadd.f32 %v1831_v56, %v6186_v17  ;;  %v3061_v5 = vmul.f32 %v6028_v20, %v1165_v39  ;;  %v3183_v17 = vld [vmem:[#allocation3 + $0xf8] sm:$0xff]  ;;  %v4826_v56 = vld [vmem:[#allocation2 + $0x130] sm:$0xff] }
 0x1b7   : > { %1451 = vst.msk [vmem:[#allocation3 + $0x108] sm:$0xff] %vm541_vm0, %v1387_v51  ;;  %v2813_v18 = vadd.f32 %v2753_v10, %v6194_v25  ;;  %v2815_v31 = vadd.f32 %v2755_v16, %v2507_v32  ;;  %v3063_v6 = vmul.f32 %v6028_v20, %v1253_v19  ;;  %v6254_v27 = vadd.f32 %v2138_v47, %v1890_v57  ;;  %v4825_v57 = vld [vmem:[#allocation2 + $0x120] sm:$0xff]  ;;  %v533_v51 = vpop.f32.mrf.mxu0 }
 0x1b8   : > { %1453 = vst.msk [vmem:[#allocation3 + $0x118] sm:$0xff] %vm541_vm0, %v1389_v30  ;;  %v1893_v52 = vadd.f32 %v1833_v15, %v1585_v60  ;;  %v2139_v54 = vmul.f32 %v5214_v13, %v1165_v39  ;;  %v2141_v41 = vmul.f32 %v5214_v13, %v1253_v19  ;;  %v6259_v1 = vadd.f32 %v2140_v22, %v1892_v58  ;;  %v6286_v15 = vld [vmem:[#allocation2 + $0x138] sm:$0xff] }
 0x1b9   : > { %v6262_v25 = vadd.f32 %v6153_v28, %v1388_v45  ;;  %v3121_v11 = vadd.f32 %v3061_v5, %v2813_v18  ;;  %v3123_v2 = vadd.f32 %v3063_v6, %v2815_v31  ;;  %v6265_v36 = vadd.f32 %v6148_v3, %v1386_v4  ;;  %602 = vst.msk [vmem:[#allocation2 + $0x1e8] sm:$0xff] %vm541_vm0, %v533_v51  ;;  %v535_v6 = vpop.f32.mrf.mxu0 }
 0x1ba   : > { %v6267_v47 = vadd.f32 %v2139_v54, %v1891_v9  ;;  %v766_v43 = vrot.slane %v4825_v57, 7  ;;  %v1101_v29 = vrot.slane %v4825_v57, 1  ;;  %v798_v37 = vrot.slane %v4826_v56, 7  ;;  %603 = vst [vmem:[#allocation2 + $0x1f0] sm:$0xff] %v535_v6 }
 0x1bb   : > { %v3241_v39 = vadd.f32 %v3181_v40, %v3121_v11  ;;  %v3243_v34 = vadd.f32 %v3183_v17, %v3123_v2  ;;  %v1133_v22 = vrot.slane %v4826_v56, 1  ;;  %v6271_v12 = vadd.f32 %v2141_v41, %v1893_v52 }
 0x1bc   : > { %v720_v28 = vmul.f32 %v4825_v57, %v5160_v44  ;;  %v1586_v19 = vmul.f32 %v4825_v57, %v5165_v46  ;;  %v2508_v3 = vmul.f32 %v4825_v57, %v7547_v8  ;;  %v721_v21 = vmul.f32 %v7548_v0, %v6269_v38  ;;  %v537_v57 = vpop.f32.mrf.mxu0 }
 0x1bd   : > { %3301 = vst.msk [vmem:[#allocation3 + $0xe8] sm:$0xff] %vm541_vm0, %v3241_v39  ;;  %3303 = vst.msk [vmem:[#allocation3 + $0xf8] sm:$0xff] %vm541_vm0, %v3243_v34  ;;  %v831_v45 = vsel %vm812_vm1, %v766_v43, %v798_v37  ;;  %v863_v58 = vsel %vm812_vm1, %v798_v37, %v766_v43  ;;  %v1198_v26 = vsel %vm1147_vm3, %v1133_v22, %v1101_v29  ;;  %v767_v10 = vrot.slane %v6269_v38, 7 }
 0x1be   : > { %v2256_v32 = vld [vmem:[#allocation3 + $0x108] sm:$0xff]  ;;  %v1102_v16 = vrot.slane %v6269_v38, 1  ;;  %v6292_v4 = vmul.f32 %v5181_v53, %v6269_v38  ;;  %v919_v30 = vsel %vm877_vm2, 0.0, %v863_v58  ;;  %v6300_v18 = vmul.f32 %v5216_v14, %v6269_v38  ;;  %604 = vst.msk [vmem:[#allocation2 + $0x1f8] sm:$0xff] %vm541_vm0, %v537_v57 }
 0x1bf   : > { %v2258_v60 = vld [vmem:[#allocation3 + $0x118] sm:$0xff]  ;;  %v2316_v9 = vadd.f32 %v2256_v32, %v6161_v50  ;;  %v1166_v31 = vsel %vm1147_vm3, %v1101_v29, %v1133_v22  ;;  %v1256_v5 = vsel %vm1213_vm4, 0.0, %v1198_v26  ;;  %v722_v54 = vmul.f32 %v4826_v56, %v5160_v44 }
 0x1c0   : > { %v2318_v52 = vadd.f32 %v2258_v60, %v6165_v59  ;;  %v993_v41 = vmul.f32 %v7549_v33, %v831_v45  ;;  %v799_v40 = vrot.slane %v6286_v15, 7  ;;  %v1588_v50 = vmul.f32 %v4826_v56, %v5165_v46 }
 0x1c1   : > { %2376 = vst.msk [vmem:[#allocation3 + $0x108] sm:$0xff] %vm541_vm0, %v2316_v9  ;;  %v2510_v17 = vmul.f32 %v4826_v56, %v7547_v8  ;;  %v2756_v11 = vmul.f32 %v5224_v23, %v919_v30  ;;  %v723_v2 = vmul.f32 %v7548_v0, %v6286_v15  ;;  %v991_v59 = vmul.f32 %v7549_v33, %v919_v30 }
 0x1c2   : > { %2378 = vst.msk [vmem:[#allocation3 + $0x118] sm:$0xff] %vm541_vm0, %v2318_v52  ;;  %v1326_v43 = vmul.f32 %v7550_v48, %v1166_v31  ;;  %v1328_v29 = vmul.f32 %v7550_v48, %v1256_v5  ;;  %v2758_v38 = vmul.f32 %v5224_v23, %v831_v45  ;;  %v1834_v39 = vmul.f32 %v7551_v49, %v919_v30 }
 0x1c3   : > { %v2816_v34 = vadd.f32 %v2756_v11, %v2508_v3  ;;  %v3064_v56 = vmul.f32 %v5986_v7, %v1166_v31  ;;  %v3066_v37 = vmul.f32 %v5986_v7, %v1256_v5  ;;  %v1057_v22 = vadd.f32 %v993_v41, %v722_v54 }
 0x1c4   : > { %v1836_v58 = vmul.f32 %v7551_v49, %v831_v45  ;;  %v2818_v26 = vadd.f32 %v2758_v38, %v2510_v17  ;;  %v832_v51 = vsel %vm812_vm1, %v767_v10, %v799_v40  ;;  %v2142_v32 = vmul.f32 %v5184_v55, %v1166_v31 }
 0x1c5   : > { %v3124_v60 = vadd.f32 %v3064_v56, %v2816_v34  ;;  %v864_v9 = vsel %vm812_vm1, %v799_v40, %v767_v10  ;;  %v994_v30 = vmul.f32 %v5186_v61, %v832_v51  ;;  %v1055_v3 = vadd.f32 %v991_v59, %v720_v28 }
 0x1c6   : > { %v3126_v6 = vadd.f32 %v3066_v37, %v2818_v26  ;;  %v920_v52 = vsel %vm877_vm2, 0.0, %v864_v9  ;;  %v1134_v54 = vrot.slane %v6286_v15, 1  ;;  %v1894_v45 = vadd.f32 %v1834_v39, %v1586_v19 }
 0x1c7   : > { %v3244_v41 = vadd.f32 %v3124_v60, %v6265_v36  ;;  %v992_v17 = vmul.f32 %v5186_v61, %v920_v52  ;;  %v1058_v11 = vadd.f32 %v994_v30, %v723_v2  ;;  %v1835_v40 = vmul.f32 %v5191_v63, %v920_v52 }
 0x1c8   : > { %v3246_v31 = vadd.f32 %v3126_v6, %v6262_v25  ;;  %v1167_v10 = vsel %vm1147_vm3, %v1102_v16, %v1134_v54  ;;  %v1199_v28 = vsel %vm1147_vm3, %v1134_v54, %v1102_v16  ;;  %v2144_v57 = vmul.f32 %v5184_v55, %v1256_v5  ;;  %v3185_v30 = vld [vmem:[#allocation3 + $0x108] sm:$0xff] }
 0x1c9   : > { %3304 = vst [vmem:[#allocation3 + $0x100] sm:$0xff] %v3244_v41  ;;  %v1056_v59 = vadd.f32 %v992_v17, %v721_v21  ;;  %v1257_v36 = vsel %vm1213_vm4, 0.0, %v1199_v28  ;;  %v1327_v19 = vmul.f32 %v5188_v62, %v1167_v10  ;;  %v1392_v2 = vadd.f32 %v1328_v29, %v1057_v22  ;;  %v4828_v28 = vld [vmem:[#allocation2 + $0x150] sm:$0xff] }
 0x1ca   : > { %v1896_v38 = vadd.f32 %v1836_v58, %v1588_v50  ;;  %3306 = vst [vmem:[#allocation3 + $0x110] sm:$0xff] %v3246_v31  ;;  %v1329_v25 = vmul.f32 %v5188_v62, %v1257_v36  ;;  %v1837_v39 = vmul.f32 %v5191_v63, %v832_v51  ;;  %v2511_v16 = vmul.f32 %v5216_v14, %v6286_v15 }
 0x1cb   : > { %v1391_v34 = vadd.f32 %v1327_v19, %v1056_v59  ;;  %v2757_v5 = vmul.f32 %v5226_v24, %v920_v52  ;;  %v2759_v21 = vmul.f32 %v5226_v24, %v832_v51  ;;  %v1390_v56 = vadd.f32 %v1326_v43, %v1055_v3 }
 0x1cc   : > { %v1393_v37 = vadd.f32 %v1329_v25, %v1058_v11  ;;  %v1589_v26 = vmul.f32 %v5181_v53, %v6286_v15  ;;  %v1895_v50 = vadd.f32 %v1835_v40, %v6292_v4  ;;  %v3065_v58 = vmul.f32 %v6028_v20, %v1167_v10  ;;  %v3187_v4 = vld [vmem:[#allocation3 + $0x118] sm:$0xff]  ;;  %v6375_v11 = vld [vmem:[#allocation2 + $0x148] sm:$0xff] }
 0x1cd   : > { %1455 = vst.msk [vmem:[#allocation3 + $0x128] sm:$0xff] %vm541_vm0, %v1391_v34  ;;  %v2817_v29 = vadd.f32 %v2757_v5, %v6300_v18  ;;  %v2819_v22 = vadd.f32 %v2759_v21, %v2511_v16  ;;  %v3067_v60 = vmul.f32 %v6028_v20, %v1257_v36  ;;  %v6360_v9 = vadd.f32 %v2142_v32, %v1894_v45  ;;  %v4827_v45 = vld [vmem:[#allocation2 + $0x140] sm:$0xff] }
 0x1ce   : > { %1457 = vst.msk [vmem:[#allocation3 + $0x138] sm:$0xff] %vm541_vm0, %v1393_v37  ;;  %v1897_v43 = vadd.f32 %v1837_v39, %v1589_v26  ;;  %v2143_v51 = vmul.f32 %v5214_v13, %v1167_v10  ;;  %v2145_v15 = vmul.f32 %v5214_v13, %v1257_v36  ;;  %v6365_v3 = vadd.f32 %v2144_v57, %v1896_v38  ;;  %v6392_v39 = vld [vmem:[#allocation2 + $0x158] sm:$0xff] }
 0x1cf   : > { %v6368_v18 = vadd.f32 %v6259_v1, %v1392_v2  ;;  %v3125_v6 = vadd.f32 %v3065_v58, %v2817_v29  ;;  %v3127_v52 = vadd.f32 %v3067_v60, %v2819_v22  ;;  %v6371_v54 = vadd.f32 %v6254_v27, %v1390_v56 }
 0x1d0   : > { %v6373_v32 = vadd.f32 %v2143_v51, %v1895_v50  ;;  %v768_v41 = vrot.slane %v4827_v45, 7  ;;  %v1103_v17 = vrot.slane %v4827_v45, 1  ;;  %v800_v40 = vrot.slane %v4828_v28, 7 }
 0x1d1   : > { %v3245_v31 = vadd.f32 %v3185_v30, %v3125_v6  ;;  %v3247_v10 = vadd.f32 %v3187_v4, %v3127_v52  ;;  %v1135_v57 = vrot.slane %v4828_v28, 1  ;;  %v6377_v59 = vadd.f32 %v2145_v15, %v1897_v43 }
 0x1d2   : > { %v724_v1 = vmul.f32 %v4827_v45, %v5160_v44  ;;  %v1590_v36 = vmul.f32 %v4827_v45, %v5165_v46  ;;  %v2512_v27 = vmul.f32 %v4827_v45, %v7547_v8  ;;  %v725_v19 = vmul.f32 %v7548_v0, %v6375_v11 }
 0x1d3   : > { %3305 = vst.msk [vmem:[#allocation3 + $0x108] sm:$0xff] %vm541_vm0, %v3245_v31  ;;  %3307 = vst.msk [vmem:[#allocation3 + $0x118] sm:$0xff] %vm541_vm0, %v3247_v10  ;;  %v833_v2 = vsel %vm812_vm1, %v768_v41, %v800_v40  ;;  %v865_v38 = vsel %vm812_vm1, %v800_v40, %v768_v41  ;;  %v1200_v25 = vsel %vm1147_vm3, %v1135_v57, %v1103_v17  ;;  %v769_v16 = vrot.slane %v6375_v11, 7 }
 0x1d4   : > { %v2260_v34 = vld [vmem:[#allocation3 + $0x128] sm:$0xff]  ;;  %v1104_v5 = vrot.slane %v6375_v11, 1  ;;  %v1591_v21 = vmul.f32 %v5181_v53, %v6375_v11  ;;  %v923_v56 = vsel %vm877_vm2, 0.0, %v865_v38  ;;  %v2513_v50 = vmul.f32 %v5216_v14, %v6375_v11 }
 0x1d5   : > { %v2262_v37 = vld [vmem:[#allocation3 + $0x138] sm:$0xff]  ;;  %v2320_v26 = vadd.f32 %v2260_v34, %v6267_v47  ;;  %v1168_v29 = vsel %vm1147_vm3, %v1103_v17, %v1135_v57  ;;  %v1260_v22 = vsel %vm1213_vm4, 0.0, %v1200_v25  ;;  %v726_v60 = vmul.f32 %v4828_v28, %v5160_v44 }
 0x1d6   : > { %v2322_v58 = vadd.f32 %v2262_v37, %v6271_v12  ;;  %v997_v43 = vmul.f32 %v7549_v33, %v833_v2  ;;  %v801_v51 = vrot.slane %v6392_v39, 7  ;;  %v1592_v47 = vmul.f32 %v4828_v28, %v5165_v46 }
 0x1d7   : > { %2380 = vst.msk [vmem:[#allocation3 + $0x128] sm:$0xff] %vm541_vm0, %v2320_v26  ;;  %v2514_v15 = vmul.f32 %v4828_v28, %v7547_v8  ;;  %v2760_v30 = vmul.f32 %v5224_v23, %v923_v56  ;;  %v727_v4 = vmul.f32 %v7548_v0, %v6392_v39  ;;  %v995_v12 = vmul.f32 %v7549_v33, %v923_v56 }
 0x1d8   : > { %2382 = vst.msk [vmem:[#allocation3 + $0x138] sm:$0xff] %vm541_vm0, %v2322_v58  ;;  %v1330_v6 = vmul.f32 %v7550_v48, %v1168_v29  ;;  %v1332_v52 = vmul.f32 %v7550_v48, %v1260_v22  ;;  %v2762_v45 = vmul.f32 %v5224_v23, %v833_v2  ;;  %v1838_v41 = vmul.f32 %v7551_v49, %v923_v56 }
 0x1d9   : > { %v2820_v17 = vadd.f32 %v2760_v30, %v2512_v27  ;;  %v3068_v11 = vmul.f32 %v5986_v7, %v1168_v29  ;;  %v3070_v31 = vmul.f32 %v5986_v7, %v1260_v22  ;;  %v1061_v10 = vadd.f32 %v997_v43, %v726_v60 }
 0x1da   : > { %v1840_v28 = vmul.f32 %v7551_v49, %v833_v2  ;;  %v2822_v40 = vadd.f32 %v2762_v45, %v2514_v15  ;;  %v834_v57 = vsel %vm812_vm1, %v769_v16, %v801_v51  ;;  %v2146_v38 = vmul.f32 %v5184_v55, %v1168_v29 }
 0x1db   : > { %v3128_v25 = vadd.f32 %v3068_v11, %v2820_v17  ;;  %v866_v34 = vsel %vm812_vm1, %v801_v51, %v769_v16  ;;  %v998_v56 = vmul.f32 %v5186_v61, %v834_v57  ;;  %v1059_v27 = vadd.f32 %v995_v12, %v724_v1 }
 0x1dc   : > { %v3130_v37 = vadd.f32 %v3070_v31, %v2822_v40  ;;  %v924_v7 = vsel %vm877_vm2, 0.0, %v866_v34  ;;  %v1136_v26 = vrot.slane %v6392_v39, 1  ;;  %v1898_v2 = vadd.f32 %v1838_v41, %v1590_v36 }
 0x1dd   : > { %v3248_v58 = vadd.f32 %v3128_v25, %v6371_v54  ;;  %v996_v60 = vmul.f32 %v5186_v61, %v924_v7  ;;  %v1062_v43 = vadd.f32 %v998_v56, %v727_v4  ;;  %v1839_v51 = vmul.f32 %v5191_v63, %v924_v7 }
 0x1de   : > { %v3250_v29 = vadd.f32 %v3130_v37, %v6368_v18  ;;  %v1169_v16 = vsel %vm1147_vm3, %v1104_v5, %v1136_v26  ;;  %v1201_v1 = vsel %vm1147_vm3, %v1136_v26, %v1104_v5  ;;  %v2148_v15 = vmul.f32 %v5184_v55, %v1260_v22  ;;  %v3189_v56 = vld [vmem:[#allocation3 + $0x128] sm:$0xff] }
 0x1df   : > { %3308 = vst [vmem:[#allocation3 + $0x120] sm:$0xff] %v3248_v58  ;;  %v1060_v30 = vadd.f32 %v996_v60, %v725_v19  ;;  %v1261_v54 = vsel %vm1213_vm4, 0.0, %v1201_v1  ;;  %v1331_v36 = vmul.f32 %v5188_v62, %v1169_v16  ;;  %v1396_v4 = vadd.f32 %v1332_v52, %v1061_v10  ;;  %v6473_v58 = vld [vmem:[#allocation2 + $0x168] sm:$0xff] }
 0x1e0   : > { %v1900_v12 = vadd.f32 %v1840_v28, %v1592_v47  ;;  %3310 = vst [vmem:[#allocation3 + $0x130] sm:$0xff] %v3250_v29  ;;  %v1333_v18 = vmul.f32 %v5188_v62, %v1261_v54  ;;  %v1841_v45 = vmul.f32 %v5191_v63, %v834_v57  ;;  %v2515_v5 = vmul.f32 %v5216_v14, %v6392_v39  ;;  %v4830_v29 = vld [vmem:[#allocation2 + $0x170] sm:$0xff] }
 0x1e1   : > { %v1395_v41 = vadd.f32 %v1331_v36, %v1060_v30  ;;  %v2761_v22 = vmul.f32 %v5226_v24, %v924_v7  ;;  %v2763_v19 = vmul.f32 %v5226_v24, %v834_v57  ;;  %v1394_v17 = vadd.f32 %v1330_v6, %v1059_v27  ;;  %v4829_v7 = vld [vmem:[#allocation2 + $0x160] sm:$0xff] }
 0x1e2   : > { %v1397_v11 = vadd.f32 %v1333_v18, %v1062_v43  ;;  %v1593_v31 = vmul.f32 %v5181_v53, %v6392_v39  ;;  %v1899_v52 = vadd.f32 %v1839_v51, %v1591_v21  ;;  %v3069_v28 = vmul.f32 %v6028_v20, %v1169_v16  ;;  %v3191_v39 = vld [vmem:[#allocation3 + $0x138] sm:$0xff] }
 0x1e3   : > { %1459 = vst.msk [vmem:[#allocation3 + $0x148] sm:$0xff] %vm541_vm0, %v1395_v41  ;;  %v2821_v47 = vadd.f32 %v2761_v22, %v2513_v50  ;;  %v2823_v10 = vadd.f32 %v2763_v19, %v2515_v5  ;;  %v3071_v40 = vmul.f32 %v6028_v20, %v1261_v54  ;;  %v6458_v25 = vadd.f32 %v2146_v38, %v1898_v2 }
 0x1e4   : > { %1461 = vst.msk [vmem:[#allocation3 + $0x158] sm:$0xff] %vm541_vm0, %v1397_v11  ;;  %v1901_v34 = vadd.f32 %v1841_v45, %v1593_v31  ;;  %v2147_v6 = vmul.f32 %v5214_v13, %v1169_v16  ;;  %v2149_v57 = vmul.f32 %v5214_v13, %v1261_v54  ;;  %v6463_v21 = vadd.f32 %v2148_v15, %v1900_v12  ;;  %v6490_v12 = vld [vmem:[#allocation2 + $0x178] sm:$0xff] }
 0x1e5   : > { %v6466_v50 = vadd.f32 %v6365_v3, %v1396_v4  ;;  %v3129_v27 = vadd.f32 %v3069_v28, %v2821_v47  ;;  %v3131_v37 = vadd.f32 %v3071_v40, %v2823_v10  ;;  %v6469_v20 = vadd.f32 %v6360_v9, %v1394_v17 }
 0x1e6   : > { %v6471_v38 = vadd.f32 %v2147_v6, %v1899_v52  ;;  %v770_v26 = vrot.slane %v4829_v7, 7  ;;  %v1105_v2 = vrot.slane %v4829_v7, 1  ;;  %v802_v16 = vrot.slane %v4830_v29, 7 }
 0x1e7   : > { %v3249_v60 = vadd.f32 %v3189_v56, %v3129_v27  ;;  %v3251_v43 = vadd.f32 %v3191_v39, %v3131_v37  ;;  %v1137_v1 = vrot.slane %v4830_v29, 1  ;;  %v6475_v51 = vadd.f32 %v2149_v57, %v1901_v34 }
 0x1e8   : > { %v728_v3 = vmul.f32 %v4829_v7, %v5160_v44  ;;  %v1594_v15 = vmul.f32 %v4829_v7, %v5165_v46  ;;  %v2516_v9 = vmul.f32 %v4829_v7, %v7547_v8  ;;  %v729_v30 = vmul.f32 %v7548_v0, %v6473_v58 }
 0x1e9   : > { %3309 = vst.msk [vmem:[#allocation3 + $0x128] sm:$0xff] %vm541_vm0, %v3249_v60  ;;  %3311 = vst.msk [vmem:[#allocation3 + $0x138] sm:$0xff] %vm541_vm0, %v3251_v43  ;;  %v835_v54 = vsel %vm812_vm1, %v770_v26, %v802_v16  ;;  %v867_v36 = vsel %vm812_vm1, %v802_v16, %v770_v26  ;;  %v1202_v4 = vsel %vm1147_vm3, %v1137_v1, %v1105_v2  ;;  %v771_v45 = vrot.slane %v6473_v58, 7  ;;  %v6526_v26 = vld [vmem:[%s7511_s2 + $0x10] ss:$0 sm:$0xff] }
 0x1ea   : > { %v2264_v18 = vld [vmem:[#allocation3 + $0x148] sm:$0xff]  ;;  %v1106_v41 = vrot.slane %v6473_v58, 1  ;;  %v6496_v5 = vmul.f32 %v5181_v53, %v6473_v58  ;;  %v927_v22 = vsel %vm877_vm2, 0.0, %v867_v36  ;;  %v2517_v11 = vmul.f32 %v5216_v14, %v6473_v58 }
 0x1eb   : > { %v2266_v19 = vld [vmem:[#allocation3 + $0x158] sm:$0xff]  ;;  %v2324_v17 = vadd.f32 %v2264_v18, %v6373_v32  ;;  %v1170_v31 = vsel %vm1147_vm3, %v1105_v2, %v1137_v1  ;;  %v1264_v52 = vsel %vm1213_vm4, 0.0, %v1202_v4  ;;  %v730_v10 = vmul.f32 %v4830_v29, %v5160_v44 }
 0x1ec   : > { %v2326_v47 = vadd.f32 %v2266_v19, %v6377_v59  ;;  %v1001_v28 = vmul.f32 %v7549_v33, %v835_v54  ;;  %v803_v40 = vrot.slane %v6490_v12, 7  ;;  %v1596_v32 = vmul.f32 %v4830_v29, %v5165_v46 }
 0x1ed   : > { %2384 = vst.msk [vmem:[#allocation3 + $0x148] sm:$0xff] %vm541_vm0, %v2324_v17  ;;  %v2518_v34 = vmul.f32 %v4830_v29, %v7547_v8  ;;  %v2764_v6 = vmul.f32 %v5224_v23, %v927_v22  ;;  %v731_v57 = vmul.f32 %v7548_v0, %v6490_v12  ;;  %v999_v59 = vmul.f32 %v7549_v33, %v927_v22 }
 0x1ee   : > { %2386 = vst.msk [vmem:[#allocation3 + $0x158] sm:$0xff] %vm541_vm0, %v2326_v47  ;;  %v1334_v56 = vmul.f32 %v7550_v48, %v1170_v31  ;;  %v1336_v39 = vmul.f32 %v7550_v48, %v1264_v52  ;;  %v2766_v27 = vmul.f32 %v5224_v23, %v835_v54  ;;  %v1842_v37 = vmul.f32 %v7551_v49, %v927_v22 }
 0x1ef   : > { %v2824_v7 = vadd.f32 %v2764_v6, %v2516_v9  ;;  %v3072_v2 = vmul.f32 %v6526_v26, %v1170_v31  ;;  %v3074_v58 = vmul.f32 %v6526_v26, %v1264_v52  ;;  %v1065_v60 = vadd.f32 %v1001_v28, %v730_v10 }
 0x1f0   : > { %v1844_v43 = vmul.f32 %v7551_v49, %v835_v54  ;;  %v2826_v29 = vadd.f32 %v2766_v27, %v2518_v34  ;;  %v836_v16 = vsel %vm812_vm1, %v771_v45, %v803_v40  ;;  %v2150_v1 = vmul.f32 %v5184_v55, %v1170_v31 }
 0x1f1   : > { %v3132_v36 = vadd.f32 %v3072_v2, %v2824_v7  ;;  %v868_v9 = vsel %vm812_vm1, %v803_v40, %v771_v45  ;;  %v1002_v4 = vmul.f32 %v5186_v61, %v836_v16  ;;  %v1063_v18 = vadd.f32 %v999_v59, %v728_v3 }
 0x1f2   : > { %v3134_v22 = vadd.f32 %v3074_v58, %v2826_v29  ;;  %v928_v19 = vsel %vm877_vm2, 0.0, %v868_v9  ;;  %v1138_v17 = vrot.slane %v6490_v12, 1  ;;  %v1902_v54 = vadd.f32 %v1842_v37, %v1594_v15 }
 0x1f3   : > { %v3252_v47 = vadd.f32 %v3132_v36, %v6469_v20  ;;  %v1000_v10 = vmul.f32 %v5186_v61, %v928_v19  ;;  %v1066_v28 = vadd.f32 %v1002_v4, %v731_v57  ;;  %v1843_v40 = vmul.f32 %v5191_v63, %v928_v19 }
 0x1f4   : > { %v3254_v31 = vadd.f32 %v3134_v22, %v6466_v50  ;;  %v1171_v45 = vsel %vm1147_vm3, %v1106_v41, %v1138_v17  ;;  %v1203_v3 = vsel %vm1147_vm3, %v1138_v17, %v1106_v41  ;;  %v2152_v34 = vmul.f32 %v5184_v55, %v1264_v52 }
 0x1f5   : > { %3312 = vst [vmem:[#allocation3 + $0x140] sm:$0xff] %v3252_v47  ;;  %v1064_v6 = vadd.f32 %v1000_v10, %v729_v30  ;;  %v1265_v20 = vsel %vm1213_vm4, 0.0, %v1203_v3  ;;  %v1335_v15 = vmul.f32 %v5188_v62, %v1171_v45  ;;  %v1400_v57 = vadd.f32 %v1336_v39, %v1065_v60  ;;  %v3195_v9 = vld [vmem:[#allocation3 + $0x158] sm:$0xff]  ;;  %v4834_v3 = vld [vmem:[#allocation2 + $0x190] sm:$0xff] }
 0x1f6   : > { %v1904_v59 = vadd.f32 %v1844_v43, %v1596_v32  ;;  %3314 = vst [vmem:[#allocation3 + $0x150] sm:$0xff] %v3254_v31  ;;  %v1337_v50 = vmul.f32 %v5188_v62, %v1265_v20  ;;  %v1845_v27 = vmul.f32 %v5191_v63, %v836_v16  ;;  %v2519_v41 = vmul.f32 %v5216_v14, %v6490_v12  ;;  %v6565_v43 = vld [vmem:[%s7511_s2 + $0x18] ss:$0 sm:$0xff] }
 0x1f7   : > { %v1399_v37 = vadd.f32 %v1335_v15, %v1064_v6  ;;  %v2765_v52 = vmul.f32 %v5226_v24, %v928_v19  ;;  %v2767_v30 = vmul.f32 %v5226_v24, %v836_v16  ;;  %v1398_v7 = vadd.f32 %v1334_v56, %v1063_v18 }
 0x1f8   : > { %v1401_v2 = vadd.f32 %v1337_v50, %v1066_v28  ;;  %v1597_v58 = vmul.f32 %v5181_v53, %v6490_v12  ;;  %v1903_v32 = vadd.f32 %v1843_v40, %v6496_v5  ;;  %v3073_v29 = vmul.f32 %v6565_v43, %v1171_v45  ;;  %v6584_v28 = vld [vmem:[#allocation2 + $0x188] sm:$0xff] }
 0x1f9   : > { %1463 = vst.msk [vmem:[#allocation3 + $0x168] sm:$0xff] %vm541_vm0, %v1399_v37  ;;  %v2825_v39 = vadd.f32 %v2765_v52, %v2517_v11  ;;  %v2827_v60 = vadd.f32 %v2767_v30, %v2519_v41  ;;  %v3075_v16 = vmul.f32 %v6565_v43, %v1265_v20  ;;  %v6569_v56 = vadd.f32 %v2150_v1, %v1902_v54  ;;  %v3193_v11 = vld [vmem:[#allocation3 + $0x148] sm:$0xff]  ;;  %v4833_v54 = vld [vmem:[#allocation2 + $0x180] sm:$0xff] }
 0x1fa   : > { %1465 = vst.msk [vmem:[#allocation3 + $0x178] sm:$0xff] %vm541_vm0, %v1401_v2  ;;  %v1905_v12 = vadd.f32 %v1845_v27, %v1597_v58  ;;  %v2151_v5 = vmul.f32 %v5214_v13, %v1171_v45  ;;  %v2153_v36 = vmul.f32 %v5214_v13, %v1265_v20  ;;  %v6574_v4 = vadd.f32 %v2152_v34, %v1904_v59  ;;  %v6601_v27 = vld [vmem:[#allocation2 + $0x198] sm:$0xff] }
 0x1fb   : > { %v6577_v18 = vadd.f32 %v6463_v21, %v1400_v57  ;;  %v3133_v22 = vadd.f32 %v3073_v29, %v2825_v39  ;;  %v3135_v19 = vadd.f32 %v3075_v16, %v2827_v60  ;;  %v6580_v17 = vadd.f32 %v6458_v25, %v1398_v7 }
 0x1fc   : > { %v6582_v1 = vadd.f32 %v2151_v5, %v1903_v32  ;;  %v772_v47 = vrot.slane %v4833_v54, 7  ;;  %v1107_v10 = vrot.slane %v4833_v54, 1  ;;  %v804_v40 = vrot.slane %v4834_v3, 7 }
 0x1fd   : > { %v3253_v31 = vadd.f32 %v3193_v11, %v3133_v22  ;;  %v3255_v45 = vadd.f32 %v3195_v9, %v3135_v19  ;;  %v1139_v34 = vrot.slane %v4834_v3, 1  ;;  %v6586_v6 = vadd.f32 %v2153_v36, %v1905_v12 }
 0x1fe   : > { %v732_v21 = vmul.f32 %v4833_v54, %v5160_v44  ;;  %v1598_v20 = vmul.f32 %v4833_v54, %v5165_v46  ;;  %v2520_v25 = vmul.f32 %v4833_v54, %v7547_v8  ;;  %v733_v15 = vmul.f32 %v7548_v0, %v6584_v28 }
 0x1ff   : > { %3313 = vst.msk [vmem:[#allocation3 + $0x148] sm:$0xff] %vm541_vm0, %v3253_v31  ;;  %3315 = vst.msk [vmem:[#allocation3 + $0x158] sm:$0xff] %vm541_vm0, %v3255_v45  ;;  %v837_v57 = vsel %vm812_vm1, %v772_v47, %v804_v40  ;;  %v869_v59 = vsel %vm812_vm1, %v804_v40, %v772_v47  ;;  %v1204_v50 = vsel %vm1147_vm3, %v1139_v34, %v1107_v10  ;;  %v773_v41 = vrot.slane %v6584_v28, 7 }
 0x200   : > { %v2268_v37 = vld [vmem:[#allocation3 + $0x168] sm:$0xff]  ;;  %v1108_v52 = vrot.slane %v6584_v28, 1  ;;  %v1599_v30 = vmul.f32 %v5181_v53, %v6584_v28  ;;  %v931_v7 = vsel %vm877_vm2, 0.0, %v869_v59  ;;  %v2521_v32 = vmul.f32 %v5216_v14, %v6584_v28 }
 0x201   : > { %v2270_v2 = vld [vmem:[#allocation3 + $0x178] sm:$0xff]  ;;  %v2328_v58 = vadd.f32 %v2268_v37, %v6471_v38  ;;  %v1172_v39 = vsel %vm1147_vm3, %v1107_v10, %v1139_v34  ;;  %v1268_v60 = vsel %vm1213_vm4, 0.0, %v1204_v50  ;;  %v734_v16 = vmul.f32 %v4834_v3, %v5160_v44 }
 0x202   : > { %v2330_v29 = vadd.f32 %v2270_v2, %v6475_v51  ;;  %v1005_v12 = vmul.f32 %v7549_v33, %v837_v57  ;;  %v805_v5 = vrot.slane %v6601_v27, 7  ;;  %v1600_v38 = vmul.f32 %v4834_v3, %v5165_v46 }
 0x203   : > { %2388 = vst.msk [vmem:[#allocation3 + $0x168] sm:$0xff] %vm541_vm0, %v2328_v58  ;;  %v2522_v36 = vmul.f32 %v4834_v3, %v7547_v8  ;;  %v2768_v11 = vmul.f32 %v5224_v23, %v931_v7  ;;  %v735_v9 = vmul.f32 %v7548_v0, %v6601_v27  ;;  %v1003_v51 = vmul.f32 %v7549_v33, %v931_v7 }
 0x204   : > { %2390 = vst.msk [vmem:[#allocation3 + $0x178] sm:$0xff] %vm541_vm0, %v2330_v29  ;;  %v1338_v22 = vmul.f32 %v7550_v48, %v1172_v39  ;;  %v1340_v19 = vmul.f32 %v7550_v48, %v1268_v60  ;;  %v2770_v54 = vmul.f32 %v5224_v23, %v837_v57  ;;  %v1846_v47 = vmul.f32 %v7551_v49, %v931_v7 }
 0x205   : > { %v2828_v10 = vadd.f32 %v2768_v11, %v2520_v25  ;;  %v3076_v28 = vmul.f32 %v6526_v26, %v1172_v39  ;;  %v3078_v31 = vmul.f32 %v6526_v26, %v1268_v60  ;;  %v1069_v45 = vadd.f32 %v1005_v12, %v734_v16 }
 0x206   : > { %v1848_v3 = vmul.f32 %v7551_v49, %v837_v57  ;;  %v2830_v40 = vadd.f32 %v2770_v54, %v2522_v36  ;;  %v838_v34 = vsel %vm812_vm1, %v773_v41, %v805_v5  ;;  %v2154_v59 = vmul.f32 %v5184_v55, %v1172_v39 }
 0x207   : > { %v3136_v50 = vadd.f32 %v3076_v28, %v2828_v10  ;;  %v870_v37 = vsel %vm812_vm1, %v805_v5, %v773_v41  ;;  %v1006_v7 = vmul.f32 %v5186_v61, %v838_v34  ;;  %v1067_v25 = vadd.f32 %v1003_v51, %v732_v21 }
 0x208   : > { %v3138_v2 = vadd.f32 %v3078_v31, %v2830_v40  ;;  %v932_v58 = vsel %vm877_vm2, 0.0, %v870_v37  ;;  %v1140_v29 = vrot.slane %v6601_v27, 1  ;;  %v1906_v57 = vadd.f32 %v1846_v47, %v1598_v20 }
 0x209   : > { %v3256_v16 = vadd.f32 %v3136_v50, %v6580_v17  ;;  %v1004_v12 = vmul.f32 %v5186_v61, %v932_v58  ;;  %v1070_v36 = vadd.f32 %v1006_v7, %v735_v9  ;;  %v1847_v5 = vmul.f32 %v5191_v63, %v932_v58 }
 0x20a   : > { %v3258_v39 = vadd.f32 %v3138_v2, %v6577_v18  ;;  %v1173_v41 = vsel %vm1147_vm3, %v1108_v52, %v1140_v29  ;;  %v1205_v21 = vsel %vm1147_vm3, %v1140_v29, %v1108_v52  ;;  %v2156_v11 = vmul.f32 %v5184_v55, %v1268_v60 }
 0x20b   : > { %3316 = vst [vmem:[#allocation3 + $0x160] sm:$0xff] %v3256_v16  ;;  %v1068_v51 = vadd.f32 %v1004_v12, %v733_v15  ;;  %v1269_v17 = vsel %vm1213_vm4, 0.0, %v1205_v21  ;;  %v1339_v20 = vmul.f32 %v5188_v62, %v1173_v41  ;;  %v1404_v9 = vadd.f32 %v1340_v19, %v1069_v45  ;;  %v4836_v21 = vld [vmem:[#allocation2 + $0x1b0] sm:$0xff] }
 0x20c   : > { %v1908_v54 = vadd.f32 %v1848_v3, %v1600_v38  ;;  %3318 = vst [vmem:[#allocation3 + $0x170] sm:$0xff] %v3258_v39  ;;  %v1341_v18 = vmul.f32 %v5188_v62, %v1269_v17  ;;  %v1849_v47 = vmul.f32 %v5191_v63, %v838_v34  ;;  %v2523_v52 = vmul.f32 %v5216_v14, %v6601_v27 }
 0x20d   : > { %v1403_v10 = vadd.f32 %v1339_v20, %v1068_v51  ;;  %v2769_v60 = vmul.f32 %v5226_v24, %v932_v58  ;;  %v2771_v15 = vmul.f32 %v5226_v24, %v838_v34  ;;  %v1402_v28 = vadd.f32 %v1338_v22, %v1067_v25  ;;  %v3197_v25 = vld [vmem:[#allocation3 + $0x168] sm:$0xff] }
 0x20e   : > { %v1405_v31 = vadd.f32 %v1341_v18, %v1070_v36  ;;  %v1601_v40 = vmul.f32 %v5181_v53, %v6601_v27  ;;  %v1907_v19 = vadd.f32 %v1847_v5, %v1599_v30  ;;  %v3077_v3 = vmul.f32 %v6565_v43, %v1173_v41  ;;  %v3199_v27 = vld [vmem:[#allocation3 + $0x178] sm:$0xff]  ;;  %v6682_v36 = vld [vmem:[#allocation2 + $0x1a8] sm:$0xff] }
 0x20f   : > { %1467 = vst.msk [vmem:[#allocation3 + $0x188] sm:$0xff] %vm541_vm0, %v1403_v10  ;;  %v2829_v38 = vadd.f32 %v2769_v60, %v2521_v32  ;;  %v2831_v45 = vadd.f32 %v2771_v15, %v2523_v52  ;;  %v3079_v50 = vmul.f32 %v6565_v43, %v1269_v17  ;;  %v6667_v37 = vadd.f32 %v2154_v59, %v1906_v57  ;;  %v4835_v57 = vld [vmem:[#allocation2 + $0x1a0] sm:$0xff] }
 0x210   : > { %1469 = vst.msk [vmem:[#allocation3 + $0x198] sm:$0xff] %vm541_vm0, %v1405_v31  ;;  %v1909_v7 = vadd.f32 %v1849_v47, %v1601_v40  ;;  %v2155_v22 = vmul.f32 %v5214_v13, %v1173_v41  ;;  %v2157_v34 = vmul.f32 %v5214_v13, %v1269_v17  ;;  %v6672_v30 = vadd.f32 %v2156_v11, %v1908_v54  ;;  %v6699_v47 = vld [vmem:[#allocation2 + $0x1b8] sm:$0xff] }
 0x211   : > { %v6675_v32 = vadd.f32 %v6574_v4, %v1404_v9  ;;  %v3137_v2 = vadd.f32 %v3077_v3, %v2829_v38  ;;  %v3139_v58 = vadd.f32 %v3079_v50, %v2831_v45  ;;  %v6678_v29 = vadd.f32 %v6569_v56, %v1402_v28 }
 0x212   : > { %v6680_v59 = vadd.f32 %v2155_v22, %v1907_v19  ;;  %v774_v16 = vrot.slane %v4835_v57, 7  ;;  %v1109_v12 = vrot.slane %v4835_v57, 1  ;;  %v806_v5 = vrot.slane %v4836_v21, 7 }
 0x213   : > { %v3257_v39 = vadd.f32 %v3197_v25, %v3137_v2  ;;  %v3259_v41 = vadd.f32 %v3199_v27, %v3139_v58  ;;  %v1141_v11 = vrot.slane %v4836_v21, 1  ;;  %v6684_v51 = vadd.f32 %v2157_v34, %v1909_v7 }
 0x214   : > { %v736_v4 = vmul.f32 %v4835_v57, %v5160_v44  ;;  %v1602_v17 = vmul.f32 %v4835_v57, %v5165_v46  ;;  %v2524_v56 = vmul.f32 %v4835_v57, %v7547_v8  ;;  %v737_v20 = vmul.f32 %v7548_v0, %v6682_v36 }
 0x215   : > { %3317 = vst.msk [vmem:[#allocation3 + $0x168] sm:$0xff] %vm541_vm0, %v3257_v39  ;;  %3319 = vst.msk [vmem:[#allocation3 + $0x178] sm:$0xff] %vm541_vm0, %v3259_v41  ;;  %v839_v9 = vsel %vm812_vm1, %v774_v16, %v806_v5  ;;  %v871_v54 = vsel %vm812_vm1, %v806_v5, %v774_v16  ;;  %v1206_v18 = vsel %vm1147_vm3, %v1141_v11, %v1109_v12  ;;  %v775_v52 = vrot.slane %v6682_v36, 7 }
 0x216   : > { %v2272_v10 = vld [vmem:[#allocation3 + $0x188] sm:$0xff]  ;;  %v1110_v60 = vrot.slane %v6682_v36, 1  ;;  %v1603_v15 = vmul.f32 %v5181_v53, %v6682_v36  ;;  %v935_v28 = vsel %vm877_vm2, 0.0, %v871_v54  ;;  %v2525_v19 = vmul.f32 %v5216_v14, %v6682_v36 }
 0x217   : > { %v2274_v31 = vld [vmem:[#allocation3 + $0x198] sm:$0xff]  ;;  %v2332_v40 = vadd.f32 %v2272_v10, %v6582_v1  ;;  %v738_v38 = vmul.f32 %v4836_v21, %v5160_v44  ;;  %v1174_v45 = vsel %vm1147_vm3, %v1109_v12, %v1141_v11  ;;  %v1009_v50 = vmul.f32 %v7549_v33, %v839_v9 }
 0x218   : > { %v2334_v3 = vadd.f32 %v2274_v31, %v6586_v6  ;;  %v1272_v7 = vsel %vm1213_vm4, 0.0, %v1206_v18  ;;  %v807_v22 = vrot.slane %v6699_v47, 7  ;;  %v1007_v1 = vmul.f32 %v7549_v33, %v935_v28 }
 0x219   : > { %2392 = vst.msk [vmem:[#allocation3 + $0x188] sm:$0xff] %vm541_vm0, %v2332_v40  ;;  %v1604_v34 = vmul.f32 %v4836_v21, %v5165_v46  ;;  %v2526_v25 = vmul.f32 %v4836_v21, %v7547_v8  ;;  %v2772_v27 = vmul.f32 %v5224_v23, %v935_v28  ;;  %v1342_v6 = vmul.f32 %v7550_v48, %v1174_v45 }
 0x21a   : > { %2394 = vst.msk [vmem:[#allocation3 + $0x198] sm:$0xff] %vm541_vm0, %v2334_v3  ;;  %v1850_v2 = vmul.f32 %v7551_v49, %v935_v28  ;;  %v2774_v58 = vmul.f32 %v5224_v23, %v839_v9  ;;  %v739_v57 = vmul.f32 %v7548_v0, %v6699_v47  ;;  %v1344_v16 = vmul.f32 %v7550_v48, %v1272_v7 }
 0x21b   : > { %v2832_v12 = vadd.f32 %v2772_v27, %v2524_v56  ;;  %v3080_v36 = vmul.f32 %v6526_v26, %v1174_v45  ;;  %v3082_v39 = vmul.f32 %v6526_v26, %v1272_v7  ;;  %v1073_v41 = vadd.f32 %v1009_v50, %v738_v38 }
 0x21c   : > { %v1852_v21 = vmul.f32 %v7551_v49, %v839_v9  ;;  %v2834_v5 = vadd.f32 %v2774_v58, %v2526_v25  ;;  %v840_v11 = vsel %vm812_vm1, %v775_v52, %v807_v22  ;;  %v1071_v54 = vadd.f32 %v1007_v1, %v736_v4 }
 0x21d   : > { %v3140_v18 = vadd.f32 %v3080_v36, %v2832_v12  ;;  %v872_v10 = vsel %vm812_vm1, %v807_v22, %v775_v52  ;;  %v1010_v28 = vmul.f32 %v5186_v61, %v840_v11  ;;  %v1910_v31 = vadd.f32 %v1850_v2, %v1602_v17 }
 0x21e   : > { %v3142_v56 = vadd.f32 %v3082_v39, %v2834_v5  ;;  %v936_v40 = vsel %vm877_vm2, 0.0, %v872_v10  ;;  %v1142_v38 = vrot.slane %v6699_v47, 1  ;;  %v2160_v9 = vmul.f32 %v5184_v55, %v1272_v7 }
 0x21f   : > { %v6743_v3 = vadd.f32 %v3140_v18, %v6678_v29  ;;  %v1008_v4 = vmul.f32 %v5186_v61, %v936_v40  ;;  %v1074_v50 = vadd.f32 %v1010_v28, %v739_v57  ;;  %v1851_v22 = vmul.f32 %v5191_v63, %v936_v40 }
 0x220   : > { %v6747_v1 = vadd.f32 %v3142_v56, %v6675_v32  ;;  %v1175_v17 = vsel %vm1147_vm3, %v1110_v60, %v1142_v38  ;;  %v1207_v52 = vsel %vm1147_vm3, %v1142_v38, %v1110_v60  ;;  %v1408_v25 = vadd.f32 %v1344_v16, %v1073_v41 }
 0x221   : > { %3320 = vst [vmem:[#allocation3 + $0x180] sm:$0xff] %v6743_v3  ;;  %v1072_v7 = vadd.f32 %v1008_v4, %v737_v20  ;;  %v1273_v29 = vsel %vm1213_vm4, 0.0, %v1207_v52  ;;  %v1343_v27 = vmul.f32 %v5188_v62, %v1175_v17  ;;  %v1406_v2 = vadd.f32 %v1342_v6, %v1071_v54 }
 0x222   : > { %v1912_v32 = vadd.f32 %v1852_v21, %v1604_v34  ;;  %3322 = vst [vmem:[#allocation3 + $0x190] sm:$0xff] %v6747_v1  ;;  %v1345_v58 = vmul.f32 %v5188_v62, %v1273_v29  ;;  %v1853_v57 = vmul.f32 %v5191_v63, %v840_v11  ;;  %v2527_v16 = vmul.f32 %v5216_v14, %v6699_v47 }
 0x223   : > { %v1407_v60 = vadd.f32 %v1343_v27, %v1072_v7  ;;  %v2773_v12 = vmul.f32 %v5226_v24, %v936_v40  ;;  %v2775_v20 = vmul.f32 %v5226_v24, %v840_v11  ;;  %v2158_v36 = vmul.f32 %v5184_v55, %v1174_v45  ;;  %v3203_v45 = vld [vmem:[#allocation3 + $0x198] sm:$0xff] }
 0x224   : > { %v1409_v39 = vadd.f32 %v1345_v58, %v1074_v50  ;;  %v1605_v34 = vmul.f32 %v5181_v53, %v6699_v47  ;;  %v1911_v6 = vadd.f32 %v1851_v22, %v1603_v15  ;;  %v3081_v5 = vmul.f32 %v6565_v43, %v1175_v17  ;;  %v3201_v15 = vld [vmem:[#allocation3 + $0x188] sm:$0xff]  ;;  %v4838_v22 = vld [vmem:[#allocation2 + $0x1d0] sm:$0xff] }
 0x225   : > { %1471 = vst.msk [vmem:[#allocation3 + $0x1a8] sm:$0xff] %vm541_vm0, %v1407_v60  ;;  %v2833_v41 = vadd.f32 %v2773_v12, %v2525_v19  ;;  %v2835_v21 = vadd.f32 %v2775_v20, %v2527_v16  ;;  %v3083_v54 = vmul.f32 %v6565_v43, %v1273_v29  ;;  %v6771_v18 = vadd.f32 %v2158_v36, %v1910_v31  ;;  %v6785_v31 = vld [vmem:[#allocation2 + $0x1c8] sm:$0xff]  ;;  %v6806_v16 = vld [vmem:[#allocation2 + $0x1d8] sm:$0xff] }
 0x226   : > { %v6773_v10 = vadd.f32 %v2160_v9, %v1912_v32  ;;  %v6776_v11 = vadd.f32 %v6672_v30, %v1408_v25  ;;  %1473 = vst.msk [vmem:[#allocation3 + $0x1b8] sm:$0xff] %vm541_vm0, %v1409_v39  ;;  %v2159_v47 = vmul.f32 %v5214_v13, %v1175_v17  ;;  %v6781_v19 = vadd.f32 %v6667_v37, %v1406_v2  ;;  %v4837_v9 = vld [vmem:[#allocation2 + $0x1c0] sm:$0xff] }
 0x227   : > { %v6783_v28 = vadd.f32 %v1853_v57, %v1605_v34  ;;  %v3141_v56 = vadd.f32 %v3081_v5, %v2833_v41  ;;  %v3143_v40 = vadd.f32 %v3083_v54, %v2835_v21  ;;  %v6788_v38 = vmul.f32 %v5214_v13, %v1273_v29 }
 0x228   : > { %v6790_v30 = vadd.f32 %v2159_v47, %v1911_v6  ;;  %v776_v4 = vrot.slane %v4837_v9, 7  ;;  %v1111_v50 = vrot.slane %v4837_v9, 1  ;;  %v808_v25 = vrot.slane %v4838_v22, 7 }
 0x229   : > { %v3261_v17 = vadd.f32 %v3201_v15, %v3141_v56  ;;  %v3263_v52 = vadd.f32 %v3203_v45, %v3143_v40  ;;  %v1143_v37 = vrot.slane %v4838_v22, 1  ;;  %v740_v7 = vmul.f32 %v4837_v9, %v5160_v44 }
 0x22a   : > { %v1606_v27 = vmul.f32 %v4837_v9, %v5165_v46  ;;  %v2528_v2 = vmul.f32 %v4837_v9, %v7547_v8  ;;  %v741_v29 = vmul.f32 %v7548_v0, %v6785_v31  ;;  %v777_v32 = vrot.slane %v6785_v31, 7 }
 0x22b   : > { %3321 = vst.msk [vmem:[#allocation3 + $0x188] sm:$0xff] %vm541_vm0, %v3261_v17  ;;  %3323 = vst.msk [vmem:[#allocation3 + $0x198] sm:$0xff] %vm541_vm0, %v3263_v52  ;;  %v841_v58 = vsel %vm812_vm1, %v776_v4, %v808_v25  ;;  %v873_v57 = vsel %vm812_vm1, %v808_v25, %v776_v4  ;;  %v1208_v60 = vsel %vm1147_vm3, %v1143_v37, %v1111_v50  ;;  %v1112_v20 = vrot.slane %v6785_v31, 1 }
 0x22c   : > { %v2276_v12 = vld [vmem:[#allocation3 + $0x1a8] sm:$0xff]  ;;  %v939_v36 = vsel %vm877_vm2, 0.0, %v873_v57  ;;  %v1013_v39 = vmul.f32 %v7549_v33, %v841_v58  ;;  %v1176_v34 = vsel %vm1147_vm3, %v1111_v50, %v1143_v37  ;;  %v742_v21 = vmul.f32 %v4838_v22, %v5160_v44 }
 0x22d   : > { %v2278_v6 = vld [vmem:[#allocation3 + $0x1b8] sm:$0xff]  ;;  %v2336_v41 = vadd.f32 %v2276_v12, %v6680_v59  ;;  %v1011_v5 = vmul.f32 %v7549_v33, %v939_v36  ;;  %v1276_v54 = vsel %vm1213_vm4, 0.0, %v1208_v60  ;;  %v1608_v15 = vmul.f32 %v4838_v22, %v5165_v46 }
 0x22e   : > { %v2338_v47 = vadd.f32 %v2278_v6, %v6684_v51  ;;  %v1854_v45 = vmul.f32 %v7551_v49, %v939_v36  ;;  %v809_v56 = vrot.slane %v6806_v16, 7  ;;  %v1346_v40 = vmul.f32 %v7550_v48, %v1176_v34 }
 0x22f   : > { %2396 = vst.msk [vmem:[#allocation3 + $0x1a8] sm:$0xff] %vm541_vm0, %v2336_v41  ;;  %v2530_v59 = vmul.f32 %v4838_v22, %v7547_v8  ;;  %v2776_v9 = vmul.f32 %v5224_v23, %v939_v36  ;;  %v743_v4 = vmul.f32 %v7548_v0, %v6806_v16  ;;  %v1077_v51 = vadd.f32 %v1013_v39, %v742_v21 }
 0x230   : > { %2398 = vst.msk [vmem:[#allocation3 + $0x1b8] sm:$0xff] %vm541_vm0, %v2338_v47  ;;  %v1348_v46 = vmul.f32 %v7550_v48, %v1276_v54  ;;  %v1856_v50 = vmul.f32 %v7551_v49, %v841_v58  ;;  %v2778_v17 = vmul.f32 %v5224_v23, %v841_v58  ;;  %v1075_v52 = vadd.f32 %v1011_v5, %v740_v7 }
 0x231   : > { %v2836_v25 = vadd.f32 %v2776_v9, %v2528_v2  ;;  %v3084_v37 = vmul.f32 %v6526_v26, %v1176_v34  ;;  %v3086_v22 = vmul.f32 %v6526_v26, %v1276_v54  ;;  %v1914_v57 = vadd.f32 %v1854_v45, %v1606_v27 }
 0x232   : > { %v2162_v60 = vmul.f32 %v5184_v55, %v1176_v34  ;;  %v2838_v12 = vadd.f32 %v2778_v17, %v2530_v59  ;;  %v6838_v36 = vsel %vm812_vm1, %v777_v32, %v809_v56  ;;  %v2164_v39 = vmul.f32 %v5184_v55, %v1276_v54 }
 0x233   : > { %v3144_v6 = vadd.f32 %v3084_v37, %v2836_v25  ;;  %v874_v49 = vsel %vm812_vm1, %v809_v56, %v777_v32  ;;  %v1014_v7 = vmul.f32 %v5186_v61, %v6838_v36  ;;  %v1916_v2 = vadd.f32 %v1856_v50, %v1608_v15 }
 0x234   : > { %v3146_v58 = vadd.f32 %v3086_v22, %v2838_v12  ;;  %v6847_v27 = vsel %vm877_vm2, 0.0, %v874_v49  ;;  %v1144_v34 = vrot.slane %v6806_v16, 1  ;;  %v1410_v41 = vadd.f32 %v1346_v40, %v1075_v52 }
 0x235   : > { %v1412_v21 = vadd.f32 %v1348_v46, %v1077_v51  ;;  %v6851_v5 = vadd.f32 %v3144_v6, %v6781_v19  ;;  %v1012_v55 = vmul.f32 %v5186_v61, %v6847_v27  ;;  %v1078_v54 = vadd.f32 %v1014_v7, %v743_v4  ;;  %v6888_v51 = vld [vmem:[#allocation2 + $0x1e8] sm:$0xff]  ;;  %v675_v7 = vld [vmem:[#allocation2 + $0x1f8] sm:$0xff] }
 0x236   : > { %v6856_v32 = vadd.f32 %v3146_v58, %v6776_v11  ;;  %v6860_v47 = vsel %vm1147_vm3, %v1112_v20, %v1144_v34  ;;  %v1209_v15 = vsel %vm1147_vm3, %v1144_v34, %v1112_v20  ;;  %v6866_v45 = vadd.f32 %v6788_v38, %v6783_v28 }
 0x237   : > { %v1076_v19 = vadd.f32 %v1012_v55, %v741_v29  ;;  %v6870_v56 = vsel %vm1213_vm4, 0.0, %v1209_v15  ;;  %v1347_v11 = vmul.f32 %v5188_v62, %v6860_v47  ;;  %v2529_v40 = vmul.f32 %v5216_v14, %v6785_v31  ;;  %v3207_v12 = vld [vmem:[#allocation3 + $0x1b8] sm:$0xff]  ;;  %v4840_v55 = vld [vmem:[#allocation2 + $0x1f0] sm:$0xff] }
 0x238   : > { %v6876_v59 = vadd.f32 %v2162_v60, %v1914_v57  ;;  %v6878_v9 = vadd.f32 %v2164_v39, %v1916_v2  ;;  %v1349_v20 = vmul.f32 %v5188_v62, %v6870_v56  ;;  %v2531_v38 = vmul.f32 %v5216_v14, %v6806_v16  ;;  %v4839_v57 = vld [vmem:[#allocation2 + $0x1e0] sm:$0xff] }
 0x239   : > { %v1411_v28 = vadd.f32 %v1347_v11, %v1076_v19  ;;  %v2777_v29 = vmul.f32 %v5226_v24, %v6847_v27  ;;  %v2779_v4 = vmul.f32 %v5226_v24, %v6838_v36  ;;  %v6891_v46 = vadd.f32 %v6771_v18, %v1410_v41  ;;  %v3205_v18 = vld [vmem:[#allocation3 + $0x1a8] sm:$0xff] }
 0x23a   : > { %v6894_v50 = vadd.f32 %v6773_v10, %v1412_v21  ;;  %v1413_v17 = vadd.f32 %v1349_v20, %v1078_v54  ;;  %v3085_v52 = vmul.f32 %v6565_v43, %v6860_v47  ;;  %v3087_v22 = vmul.f32 %v6565_v43, %v6870_v56 }
 0x23b   : > { %1475 = vst.msk [vmem:[#allocation3 + $0x1c8] sm:$0xff] %vm541_vm0, %v1411_v28  ;;  %v2837_v25 = vadd.f32 %v2777_v29, %v2529_v40  ;;  %v2839_v37 = vadd.f32 %v2779_v4, %v2531_v38  ;;  %v744_v60 = vmul.f32 %v4839_v57, %v5160_v44  ;;  %v778_v10 = vrot.slane %v4839_v57, 7 }
 0x23c   : > { %1477 = vst.msk [vmem:[#allocation3 + $0x1d8] sm:$0xff] %vm541_vm0, %v1413_v17  ;;  %v1113_v39 = vrot.slane %v4839_v57, 1  ;;  %v2532_v6 = vmul.f32 %v4839_v57, %v7547_v8  ;;  %v745_v49 = vmul.f32 %v7548_v0, %v6888_v51  ;;  %v779_v34 = vrot.slane %v6888_v51, 7 }
 0x23d   : > { %v3145_v2 = vadd.f32 %v3085_v52, %v2837_v25  ;;  %v3147_v58 = vadd.f32 %v3087_v22, %v2839_v37  ;;  %v1114_v41 = vrot.slane %v6888_v51, 1  ;;  %v2533_v21 = vmul.f32 %v5216_v14, %v6888_v51 }
 0x23e   : > { %v746_v54 = vmul.f32 %v4840_v55, %v5160_v44  ;;  %v810_v15 = vrot.slane %v4840_v55, 7  ;;  %v1145_v19 = vrot.slane %v4840_v55, 1  ;;  %v2534_v20 = vmul.f32 %v4840_v55, %v7547_v8 }
 0x23f   : > { %v3265_v11 = vadd.f32 %v3205_v18, %v3145_v2  ;;  %v3267_v40 = vadd.f32 %v3207_v12, %v3147_v58  ;;  %v747_v28 = vmul.f32 %v7548_v0, %v675_v7 }
 0x240   : > { %v843_v38 = vsel %vm812_vm1, %v778_v10, %v810_v15  ;;  %v875_v29 = vsel %vm812_vm1, %v810_v15, %v778_v10  ;;  %v1178_v4 = vsel %vm1147_vm3, %v1113_v39, %v1145_v19  ;;  %v1210_v44 = vsel %vm1147_vm3, %v1145_v19, %v1113_v39 }
 0x241   : > { %3325 = vst.msk [vmem:[#allocation3 + $0x1a8] sm:$0xff] %vm541_vm0, %v3265_v11  ;;  %3327 = vst.msk [vmem:[#allocation3 + $0x1b8] sm:$0xff] %vm541_vm0, %v3267_v40  ;;  %v943_v8 = vsel %vm877_vm2, 0.0, %v875_v29  ;;  %v1017_v0 = vmul.f32 %v7549_v33, %v843_v38  ;;  %v1280_v51 = vsel %vm1213_vm4, 0.0, %v1210_v44  ;;  %v1350_v17 = vmul.f32 %v7550_v48, %v1178_v4 }
 0x242   : > { %v2280_v52 = vld [vmem:[#allocation3 + $0x1c8] sm:$0xff]  ;;  %v1015_v25 = vmul.f32 %v7549_v33, %v943_v8  ;;  %v1352_v37 = vmul.f32 %v7550_v48, %v1280_v51  ;;  %v2780_v22 = vmul.f32 %v5224_v23, %v943_v8  ;;  %v2782_v57 = vmul.f32 %v5224_v23, %v843_v38 }
 0x243   : > { %v2282_v18 = vld [vmem:[#allocation3 + $0x1d8] sm:$0xff]  ;;  %v2340_v12 = vadd.f32 %v2280_v52, %v6790_v30  ;;  %v1081_v10 = vadd.f32 %v1017_v0, %v746_v54  ;;  %v3088_v39 = vmul.f32 %v6526_v26, %v1178_v4  ;;  %v3090_v2 = vmul.f32 %v6526_v26, %v1280_v51 }
 0x244   : > { %v2342_v58 = vadd.f32 %v2282_v18, %v6866_v45  ;;  %v2840_v55 = vadd.f32 %v2780_v22, %v2532_v6  ;;  %v2842_v15 = vadd.f32 %v2782_v57, %v2534_v20  ;;  %v811_v19 = vrot.slane %v675_v7, 7  ;;  %v6974_v22 = vld [vmem:[#allocation3] sm:$0xff] }
 0x245   : > { %2400 = vst.msk [vmem:[#allocation3 + $0x1c8] sm:$0xff] %vm541_vm0, %v2340_v12  ;;  %v1416_v33 = vadd.f32 %v1352_v37, %v1081_v10  ;;  %v1146_v48 = vrot.slane %v675_v7, 1  ;;  %v2535_v11 = vmul.f32 %v5216_v14, %v675_v7  ;;  %v1079_v23 = vadd.f32 %v1015_v25, %v744_v60 }
 0x246   : > { %2402 = vst.msk [vmem:[#allocation3 + $0x1d8] sm:$0xff] %vm541_vm0, %v2342_v58  ;;  %v3148_v30 = vadd.f32 %v3088_v39, %v2840_v55  ;;  %v3150_v54 = vadd.f32 %v3090_v2, %v2842_v15  ;;  %v844_v40 = vsel %vm812_vm1, %v779_v34, %v811_v19  ;;  %v876_v26 = vsel %vm812_vm1, %v811_v19, %v779_v34  ;;  %v6990_v39 = vld [vmem:[#allocation3 + $0x30] sm:$0xff]  ;;  %v6992_v2 = vld [vmem:[#allocation3 + $0x40] sm:$0xff] }
 0x247   : > { %v944_v45 = vsel %vm877_vm2, 0.0, %v876_v26  ;;  %v1018_v6 = vmul.f32 %v5186_v61, %v844_v40  ;;  %v1179_v20 = vsel %vm1147_vm3, %v1114_v41, %v1146_v48  ;;  %v1211_v14 = vsel %vm1147_vm3, %v1146_v48, %v1114_v41  ;;  %v6999_v48 = vld [vmem:[#allocation3 + $0x50] sm:$0xff] }
 0x248   : > { %v6952_v60 = vadd.f32 %v3148_v30, %v6891_v46  ;;  %v6955_v7 = vadd.f32 %v3150_v54, %v6894_v50  ;;  %v1016_v38 = vmul.f32 %v5186_v61, %v944_v45  ;;  %v1281_v34 = vsel %vm1213_vm4, 0.0, %v1211_v14 }
 0x249   : > { %v1082_v29 = vadd.f32 %v1018_v6, %v747_v28  ;;  %v1351_v4 = vmul.f32 %v5188_v62, %v1179_v20  ;;  %v1353_v44 = vmul.f32 %v5188_v62, %v1281_v34  ;;  %v2781_v8 = vmul.f32 %v5226_v24, %v944_v45 }
 0x24a   : > { %v1080_v35 = vadd.f32 %v1016_v38, %v745_v49  ;;  %v2783_v41 = vmul.f32 %v5226_v24, %v844_v40  ;;  %v3089_v46 = vmul.f32 %v6565_v43, %v1179_v20  ;;  %v3091_v50 = vmul.f32 %v6565_v43, %v1281_v34 }
 0x24b   : > { %v1417_v0 = vadd.f32 %v1353_v44, %v1082_v29  ;;  %v2841_v51 = vadd.f32 %v2781_v8, %v2533_v21  ;;  %v1414_v61 = vadd.f32 %v1350_v17, %v1079_v23  ;;  %v6967_v42 = vadd.f32 %v6878_v9, %v1416_v33  ;;  %v6976_v21 = vld [vmem:[#allocation3 + $0x10] sm:$0xff]  ;;  %v6979_v17 = vld [vmem:[#allocation3 + $0x20] sm:$0xff] }
 0x24c   : > { %v1415_v28 = vadd.f32 %v1351_v4, %v1080_v35  ;;  %v2843_v52 = vadd.f32 %v2783_v41, %v2535_v11  ;;  %v3209_v25 = vld [vmem:[#allocation3 + $0x1c8] sm:$0xff]  ;;  %v3397_v57 = vmul.f32 %v6974_v22, %v6974_v22  ;;  %v3399_v18 = vmul.f32 %v6979_v17, %v6979_v17  ;;  %v7001_v11 = vld [vmem:[#allocation3 + $0x60] sm:$0xff]  ;;  %v7014_v4 = vld [vmem:[#allocation3 + $0x70] sm:$0xff] }
 0x24d   : > { %1481 = vst.msk [vmem:[#allocation3 + $0x1f8] sm:$0xff] %vm541_vm0, %v1417_v0  ;;  %v3149_v62 = vadd.f32 %v3089_v46, %v2841_v51  ;;  %v3211_v37 = vld [vmem:[#allocation3 + $0x1d8] sm:$0xff]  ;;  %v6971_v49 = vadd.f32 %v6876_v59, %v1414_v61  ;;  %v3398_v59 = vmul.f32 %v6976_v21, %v6976_v21  ;;  %v3400_v15 = vmul.f32 %v6990_v39, %v6990_v39  ;;  %v7016_v44 = vld [vmem:[#allocation3 + $0x80] sm:$0xff] }
 0x24e   : > { %1479 = vst.msk [vmem:[#allocation3 + $0x1e8] sm:$0xff] %vm541_vm0, %v1415_v28  ;;  %v3151_v24 = vadd.f32 %v3091_v50, %v2843_v52  ;;  %v3429_v12 = vsel %vm541_vm0, %v3397_v57, 0.0  ;;  %v3432_v58 = vsel %vm541_vm0, %v3399_v18, 0.0  ;;  %v3401_v19 = vmul.f32 %v6992_v2, %v6992_v2 }
 0x24f   : > { %v3269_v43 = vadd.f32 %v3209_v25, %v3149_v62  ;;  %v3430_v10 = vsel %vm541_vm0, %v3398_v59, 0.0  ;;  %v3434_v23 = vsel %vm541_vm0, %v3400_v15, 0.0  ;;  %v3502_v40 = vsel %vm3501_vm5, %v3397_v57, 0.0 }
 0x250   : > { %v3271_v9 = vadd.f32 %v3211_v37, %v3151_v24  ;;  %v3431_v55 = vadd.f32 %v3430_v10, %v3429_v12  ;;  %v3436_v30 = vsel %vm541_vm0, %v3401_v19, 0.0  ;;  %v3503_v26 = vsel %vm3501_vm5, %v3398_v59, 0.0 }
 0x251   : > { %3329 = vst.msk [vmem:[#allocation3 + $0x1c8] sm:$0xff] %vm541_vm0, %v3269_v43  ;;  %v3505_v45 = vsel %vm3501_vm5, %v3399_v18, 0.0  ;;  %v3402_v6 = vmul.f32 %v6999_v48, %v6999_v48  ;;  %v3403_v20 = vmul.f32 %v7001_v11, %v7001_v11  ;;  %v3504_v14 = vadd.f32 %v3503_v26, %v3502_v40 }
 0x252   : > { %3331 = vst.msk [vmem:[#allocation3 + $0x1d8] sm:$0xff] %vm541_vm0, %v3271_v9  ;;  %v3433_v33 = vadd.f32 %v3432_v58, %v3431_v55  ;;  %v1855_v29 = vmul.f32 %v5191_v63, %v6847_v27  ;;  %v3507_v8 = vsel %vm3501_vm5, %v3400_v15, 0.0  ;;  %v3509_v35 = vsel %vm3501_vm5, %v3401_v19, 0.0 }
 0x253   : > { %v3506_v34 = vadd.f32 %v3505_v45, %v3504_v14  ;;  %v1857_v41 = vmul.f32 %v5191_v63, %v6838_v36  ;;  %v3438_v46 = vsel %vm541_vm0, %v3402_v6, 0.0  ;;  %v3440_v50 = vsel %vm541_vm0, %v3403_v20, 0.0  ;;  %v7032_v63 = vld [vmem:[#allocation3 + $0x90] sm:$0xff] }
 0x254   : > { %v3435_v54 = vadd.f32 %v3434_v23, %v3433_v33  ;;  %v1607_v51 = vmul.f32 %v5181_v53, %v6785_v31  ;;  %v1609_v61 = vmul.f32 %v5181_v53, %v6806_v16  ;;  %v3404_v28 = vmul.f32 %v7014_v4, %v7014_v4  ;;  %v7038_v53 = vld [vmem:[#allocation3 + $0xa0] sm:$0xff]  ;;  %v2286_v19 = vld [vmem:[#allocation3 + $0x1f8] sm:$0xff] }
 0x255   : > { %v3508_v0 = vadd.f32 %v3507_v8, %v3506_v34  ;;  %v3405_v52 = vmul.f32 %v7016_v44, %v7016_v44  ;;  %v3511_v62 = vsel %vm3501_vm5, %v3402_v6, 0.0  ;;  %v3513_v37 = vsel %vm3501_vm5, %v3403_v20, 0.0  ;;  %v2284_v15 = vld [vmem:[#allocation3 + $0x1e8] sm:$0xff]  ;;  %v7052_v23 = vld [vmem:[#allocation3 + $0xc0] sm:$0xff]  ;;  %v7054_v6 = vld [vmem:[#allocation3 + $0xd0] sm:$0xff] }
 0x256   : > { %v3437_v38 = vadd.f32 %v3436_v30, %v3435_v54  ;;  %v1915_v24 = vadd.f32 %v1855_v29, %v1607_v51  ;;  %v1917_v31 = vadd.f32 %v1857_v41, %v1609_v61  ;;  %v2165_v43 = vmul.f32 %v5214_v13, %v6870_v56  ;;  %v7062_v29 = vld [vmem:[#allocation3 + $0xe0] sm:$0xff]  ;;  %v7070_v51 = vld [vmem:[#allocation3 + $0xf0] sm:$0xff] }
 0x257   : > { %v3510_v25 = vadd.f32 %v3509_v35, %v3508_v0  ;;  %v2163_v9 = vmul.f32 %v5214_v13, %v6860_v47  ;;  %v3406_v57 = vmul.f32 %v7032_v63, %v7032_v63  ;;  %v3442_v59 = vsel %vm541_vm0, %v3404_v28, 0.0  ;;  %v7050_v47 = vld [vmem:[#allocation3 + $0xb0] sm:$0xff] }
 0x258   : > { %v3439_v27 = vadd.f32 %v3438_v46, %v3437_v38  ;;  %v3444_v18 = vsel %vm541_vm0, %v3405_v52, 0.0  ;;  %v3407_v10 = vmul.f32 %v7038_v53, %v7038_v53  ;;  %v3515_v56 = vsel %vm3501_vm5, %v3404_v28, 0.0 }
 0x259   : > { %v3512_v16 = vadd.f32 %v3511_v62, %v3510_v25  ;;  %v3517_v55 = vsel %vm3501_vm5, %v3405_v52, 0.0  ;;  %v2223_v33 = vadd.f32 %v2163_v9, %v1915_v24  ;;  %v2225_v13 = vadd.f32 %v2165_v43, %v1917_v31  ;;  %v7076_v25 = vld [vmem:[#allocation3 + $0x100] sm:$0xff] }
 0x25a   : > { %v3441_v36 = vadd.f32 %v3440_v50, %v3439_v27  ;;  %v3408_v20 = vmul.f32 %v7050_v47, %v7050_v47  ;;  %v3409_v14 = vmul.f32 %v7052_v23, %v7052_v23  ;;  %v3519_v38 = vsel %vm3501_vm5, %v3406_v57, 0.0 }
 0x25b   : > { %v3514_v12 = vadd.f32 %v3513_v37, %v3512_v16  ;;  %v2344_v26 = vadd.f32 %v2284_v15, %v2223_v33  ;;  %v2346_v45 = vadd.f32 %v2286_v19, %v2225_v13  ;;  %v3521_v34 = vsel %vm3501_vm5, %v3407_v10, 0.0  ;;  %v7098_v13 = vld [vmem:[#allocation3 + $0x140] sm:$0xff] }
 0x25c   : > { %v3443_v58 = vadd.f32 %v3442_v59, %v3441_v36  ;;  %v3446_v8 = vsel %vm541_vm0, %v3406_v57, 0.0  ;;  %v3448_v35 = vsel %vm541_vm0, %v3407_v10, 0.0  ;;  %v3410_v50 = vmul.f32 %v7054_v6, %v7054_v6  ;;  %v7086_v59 = vld [vmem:[#allocation3 + $0x110] sm:$0xff] }
 0x25d   : > { %v3516_v30 = vadd.f32 %v3515_v56, %v3514_v12  ;;  %2404 = vst.msk [vmem:[#allocation3 + $0x1e8] sm:$0xff] %vm541_vm0, %v2344_v26  ;;  %2406 = vst.msk [vmem:[#allocation3 + $0x1f8] sm:$0xff] %vm541_vm0, %v2346_v45  ;;  %v3411_v27 = vmul.f32 %v7062_v29, %v7062_v29  ;;  %v3523_v28 = vsel %vm3501_vm5, %v3408_v20, 0.0  ;;  %v3525_v52 = vsel %vm3501_vm5, %v3409_v14, 0.0  ;;  %v7090_v56 = vld [vmem:[#allocation3 + $0x130] sm:$0xff] }
 0x25e   : > { %v3445_v54 = vadd.f32 %v3444_v18, %v3443_v58  ;;  %v3412_v62 = vmul.f32 %v7070_v51, %v7070_v51  ;;  %v3450_v37 = vsel %vm541_vm0, %v3408_v20, 0.0  ;;  %v3452_v24 = vsel %vm541_vm0, %v3409_v14, 0.0  ;;  %v7088_v18 = vld [vmem:[#allocation3 + $0x120] sm:$0xff]  ;;  %v7104_v14 = vld [vmem:[#allocation3 + $0x150] sm:$0xff] }
 0x25f   : > { %v3518_v40 = vadd.f32 %v3517_v55, %v3516_v30  ;;  %v3413_v43 = vmul.f32 %v7076_v25, %v7076_v25  ;;  %v3527_v9 = vsel %vm3501_vm5, %v3410_v50, 0.0  ;;  %v3529_v57 = vsel %vm3501_vm5, %v3411_v27, 0.0 }
 0x260   : > { %v3447_v46 = vadd.f32 %v3446_v8, %v3445_v54  ;;  %v3414_v55 = vmul.f32 %v7086_v59, %v7086_v59  ;;  %v3415_v15 = vmul.f32 %v7088_v18, %v7088_v18  ;;  %v3531_v19 = vsel %vm3501_vm5, %v3412_v62, 0.0 }
 0x261   : > { %v3520_v41 = vadd.f32 %v3519_v38, %v3518_v40  ;;  %v3533_v33 = vsel %vm3501_vm5, %v3413_v43, 0.0  ;;  %v3454_v30 = vsel %vm541_vm0, %v3410_v50, 0.0  ;;  %v3456_v54 = vsel %vm541_vm0, %v3411_v27, 0.0 }
 0x262   : > { %v3449_v61 = vadd.f32 %v3448_v35, %v3447_v46  ;;  %v3416_v45 = vmul.f32 %v7090_v56, %v7090_v56  ;;  %v3417_v38 = vmul.f32 %v7098_v13, %v7098_v13  ;;  %v3535_v8 = vsel %vm3501_vm5, %v3414_v55, 0.0 }
 0x263   : > { %v3522_v0 = vadd.f32 %v3521_v34, %v3520_v41  ;;  %v3537_v35 = vsel %vm3501_vm5, %v3415_v15, 0.0  ;;  %v7110_v41 = vld [vmem:[#allocation3 + $0x160] sm:$0xff]  ;;  %v3418_v50 = vmul.f32 %v7104_v14, %v7104_v14  ;;  %v3460_v27 = vsel %vm541_vm0, %v3413_v43, 0.0 }
 0x264   : > { %v3451_v16 = vadd.f32 %v3450_v37, %v3449_v61  ;;  %v3541_v37 = vsel %vm3501_vm5, %v3417_v38, 0.0 }
 0x265   : > { %v3524_v36 = vadd.f32 %v3523_v28, %v3522_v0  ;;  %v3458_v0 = vsel %vm541_vm0, %v3412_v62, 0.0  ;;  %v3419_v28 = vmul.f32 %v7110_v41, %v7110_v41  ;;  %v3543_v62 = vsel %vm3501_vm5, %v3418_v50, 0.0 }
 0x266   : > { %v3453_v10 = vadd.f32 %v3452_v24, %v3451_v16  ;;  %v7120_v24 = vld [vmem:[#allocation3 + $0x170] sm:$0xff] }
 0x267   : > { %v3526_v31 = vadd.f32 %v3525_v52, %v3524_v36  ;;  %v3539_v36 = vsel %vm3501_vm5, %v3416_v45, 0.0  ;;  %v3545_v43 = vsel %vm3501_vm5, %v3419_v28, 0.0 }
 0x268   : > { %v3455_v26 = vadd.f32 %v3454_v30, %v3453_v10  ;;  %v3464_v10 = vsel %vm541_vm0, %v3415_v15, 0.0  ;;  %v3424_v15 = vmul.f32 %v6856_v32, %v6856_v32 }
 0x269   : > { %v3528_v12 = vadd.f32 %v3527_v9, %v3526_v31 }
 0x26a   : > { %v3457_v34 = vadd.f32 %v3456_v54, %v3455_v26  ;;  %v3422_v54 = vmul.f32 %v6747_v1, %v6747_v1 }
 0x26b   : > { %v3530_v58 = vadd.f32 %v3529_v57, %v3528_v12  ;;  %v3420_v57 = vmul.f32 %v7120_v24, %v7120_v24  ;;  %v3462_v12 = vsel %vm541_vm0, %v3414_v55, 0.0 }
 0x26c   : > { %v3459_v52 = vadd.f32 %v3458_v0, %v3457_v34  ;;  %v3425_v0 = vmul.f32 %v6952_v60, %v6952_v60 }
 0x26d   : > { %v3532_v40 = vadd.f32 %v3531_v19, %v3530_v58  ;;  %v3421_v19 = vmul.f32 %v6743_v3, %v6743_v3 }
 0x26e   : > { %v3461_v16 = vadd.f32 %v3460_v27, %v3459_v52 }
 0x26f   : > { %v3534_v20 = vadd.f32 %v3533_v33, %v3532_v40  ;;  %v3423_v40 = vmul.f32 %v6851_v5, %v6851_v5  ;;  %v3549_v55 = vsel %vm3501_vm5, %v3421_v19, 0.0 }
 0x270   : > { %v3463_v33 = vadd.f32 %v3462_v12, %v3461_v16  ;;  %v3426_v16 = vmul.f32 %v6955_v7, %v6955_v7  ;;  %v3427_v12 = vmul.f32 %v6971_v49, %v6971_v49 }
 0x271   : > { %v3536_v46 = vadd.f32 %v3535_v8, %v3534_v20  ;;  %v3547_v20 = vsel %vm3501_vm5, %v3420_v57, 0.0  ;;  %v3466_v8 = vsel %vm541_vm0, %v3416_v45, 0.0  ;;  %v3553_v52 = vsel %vm3501_vm5, %v3423_v40, 0.0 }
 0x272   : > { %v3465_v26 = vadd.f32 %v3464_v10, %v3463_v33  ;;  %v3557_v45 = vsel %vm3501_vm5, %v3425_v0, 0.0  ;;  %v3428_v33 = vmul.f32 %v6967_v42, %v6967_v42 }
 0x273   : > { %v3538_v61 = vadd.f32 %v3537_v35, %v3536_v46  ;;  %v3468_v35 = vsel %vm541_vm0, %v3417_v38, 0.0  ;;  %v3470_v38 = vsel %vm541_vm0, %v3418_v50, 0.0 }
 0x274   : > { %v3467_v27 = vadd.f32 %v3466_v8, %v3465_v26  ;;  %v3559_v26 = vsel %vm3501_vm5, %v3426_v16, 0.0 }
 0x275   : > { %v3540_v31 = vadd.f32 %v3539_v36, %v3538_v61  ;;  %v3551_v61 = vsel %vm3501_vm5, %v3422_v54, 0.0 }
 0x277   : > { %v3542_v9 = vadd.f32 %v3541_v37, %v3540_v31  ;;  %v3469_v37 = vadd.f32 %v3468_v35, %v3467_v27 }
 0x279   : > { %v3544_v58 = vadd.f32 %v3543_v62, %v3542_v9  ;;  %v3555_v9 = vsel %vm3501_vm5, %v3424_v15, 0.0  ;;  %v3472_v62 = vsel %vm541_vm0, %v3419_v28, 0.0  ;;  %v3471_v10 = vadd.f32 %v3470_v38, %v3469_v37 }
 0x27a   : > { %v3563_v28 = vsel %vm3501_vm5, %v3428_v33, 0.0 }
 0x27b   : > { %v3546_v30 = vadd.f32 %v3545_v43, %v3544_v58 }
 0x27d   : > { %v3548_v34 = vadd.f32 %v3547_v20, %v3546_v30  ;;  %v3473_v30 = vadd.f32 %v3472_v62, %v3471_v10  ;;  %v3484_v10 = vsel %vm541_vm0, %v3425_v0, 0.0 }
 0x27f   : > { %v3550_v46 = vadd.f32 %v3549_v55, %v3548_v34  ;;  %v3561_v34 = vsel %vm3501_vm5, %v3427_v12, 0.0  ;;  %v3474_v55 = vsel %vm541_vm0, %v3420_v57, 0.0 }
 0x280   : > { %v3475_v8 = vadd.f32 %v3474_v55, %v3473_v30 }
 0x281   : > { %v3552_v36 = vadd.f32 %v3551_v61, %v3550_v46  ;;  %v3476_v46 = vsel %vm541_vm0, %v3421_v19, 0.0 }
 0x282   : > { %v3477_v61 = vadd.f32 %v3476_v46, %v3475_v8 }
 0x283   : > { %v3554_v31 = vadd.f32 %v3553_v52, %v3552_v36  ;;  %v3478_v36 = vsel %vm541_vm0, %v3422_v54, 0.0  ;;  %v3488_v54 = vsel %vm541_vm0, %v3427_v12, 0.0 }
 0x285   : > { %v3556_v43 = vadd.f32 %v3555_v9, %v3554_v31  ;;  %v3479_v31 = vadd.f32 %v3478_v36, %v3477_v61  ;;  %v3480_v9 = vsel %vm541_vm0, %v3423_v40, 0.0  ;;  %v3490_v40 = vsel %vm541_vm0, %v3428_v33, 0.0 }
 0x287   : > { %v3558_v58 = vadd.f32 %v3557_v45, %v3556_v43  ;;  %v3481_v62 = vadd.f32 %v3480_v9, %v3479_v31  ;;  %v3482_v43 = vsel %vm541_vm0, %v3424_v15, 0.0 }
 0x289   : > { %v3560_v20 = vadd.f32 %v3559_v26, %v3558_v58  ;;  %v3483_v30 = vadd.f32 %v3482_v43, %v3481_v62  ;;  %v3486_v26 = vsel %vm541_vm0, %v3426_v16, 0.0 }
 0x28b   : > { %v3562_v50 = vadd.f32 %v3561_v34, %v3560_v20  ;;  %v3485_v19 = vadd.f32 %v3484_v10, %v3483_v30 }
 0x28d   : > { %v3564_v35 = vadd.f32 %v3563_v28, %v3562_v50  ;;  %v3487_v20 = vadd.f32 %v3486_v26, %v3485_v19 }
 0x28f   : > { %v3565_v27 = vrot.slane %v3564_v35, 4  ;;  %v3489_v34 = vadd.f32 %v3488_v54, %v3487_v20 }
 0x291   : > { %v3566_v52 = vadd.f32 %v3565_v27, %v3564_v35  ;;  %v3491_v50 = vadd.f32 %v3490_v40, %v3489_v34 }
 0x293   : > { %v3567_v37 = vrot.slane %v3566_v52, 2  ;;  %v3492_v61 = vrot.slane %v3491_v50, 4 }
 0x295   : > { %v3568_v45 = vadd.f32 %v3567_v37, %v3566_v52 }
 0x297   : > { %v3569_v38 = vrot.slane %v3568_v45, 1 }
 0x299   : > { %v3570_v57 = vadd.f32 %v3569_v38, %v3568_v45  ;;  %v3493_v38 = vadd.f32 %v3492_v61, %v3491_v50 }
 0x29b   : > { %v3571_v58 = vmax.f32 %v3570_v57, 1e-24  ;;  %v3494_v19 = vrot.slane %v3493_v38, 2 }
 0x29d   : > { %4785 = vrsqrt.f32 %v3571_v58  ;;  %v3495_v40 = vadd.f32 %v3494_v19, %v3493_v38 }
 0x2aa   : > { %v7166_v55 = vpop.eup %4785 }
 0x2ab   : > { %v3657_v15 = vmul.f32 %v7166_v55, %v6971_v49  ;;  %v3658_v0 = vmul.f32 %v7166_v55, %v6967_v42  ;;  %v3655_v8 = vmul.f32 %v7166_v55, %v6952_v60  ;;  %v3656_v16 = vmul.f32 %v7166_v55, %v6955_v7 }
 0x2ac   : > { %v3641_v12 = vmul.f32 %v7166_v55, %v7062_v29  ;;  %v3642_v33 = vmul.f32 %v7166_v55, %v7070_v51  ;;  %v3639_v46 = vmul.f32 %v7166_v55, %v7052_v23  ;;  %v3640_v27 = vmul.f32 %v7166_v55, %v7054_v6 }
 0x2ad   : > { %v3674_v28 = vpack.c.bf16 %v3658_v0, %v3657_v15  ;;  %v3673_v35 = vpack.c.bf16 %v3656_v16, %v3655_v8  ;;  %v3653_v52 = vmul.f32 %v7166_v55, %v6851_v5  ;;  %v3654_v36 = vmul.f32 %v7166_v55, %v6856_v32 }
 0x2ae   : > { %v3666_v37 = vpack.c.bf16 %v3642_v33, %v3641_v12  ;;  %v3665_v31 = vpack.c.bf16 %v3640_v27, %v3639_v46  ;;  %v3637_v9 = vmul.f32 %v7166_v55, %v7038_v53  ;;  %v3638_v45 = vmul.f32 %v7166_v55, %v7050_v47 }
 0x2af   : > { %3761 = vrot.lane.b32.xlu0 %v3674_v28, %s4906_s19  ;;  %3759 = vrot.lane.b32.xlu1 %v3673_v35, %s4906_s19  ;;  %v3651_v62 = vmul.f32 %v7166_v55, %v6743_v3  ;;  %v3652_v57 = vmul.f32 %v7166_v55, %v6747_v1  ;;  %v3672_v43 = vpack.c.bf16 %v3654_v36, %v3653_v52  ;;  %v3496_v33 = vrot.slane %v3495_v40, 1 }
 0x2b0   : > { %v3664_v10 = vpack.c.bf16 %v3638_v45, %v3637_v9  ;;  %v3635_v58 = vmul.f32 %v7166_v55, %v7016_v44  ;;  %v3636_v30 = vmul.f32 %v7166_v55, %v7032_v63  ;;  %v3649_v3 = vmul.f32 %v7166_v55, %v7110_v41 }
 0x2b1   : > { %v3671_v26 = vpack.c.bf16 %v3652_v57, %v3651_v62  ;;  %v3650_v1 = vmul.f32 %v7166_v55, %v7120_v24  ;;  %v3633_v54 = vmul.f32 %v7166_v55, %v7001_v11  ;;  %v3634_v34 = vmul.f32 %v7166_v55, %v7014_v4 }
 0x2b2   : > { %v3663_v20 = vpack.c.bf16 %v3636_v30, %v3635_v58  ;;  %v3647_v50 = vmul.f32 %v7166_v55, %v7098_v13  ;;  %v3648_v15 = vmul.f32 %v7166_v55, %v7104_v14  ;;  %v3631_v16 = vmul.f32 %v7166_v55, %v6992_v2  ;;  %v3396_v30 = vld [vmem:[%s7512_s3] sm:$0x1] }
 0x2b3   : > { %3745 = vrot.lane.b32.xlu0 %v3666_v37, %s4906_s19  ;;  %3743 = vrot.lane.b32.xlu1 %v3665_v31, %s4906_s19  ;;  %v3670_v0 = vpack.c.bf16 %v3650_v1, %v3649_v3  ;;  %v3662_v8 = vpack.c.bf16 %v3634_v34, %v3633_v54  ;;  %v3632_v12 = vmul.f32 %v7166_v55, %v6999_v48 }
 0x2b4   : > { %v3669_v28 = vpack.c.bf16 %v3648_v15, %v3647_v50  ;;  %v3645_v35 = vmul.f32 %v7166_v55, %v7088_v18  ;;  %v3646_v27 = vmul.f32 %v7166_v55, %v7090_v56  ;;  %v3629_v61 = vmul.f32 %v7166_v55, %v6979_v17 }
 0x2b5   : > { %v3661_v46 = vpack.c.bf16 %v3632_v12, %v3631_v16  ;;  %v3630_v52 = vmul.f32 %v7166_v55, %v6990_v39  ;;  %v3497_v36 = vadd.f32 %v3496_v33, %v3495_v40  ;;  %v3643_v37 = vmul.f32 %v7166_v55, %v7076_v25 }
 0x2b6   : > { %v3644_v31 = vmul.f32 %v7166_v55, %v7086_v59  ;;  %v3668_v9 = vpack.c.bf16 %v3646_v27, %v3645_v35  ;;  %v3627_v38 = vmul.f32 %v7166_v55, %v6974_v22  ;;  %v3628_v62 = vmul.f32 %v7166_v55, %v6976_v21 }
 0x2b7   : > { %3757 = vrot.lane.b32.xlu0 %v3672_v43, %s4906_s19  ;;  %3741 = vrot.lane.b32.xlu1 %v3664_v10, %s4906_s19  ;;  %v3660_v45 = vpack.c.bf16 %v3630_v52, %v3629_v61  ;;  %v3498_v57 = vmax.f32 %v3497_v36, 1e-24 }
 0x2b8   : > { %v3667_v43 = vpack.c.bf16 %v3644_v31, %v3643_v37  ;;  %v3659_v10 = vpack.c.bf16 %v3628_v62, %v3627_v38 }
 0x2b9   : > { %4787 = vrsqrt.f32 %v3498_v57 }
 0x2bb   : > { %3755 = vrot.lane.b32.xlu0 %v3671_v26, %s4906_s19  ;;  %3739 = vrot.lane.b32.xlu1 %v3663_v20, %s4906_s19  ;;  %v7558_v26 = vld [vmem:[#allocation7_spill] sm:$0xff] }
 0x2bf   : > { %3753 = vrot.lane.b32.xlu0 %v3670_v0, %s4906_s19  ;;  %3737 = vrot.lane.b32.xlu1 %v3662_v8, %s4906_s19 }
 0x2c3   : > { %3751 = vrot.lane.b32.xlu0 %v3669_v28, %s4906_s19  ;;  %3735 = vrot.lane.b32.xlu1 %v3661_v46, %s4906_s19 }
 0x2c6   : > { %v4788_v58 = vpop.eup %4787 }
 0x2c7   : > { %3749 = vrot.lane.b32.xlu0 %v3668_v9, %s4906_s19  ;;  %3733 = vrot.lane.b32.xlu1 %v3660_v45, %s4906_s19  ;;  %v3500_v19 = vmul.f32 %v4788_v58, %v3396_v30 }
 0x2c9   : > { %v3577_v55 = vrot.slane %v3500_v19, %v7558_v26 }
 0x2cb   : > { %3747 = vrot.lane.b32.xlu0 %v3667_v43, %s4906_s19  ;;  %3731 = vrot.lane.b32.xlu1 %v3659_v10, %s4906_s19  ;;  %v3595_v3 = vmul.f32 %v3577_v55, %v7076_v25  ;;  %v3596_v20 = vmul.f32 %v3577_v55, %v7086_v59  ;;  %v3597_v54 = vmul.f32 %v3577_v55, %v7088_v18  ;;  %s4847_s19 = sshll.u32 %s4907_s16, 4  ;;  %s4848_s19 = int_to_ptr.vmem [resolvable:$false] %s4847_s19 }
 0x2cc   : > { %v3598_v34 = vmul.f32 %v3577_v55, %v7090_v56  ;;  %v3579_v40 = vmul.f32 %v3577_v55, %v6974_v22  ;;  %v3580_v50 = vmul.f32 %v3577_v55, %v6976_v21  ;;  %v3599_v0 = vmul.f32 %v3577_v55, %v7098_v13  ;;  %s4849_s20 = scalar_lea.vmem %s4848_s19, 8192  ;;  %p4850_p0 = scmp.lt.s32.totalorder %s7461_s13, %s4848_s19 }
 0x2cd   : > { %v3619_v1 = vpack.c.bf16 %v3596_v20, %v3595_v3  ;;  %v3600_v8 = vmul.f32 %v3577_v55, %v7104_v14  ;;  %v3581_v25 = vmul.f32 %v3577_v55, %v6979_v17  ;;  %v3582_v59 = vmul.f32 %v3577_v55, %v6990_v39  ;;  %v4841_v14 = vld [vmem:[#allocation3 + $0x180] sm:$0xff]  ;;  %v4842_v17 = vld [vmem:[#allocation3 + $0x190] sm:$0xff]  ;;  %p4851_p1 = scmp.lt.s32.totalorder %s4849_s20, %s4843_s18 }
 0x2ce   : > { %v3620_v15 = vpack.c.bf16 %v3598_v34, %v3597_v54  ;;  %v3611_v16 = vpack.c.bf16 %v3580_v50, %v3579_v40  ;;  %v3601_v56 = vmul.f32 %v3577_v55, %v7110_v41  ;;  %v3602_v22 = vmul.f32 %v3577_v55, %v7120_v24 }
 0x2cf   : > { %v3621_v18 = vpack.c.bf16 %v3600_v8, %v3599_v0  ;;  %v3612_v12 = vpack.c.bf16 %v3582_v59, %v3581_v25  ;;  %v3583_v21 = vmul.f32 %v3577_v55, %v6992_v2  ;;  %v3584_v33 = vmul.f32 %v3577_v55, %v6999_v48  ;;  %v3349_v8 = vld [vmem:[#allocation3 + $0x88] sm:$0xff]  ;;  %p4852_p2 = por %p4851_p1, %p4850_p0 }
 0x2d0   : > { %v3622_v13 = vpack.c.bf16 %v3602_v22, %v3601_v56  ;;  %v3603_v28 = vmul.f32 %v4841_v14, %v3577_v55  ;;  %v3604_v35 = vmul.f32 %v4842_v17, %v3577_v55  ;;  %v3585_v46 = vmul.f32 %v3577_v55, %v7001_v11 }
 0x2d1   : > { %v3613_v39 = vpack.c.bf16 %v3584_v33, %v3583_v21  ;;  %v3586_v27 = vmul.f32 %v3577_v55, %v7014_v4  ;;  %v3605_v24 = vmul.f32 %v3577_v55, %v6851_v5  ;;  %v3606_v2 = vmul.f32 %v3577_v55, %v6856_v32  ;;  %p4853_p3 = pnand %p4852_p2, %p4846_p13 }
 0x2d2   : > { %v3623_v41 = vpack.c.bf16 %v3604_v35, %v3603_v28  ;;  %v3587_v61 = vmul.f32 %v3577_v55, %v7016_v44  ;;  %v3588_v52 = vmul.f32 %v3577_v55, %v7032_v63  ;;  %v3607_v37 = vmul.f32 %v3577_v55, %v6952_v60 }
 0x2d3   : > { %v3614_v48 = vpack.c.bf16 %v3586_v27, %v3585_v46  ;;  %v3624_v36 = vpack.c.bf16 %v3606_v2, %v3605_v24  ;;  %v3608_v11 = vmul.f32 %v3577_v55, %v6955_v7  ;;  %v3589_v31 = vmul.f32 %v3577_v55, %v7038_v53 }
 0x2d4   : > { %v3615_v4 = vpack.c.bf16 %v3588_v52, %v3587_v61  ;;  %v3590_v9 = vmul.f32 %v3577_v55, %v7050_v47  ;;  %v3609_v32 = vmul.f32 %v3577_v55, %v6971_v49  ;;  %v3610_v44 = vmul.f32 %v3577_v55, %v6967_v42  ;;  %v3679_v61 = vld [vmem:[%s7513_s4 + $0x20] sm:$0xff] }
 0x2d5   : > { %v3625_v5 = vpack.c.bf16 %v3608_v11, %v3607_v37  ;;  %v3591_v45 = vmul.f32 %v3577_v55, %v7052_v23  ;;  %v3592_v38 = vmul.f32 %v3577_v55, %v7054_v6  ;;  %v3593_v53 = vmul.f32 %v3577_v55, %v7062_v29  ;;  %v3682_v11 = vld [vmem:[%s7513_s4 + $0x38] sm:$0xff] }
 0x2d6   : > { %v3616_v63 = vpack.c.bf16 %v3590_v9, %v3589_v31  ;;  %v3626_v60 = vpack.c.bf16 %v3610_v44, %v3609_v32  ;;  %v3594_v47 = vmul.f32 %v3577_v55, %v7070_v51  ;;  %v3677_v32 = vld [vmem:[%s7513_s4 + $0x10] sm:$0xff]  ;;  %v3680_v44 = vld [vmem:[%s7513_s4 + $0x28] sm:$0xff] }
 0x2d7   : > { %v3617_v7 = vpack.c.bf16 %v3592_v38, %v3591_v45 }
 0x2d8   : > { %v3618_v62 = vpack.c.bf16 %v3594_v47, %v3593_v53 }
 0x2e9   : > { %3699 = vxpose.xlu0.c.b16.start [1/8] (narrow) %v3619_v1, 64 }
 0x2ed   : > { %3700 = vxpose.xlu0.c.b16.cont [2/8] (narrow) %v3620_v15, 64 }
 0x2ee   : > { %3683 = vxpose.xlu1.c.b16.start [1/8] (narrow) %v3611_v16, 64  ;;  %v3351_v16 = vld [vmem:[#allocation3 + $0x98] sm:$0xff] }
 0x2ef   : > { %v3936_v59 = vpack.c.bf16 %v3351_v16, %v3349_v8 }
 0x2f1   : > { %3701 = vxpose.xlu0.c.b16.cont [3/8] (narrow) %v3621_v18, 64 }
 0x2f2   : > { %3684 = vxpose.xlu1.c.b16.cont [2/8] (narrow) %v3612_v12, 64 }
 0x2f5   : > { %3702 = vxpose.xlu0.c.b16.cont [4/8] (narrow) %v3622_v13, 64 }
 0x2f6   : > { %3685 = vxpose.xlu1.c.b16.cont [3/8] (narrow) %v3613_v39, 64 }
 0x2f9   : > { %3703 = vxpose.xlu0.c.b16.cont [5/8] (narrow) %v3623_v41, 64  ;;  %v3681_v41 = vld [vmem:[%s7513_s4 + $0x30] sm:$0xff] }
 0x2fa   : > { %3686 = vxpose.xlu1.c.b16.cont [4/8] (narrow) %v3614_v48, 64 }
 0x2fd   : > { %3704 = vxpose.xlu0.c.b16.cont [6/8] (narrow) %v3624_v36, 64 }
 0x2fe   : > { %3687 = vxpose.xlu1.c.b16.cont [5/8] (narrow) %v3615_v4, 64 }
 0x301   : > { %3705 = vxpose.xlu0.c.b16.cont [7/8] (narrow) %v3625_v5, 64 }
 0x302   : > { %3688 = vxpose.xlu1.c.b16.cont [6/8] (narrow) %v3616_v63, 64 }
 0x305   : > { %3706 = vxpose.xlu0.c.b16.end [8/8] (narrow) %v3626_v60, 64 }
 0x306   : > { %3689 = vxpose.xlu1.c.b16.cont [7/8] (narrow) %v3617_v7, 64 }
 0x30a   : > { %3690 = vxpose.xlu1.c.b16.end [8/8] (narrow) %v3618_v62, 64  ;;  %v3675_v62 = vld [vmem:[%s7513_s4] sm:$0xff] }
 0x321   : > { %v3762_v49 = vpop.permute.xlu0 %3761  ;;  %v3760_v57 = vpop.permute.xlu1 %3759 }
 0x322   : > { %4566 = vmatprep.subr.bf16.mxu1 %v3762_v49  ;;  %v3678_v49 = vld [vmem:[%s7513_s4 + $0x18] sm:$0xff] }
 0x325   : > { %v3746_v42 = vpop.permute.xlu0 %3745  ;;  %v3744_v43 = vpop.permute.xlu1 %3743 }
 0x326   : > { %4567 = vmatpush3.bf16.msra.mxu1 %v3746_v42 }
 0x327   : > { %4568 = vmatprep.subr.bf16.mxu1 %v3760_v57 }
 0x329   : > { %v3758_v23 = vpop.permute.xlu0 %3757  ;;  %v3742_v6 = vpop.permute.xlu1 %3741 }
 0x32a   : > { %4569 = vmatpush3.bf16.msra.mxu1 %v3744_v43 }
 0x32b   : > { %4570 = vmatprep.subr.bf16.mxu1 %v3758_v23 }
 0x32d   : > { %v3756_v10 = vpop.permute.xlu0 %3755  ;;  %v3740_v58 = vpop.permute.xlu1 %3739 }
 0x32e   : > { %4571 = vmatpush3.bf16.msra.mxu1 %v3742_v6 }
 0x32f   : > { %4572 = vmatprep.subr.bf16.mxu1 %v3756_v10  ;;  %v3676_v10 = vld [vmem:[%s7513_s4 + $0x8] sm:$0xff] }
 0x331   : > { %v3754_v29 = vpop.permute.xlu0 %3753  ;;  %v3738_v51 = vpop.permute.xlu1 %3737 }
 0x332   : > { %4573 = vmatpush3.bf16.msra.mxu1 %v3740_v58 }
 0x333   : > { %4574 = vmatprep.subr.bf16.mxu1 %v3754_v29 }
 0x335   : > { %v3752_v30 = vpop.permute.xlu0 %3751  ;;  %v3736_v19 = vpop.permute.xlu1 %3735 }
 0x336   : > { %4575 = vmatpush3.bf16.msra.mxu1 %v3738_v51 }
 0x337   : > { %4576 = vmatprep.subr.bf16.mxu1 %v3752_v30 }
 0x339   : > { %v3750_v26 = vpop.permute.xlu0 %3749  ;;  %v3734_v55 = vpop.permute.xlu1 %3733 }
 0x33a   : > { %4577 = vmatpush3.bf16.msra.mxu1 %v3736_v19 }
 0x33b   : > { %4578 = vmatprep.subr.bf16.mxu1 %v3750_v26 }
 0x33d   : > { %v3748_v3 = vpop.permute.xlu0 %3747  ;;  %v3732_v20 = vpop.permute.xlu1 %3731 }
 0x33e   : > { %4579 = vmatpush3.bf16.msra.mxu1 %v3734_v55 }
 0x33f   : > { %4580 = vmatprep.subr.bf16.mxu1 %v3748_v3 }
 0x342   : > { %4581 = vmatpush3.bf16.msra.mxu1 %v3732_v20 }
 0x34b   : > { %v3707_v1 = vpop.trf.xlu0 }
 0x34c   : > { %3811 = vmatprep.mubr.bf16.mxu1 %v3707_v1 }
 0x34f   : > { %v3708_v54 = vpop.trf.xlu0 }
 0x350   : > { %v3691_v34 = vpop.trf.xlu1 }
 0x351   : > { %3812 = vmatmul.mubr.bf16.vlgmr.msra.gmra.mxu1 %v3691_v34 }
 0x352   : > { %3819 = vmatprep.mubr.bf16.mxu1 %v3708_v54 }
 0x353   : > { %v3709_v50 = vpop.trf.xlu0 }
 0x354   : > { %v3692_v40 = vpop.trf.xlu1 }
 0x357   : > { %v3710_v0 = vpop.trf.xlu0 }
 0x358   : > { %v3693_v15 = vpop.trf.xlu1 }
 0x359   : > { %3820 = vmatmul.mubr.bf16.gmra.mxu1 %v3692_v40 }
 0x35a   : > { %3827 = vmatprep.mubr.bf16.mxu1 %v3709_v50 }
 0x35c   : > { %v3694_v25 = vpop.trf.xlu1 }
 0x361   : > { %3828 = vmatmul.mubr.bf16.gmra.mxu1 %v3693_v15 }
 0x362   : > { %3835 = vmatprep.mubr.bf16.mxu1 %v3710_v0 }
 0x369   : > { %3836 = vmatmul.mubr.bf16.gmra.mxu1 %v3694_v25 }
 0x36a   : > { %4662 = vmatprep.mubr.msk.bf16.mxu1 %vm541_vm0, %v3936_v59 }
 0x411   : > { %v4582_v18 = vpop.f32.mrf.mxu1 }
 0x413   : > { %v4583_v56 = vpop.f32.mrf.mxu1 }
 0x414   : > { %v4584_v45 = vadd.f32 %v4583_v56, %v4582_v18 }
 0x415   : > { %v4585_v22 = vpop.f32.mrf.mxu1 }
 0x416   : > { %v3814_v57 = vadd.f32 %v4584_v45, %v3675_v62 }
 0x417   : > { %v4586_v12 = vpop.f32.mrf.mxu1 }
 0x418   : > { %v4587_v42 = vadd.f32 %v4586_v12, %v4585_v22  ;;  %v3844_v58 = vsel %vm541_vm0, %v3814_v57, -inf }
 0x419   : > { %v4588_v21 = vpop.f32.mrf.mxu1 }
 0x41a   : > { %v3817_v51 = vadd.f32 %v4587_v42, %v3676_v10 }
 0x41b   : > { %v4589_v33 = vpop.f32.mrf.mxu1 }
 0x41c   : > { %v4590_v36 = vadd.f32 %v4589_v33, %v4588_v21  ;;  %v3847_v30 = vsel %vm541_vm0, %v3817_v51, -inf }
 0x41d   : > { %v4591_v13 = vpop.f32.mrf.mxu1 }
 0x41e   : > { %v3822_v38 = vadd.f32 %v4590_v36, %v3677_v32 }
 0x41f   : > { %v4592_v14 = vpop.f32.mrf.mxu1 }
 0x420   : > { %v4593_v60 = vadd.f32 %v4592_v14, %v4591_v13  ;;  %v3850_v43 = vsel %vm541_vm0, %v3822_v38, -inf }
 0x421   : > { %v4594_v28 = vpop.f32.mrf.mxu1 }
 0x422   : > { %v3825_v6 = vadd.f32 %v4593_v60, %v3678_v49 }
 0x423   : > { %v4595_v17 = vpop.f32.mrf.mxu1 }
 0x424   : > { %v4596_v24 = vadd.f32 %v4595_v17, %v4594_v28  ;;  %v3853_v29 = vsel %vm541_vm0, %v3825_v6, -inf }
 0x425   : > { %v4597_v35 = vpop.f32.mrf.mxu1 }
 0x426   : > { %v3830_v5 = vadd.f32 %v4596_v24, %v3679_v61 }
 0x427   : > { %v4598_v39 = vpop.f32.mrf.mxu1 }
 0x428   : > { %v4599_v4 = vadd.f32 %v4598_v39, %v4597_v35  ;;  %v3856_v53 = vsel %vm541_vm0, %v3830_v5, -inf }
 0x429   : > { %v4600_v46 = vpop.f32.mrf.mxu1 }
 0x42a   : > { %v3833_v47 = vadd.f32 %v4599_v4, %v3680_v44 }
 0x42b   : > { %v4601_v27 = vpop.f32.mrf.mxu1 }
 0x42c   : > { %v4602_v2 = vadd.f32 %v4601_v27, %v4600_v46  ;;  %v3859_v23 = vsel %vm541_vm0, %v3833_v47, -inf }
 0x42d   : > { %v4603_v48 = vpop.f32.mrf.mxu1 }
 0x42e   : > { %v3838_v52 = vadd.f32 %v4602_v2, %v3681_v41 }
 0x42f   : > { %v4604_v37 = vpop.f32.mrf.mxu1 }
 0x430   : > { %v4605_v31 = vadd.f32 %v4604_v37, %v4603_v48  ;;  %v3862_v9 = vsel %vm541_vm0, %v3838_v52, -inf }
 0x431   : > { %3863 = vmax.xlane.f32.xlu0 %v3862_v9 }
 0x432   : > { %v3841_v63 = vadd.f32 %v4605_v31, %v3682_v11 }
 0x434   : > { %v3865_v7 = vsel %vm541_vm0, %v3841_v63, -inf }
 0x435   : > { %3866 = vmax.xlane.f32.xlu1 %v3865_v7  ;;  %3857 = vmax.xlane.f32.xlu0 %v3856_v53 }
 0x439   : > { %3851 = vmax.xlane.f32.xlu1 %v3850_v43  ;;  %3860 = vmax.xlane.f32.xlu0 %v3859_v23 }
 0x43d   : > { %3845 = vmax.xlane.f32.xlu1 %v3844_v58  ;;  %3854 = vmax.xlane.f32.xlu0 %v3853_v29 }
 0x441   : > { %3848 = vmax.xlane.f32.xlu0 %v3847_v30 }
 0x4ba   : > { %v3864_v19 = vpop.xlane.xlu0 %3863 }
 0x4bb   : > { %v3874_v26 = vsub.f32 %v3838_v52, %v3864_v19 }
 0x4bd   : > { %v3888_v55 = vmul.f32 1.442695, %v3874_v26 }
 0x4be   : > { %v3867_v3 = vpop.xlane.xlu1 %3866  ;;  %v3858_v20 = vpop.xlane.xlu0 %3857 }
 0x4bf   : > { %4789 = vpow2.f32 %v3888_v55  ;;  %v3875_v1 = vsub.f32 %v3841_v63, %v3867_v3  ;;  %v3872_v54 = vsub.f32 %v3830_v5, %v3858_v20 }
 0x4c1   : > { %v3890_v34 = vmul.f32 1.442695, %v3875_v1  ;;  %v3884_v40 = vmul.f32 1.442695, %v3872_v54 }
 0x4c2   : > { %v3852_v50 = vpop.xlane.xlu1 %3851  ;;  %v3861_v15 = vpop.xlane.xlu0 %3860 }
 0x4c3   : > { %4791 = vpow2.f32 %v3890_v34  ;;  %v3870_v0 = vsub.f32 %v3822_v38, %v3852_v50  ;;  %v3873_v8 = vsub.f32 %v3833_v47, %v3861_v15  ;;  %v4195_v34 = vld [vmem:[%s7514_s5 + $0x30] sm:$0xff] }
 0x4c4   : > { %4793 = vpow2.f32 %v3884_v40  ;;  %v4196_v40 = vld [vmem:[%s7514_s5 + $0x38] sm:$0xff] }
 0x4c5   : > { %v3880_v16 = vmul.f32 1.442695, %v3870_v0  ;;  %v3886_v25 = vmul.f32 1.442695, %v3873_v8  ;;  %v4200_v50 = vpack.c.bf16 %v4196_v40, %v4195_v34  ;;  %v3339_v0 = vld [vmem:[#allocation3 + $0x38] sm:$0xff]  ;;  %v3337_v8 = vld [vmem:[#allocation3 + $0x28] sm:$0xff] }
 0x4c6   : > { %v3846_v59 = vpop.xlane.xlu1 %3845  ;;  %v3855_v18 = vpop.xlane.xlu0 %3854 }
 0x4c7   : > { %4795 = vpow2.f32 %v3880_v16  ;;  %v3868_v56 = vsub.f32 %v3814_v57, %v3846_v59  ;;  %v3871_v22 = vsub.f32 %v3825_v6, %v3855_v18  ;;  %v3341_v16 = vld [vmem:[#allocation3 + $0x48] sm:$0xff]  ;;  %v3355_v18 = vld [vmem:[#allocation3 + $0xb8] sm:$0xff] }
 0x4c8   : > { %4797 = vpow2.f32 %v3886_v25  ;;  %v3343_v25 = vld [vmem:[#allocation3 + $0x58] sm:$0xff]  ;;  %v3353_v59 = vld [vmem:[#allocation3 + $0xa8] sm:$0xff] }
 0x4c9   : > { %v3876_v12 = vmul.f32 1.442695, %v3868_v56  ;;  %v3882_v21 = vmul.f32 1.442695, %v3871_v22  ;;  %v3359_v56 = vld [vmem:[#allocation3 + $0xd8] sm:$0xff]  ;;  %v3357_v22 = vld [vmem:[#allocation3 + $0xc8] sm:$0xff] }
 0x4ca   : > { %v3849_v33 = vpop.xlane.xlu0 %3848 }
 0x4cb   : > { %4799 = vpow2.f32 %v3876_v12  ;;  %v3869_v13 = vsub.f32 %v3817_v51, %v3849_v33  ;;  %v4193_v12 = vld [vmem:[%s7514_s5 + $0x20] sm:$0xff]  ;;  %v3933_v33 = vpack.c.bf16 %v3339_v0, %v3337_v8 }
 0x4cc   : > { %v4790_v14 = vpop.eup %4789  ;;  %4801 = vpow2.f32 %v3882_v21  ;;  %v4194_v21 = vld [vmem:[%s7514_s5 + $0x28] sm:$0xff] }
 0x4cd   : > { %v3878_v28 = vmul.f32 1.442695, %v3869_v13  ;;  %v3910_v17 = vsel %vm541_vm0, %v4790_v14, 0.0  ;;  %v3937_v13 = vpack.c.bf16 %v3355_v18, %v3353_v59 }
 0x4ce   : > { %3911 = vadd.xlane.f32.xlu1 %v3910_v17  ;;  %v4199_v17 = vpack.c.bf16 %v4194_v21, %v4193_v12 }
 0x4cf   : > { %4803 = vpow2.f32 %v3878_v28  ;;  %v3938_v28 = vpack.c.bf16 %v3359_v56, %v3357_v22 }
 0x4d0   : > { %v4792_v35 = vpop.eup %4791 }
 0x4d1   : > { %v4794_v39 = vpop.eup %4793  ;;  %v3913_v46 = vsel %vm541_vm0, %v4792_v35, 0.0 }
 0x4d2   : > { %3914 = vadd.xlane.f32.xlu0 %v3913_v46  ;;  %v3904_v27 = vsel %vm541_vm0, %v4794_v39, 0.0  ;;  %v3361_v46 = vld [vmem:[#allocation3 + $0xe8] sm:$0xff] }
 0x4d3   : > { %3905 = vadd.xlane.f32.xlu1 %v3904_v27  ;;  %v3363_v27 = vld [vmem:[#allocation3 + $0xf8] sm:$0xff] }
 0x4d4   : > { %v4796_v41 = vpop.eup %4795 }
 0x4d5   : > { %v4798_v24 = vpop.eup %4797  ;;  %v3898_v2 = vsel %vm541_vm0, %v4796_v41, 0.0 }
 0x4d6   : > { %v3907_v48 = vsel %vm541_vm0, %v4798_v24, 0.0 }
 0x4d7   : > { %3899 = vadd.xlane.f32.xlu1 %v3898_v2  ;;  %3908 = vadd.xlane.f32.xlu0 %v3907_v48  ;;  %v3939_v48 = vpack.c.bf16 %v3363_v27, %v3361_v46 }
 0x4d8   : > { %v4800_v61 = vpop.eup %4799 }
 0x4d9   : > { %v4802_v52 = vpop.eup %4801  ;;  %v3892_v36 = vsel %vm541_vm0, %v4800_v61, 0.0 }
 0x4da   : > { %v3901_v37 = vsel %vm541_vm0, %v4802_v52, 0.0 }
 0x4db   : > { %3893 = vadd.xlane.f32.xlu1 %v3892_v36  ;;  %3902 = vadd.xlane.f32.xlu0 %v3901_v37  ;;  %v3371_v36 = vld [vmem:[#allocation3 + $0x138] sm:$0xff]  ;;  %v3373_v37 = vld [vmem:[#allocation3 + $0x148] sm:$0xff] }
 0x4dc   : > { %v4804_v11 = vpop.eup %4803 }
 0x4dd   : > { %v3895_v4 = vsel %vm541_vm0, %v4804_v11, 0.0 }
 0x4df   : > { %3896 = vadd.xlane.f32.xlu0 %v3895_v4 }
 0x557   : > { %v3912_v31 = vpop.xlane.xlu1 %3911 }
 0x558   : > { %4805 = vrcp.f32 %v3912_v31 }
 0x55b   : > { %v3915_v9 = vpop.xlane.xlu0 %3914 }
 0x55c   : > { %v3906_v5 = vpop.xlane.xlu1 %3905  ;;  %4807 = vrcp.f32 %v3915_v9  ;;  %v3377_v9 = vld [vmem:[#allocation3 + $0x168] sm:$0xff] }
 0x55d   : > { %4809 = vrcp.f32 %v3906_v5  ;;  %v3379_v5 = vld [vmem:[#allocation3 + $0x178] sm:$0xff] }
 0x560   : > { %v3909_v32 = vpop.xlane.xlu0 %3908  ;;  %v3900_v44 = vpop.xlane.xlu1 %3899 }
 0x561   : > { %4811 = vrcp.f32 %v3909_v32  ;;  %v3381_v32 = vld [vmem:[#allocation3 + $0x188] sm:$0xff] }
 0x562   : > { %4813 = vrcp.f32 %v3900_v44  ;;  %v3383_v44 = vld [vmem:[#allocation3 + $0x198] sm:$0xff] }
 0x564   : > { %v3903_v63 = vpop.xlane.xlu0 %3902  ;;  %v3894_v7 = vpop.xlane.xlu1 %3893 }
 0x565   : > { %4815 = vrcp.f32 %v3903_v63  ;;  %v4806_v45 = vpop.eup %4805  ;;  %v3943_v63 = vpack.c.bf16 %v3379_v5, %v3377_v9 }
 0x566   : > { %v3930_v53 = vmul.f32 %v4806_v45, %v4790_v14  ;;  %v3934_v14 = vpack.c.bf16 %v3343_v25, %v3341_v16  ;;  %v3944_v45 = vpack.c.bf16 %v3383_v44, %v3381_v32 }
 0x568   : > { %v3897_v38 = vpop.xlane.xlu0 %3896 }
 0x569   : > { %v4808_v60 = vpop.eup %4807  ;;  %4817 = vrcp.f32 %v3897_v38  ;;  %v3385_v38 = vld [vmem:[#allocation3 + $0x1a8] sm:$0xff] }
 0x56a   : > { %v3931_v47 = vmul.f32 %v4808_v60, %v4792_v35  ;;  %4819 = vrcp.f32 %v3894_v7  ;;  %v4810_v49 = vpop.eup %4809  ;;  %v3347_v35 = vld [vmem:[#allocation3 + $0x78] sm:$0xff]  ;;  %v3389_v7 = vld [vmem:[#allocation3 + $0x1c8] sm:$0xff] }
 0x56b   : > { %v3928_v43 = vmul.f32 %v4810_v49, %v4794_v39  ;;  %v3345_v39 = vld [vmem:[#allocation3 + $0x68] sm:$0xff]  ;;  %v3387_v60 = vld [vmem:[#allocation3 + $0x1b8] sm:$0xff] }
 0x56c   : > { %v3951_v62 = vpack.c.bf16 %v3931_v47, %v3930_v53  ;;  %v3935_v2 = vpack.c.bf16 %v3347_v35, %v3345_v39  ;;  %v3391_v53 = vld [vmem:[#allocation3 + $0x1d8] sm:$0xff]  ;;  %v3945_v47 = vpack.c.bf16 %v3387_v60, %v3385_v38  ;;  %v3393_v49 = vld [vmem:[#allocation3 + $0x1e8] sm:$0xff] }
 0x56e   : > { %4734 = vmatprep.subr.msk.bf16.mxu0 %vm541_vm0, %v3951_v62  ;;  %4735 = vmatprep.subr.msk.bf16.mxu1 %vm541_vm0, %v3951_v62  ;;  %v4010_v57 = vsel %vm541_vm0, %v3951_v62, 0  ;;  %v4812_v42 = vpop.eup %4811  ;;  %v3946_v62 = vpack.c.bf16 %v3391_v53, %v3389_v7 }
 0x56f   : > { %4647 = vmatpush3.bf16.xpose.msra.mxu0 %v4010_v57  ;;  %4730 = vmatpush3.bf16.xpose.msra.mxu1 %v4010_v57  ;;  %v3929_v23 = vmul.f32 %v4812_v42, %v4798_v24  ;;  %v4814_v6 = vpop.eup %4813  ;;  %v3367_v24 = vld [vmem:[#allocation3 + $0x118] sm:$0xff] }
 0x570   : > { %v3926_v29 = vmul.f32 %v4814_v6, %v4796_v41  ;;  %v3365_v41 = vld [vmem:[#allocation3 + $0x108] sm:$0xff]  ;;  %v3395_v57 = vld [vmem:[#allocation3 + $0x1f8] sm:$0xff] }
 0x571   : > { %v3950_v10 = vpack.c.bf16 %v3929_v23, %v3928_v43  ;;  %v3947_v42 = vpack.c.bf16 %v3395_v57, %v3393_v49  ;;  %v4191_v43 = vld [vmem:[%s7514_s5 + $0x10] sm:$0xff]  ;;  %v4192_v23 = vld [vmem:[%s7514_s5 + $0x18] sm:$0xff] }
 0x572   : > { %v4816_v58 = vpop.eup %4815  ;;  %v4198_v6 = vpack.c.bf16 %v4192_v23, %v4191_v43 }
 0x573   : > { %4736 = vmatprep.subr.msk.bf16.mxu0 %vm541_vm0, %v3950_v10  ;;  %4737 = vmatprep.subr.msk.bf16.mxu1 %vm541_vm0, %v3950_v10  ;;  %v3927_v51 = vmul.f32 %v4816_v58, %v4802_v52  ;;  %v4007_v30 = vsel %vm541_vm0, %v3950_v10, 0  ;;  %v3369_v52 = vld [vmem:[#allocation3 + $0x128] sm:$0xff]  ;;  %v4189_v10 = vld [vmem:[%s7514_s5] sm:$0xff] }
 0x574   : > { %v3941_v4 = vpack.c.bf16 %v3371_v36, %v3369_v52  ;;  %v4190_v58 = vld [vmem:[%s7514_s5 + $0x8] sm:$0xff] }
 0x575   : > { %v3949_v19 = vpack.c.bf16 %v3927_v51, %v3926_v29  ;;  %v4197_v29 = vpack.c.bf16 %v4190_v58, %v4189_v10 }
 0x576   : > { %v4818_v26 = vpop.eup %4817 }
 0x577   : > { %4649 = vmatpush3.bf16.xpose.msra.mxu0 %v4007_v30  ;;  %4731 = vmatpush3.bf16.xpose.msra.mxu1 %v4007_v30  ;;  %v4820_v55 = vpop.eup %4819  ;;  %v3925_v3 = vmul.f32 %v4818_v26, %v4804_v11  ;;  %v4004_v1 = vsel %vm541_vm0, %v3949_v19, 0  ;;  %v3375_v11 = vld [vmem:[#allocation3 + $0x158] sm:$0xff] }
 0x578   : > { %4738 = vmatprep.subr.msk.bf16.mxu0 %vm541_vm0, %v3949_v19  ;;  %4739 = vmatprep.subr.msk.bf16.mxu1 %vm541_vm0, %v3949_v19  ;;  %v3924_v20 = vmul.f32 %v4820_v55, %v4800_v61  ;;  %v3940_v61 = vpack.c.bf16 %v3367_v24, %v3365_v41  ;;  %v3942_v31 = vpack.c.bf16 %v3375_v11, %v3373_v37 }
 0x57a   : > { %v3948_v54 = vpack.c.bf16 %v3925_v3, %v3924_v20 }
 0x57c   : > { %v4001_v15 = vsel %vm541_vm0, %v3948_v54, 0 }
 0x57f   : > { %4651 = vmatpush3.bf16.xpose.msra.mxu0 %v4004_v1  ;;  %4732 = vmatpush3.bf16.xpose.msra.mxu1 %v4004_v1 }
 0x580   : > { %4740 = vmatprep.subr.msk.bf16.mxu0 %vm541_vm0, %v3948_v54  ;;  %4741 = vmatprep.subr.msk.bf16.mxu1 %vm541_vm0, %v3948_v54 }
 0x587   : > { %4653 = vmatpush3.bf16.xpose.msra.mxu0 %v4001_v15  ;;  %4733 = vmatpush3.bf16.xpose.msra.mxu1 %v4001_v15 }
 0x588   : > { %4686 = vmatprep.subr.bf16.mxu1 %v4200_v50 }
 0x58e   : > { %4655 = vmatmul.mubr.msk.bf16.vlgmr.msra.gmra.mxu0 %vm541_vm0, %v3933_v33  ;;  %4663 = vmatmul.mubr.msk.bf16.vlgmr.msra.gmra.mxu1 %vm541_vm0, %v3937_v13 }
 0x58f   : > { %4658 = vmatprep.mubr.msk.bf16.mxu0 %vm541_vm0, %v3934_v14  ;;  %4666 = vmatprep.mubr.msk.bf16.mxu1 %vm541_vm0, %v3938_v28 }
 0x590   : > { %4687 = vmatpush3.bf16.msra.mxu1 %v4200_v50 }
 0x591   : > { %4688 = vmatprep.subr.bf16.mxu1 %v4199_v17 }
 0x594   : > { %4689 = vmatpush3.bf16.msra.mxu1 %v4199_v17 }
 0x595   : > { %4690 = vmatprep.subr.bf16.mxu1 %v4198_v6 }
 0x596   : > { %4659 = vmatmul.mubr.msk.bf16.gmra.mxu0 %vm541_vm0, %v3935_v2  ;;  %4667 = vmatmul.mubr.msk.bf16.gmra.mxu1 %vm541_vm0, %v3939_v48 }
 0x597   : > { %4670 = vmatprep.mubr.msk.bf16.mxu1 %vm541_vm0, %v3940_v61 }
 0x598   : > { %4691 = vmatpush3.bf16.msra.mxu1 %v4198_v6 }
 0x599   : > { %4692 = vmatprep.subr.bf16.mxu1 %v4197_v29 }
 0x59c   : > { %4693 = vmatpush3.bf16.msra.mxu1 %v4197_v29 }
 0x59e   : > { %4671 = vmatmul.mubr.msk.bf16.gmra.mxu1 %vm541_vm0, %v3941_v4 }
 0x59f   : > { %4674 = vmatprep.mubr.msk.bf16.mxu1 %vm541_vm0, %v3942_v31 }
 0x5a6   : > { %4675 = vmatmul.mubr.msk.bf16.gmra.mxu1 %vm541_vm0, %v3943_v63 }
 0x5a7   : > { %4678 = vmatprep.mubr.msk.bf16.mxu1 %vm541_vm0, %v3944_v45 }
 0x5ae   : > { %4679 = vmatmul.mubr.msk.bf16.gmra.mxu1 %vm541_vm0, %v3945_v47 }
 0x5af   : > { %4682 = vmatprep.mubr.msk.bf16.mxu1 %vm541_vm0, %v3946_v62 }
 0x5b6   : > { %4683 = vmatmul.mubr.msk.bf16.gmra.mxu1 %vm541_vm0, %v3947_v42 }
 0x64e   : > { %v4656_v51 = vpop.f32.mrf.mxu0  ;;  %v4664_v30 = vpop.f32.mrf.mxu1 }
 0x650   : > { %v4046_v19 = vpop.f32.mrf.mxu0  ;;  %v4078_v26 = vpop.f32.mrf.mxu1 }
 0x652   : > { %v4657_v55 = vpop.f32.mrf.mxu0  ;;  %v4665_v3 = vpop.f32.mrf.mxu1 }
 0x653   : > { %v4174_v34 = vpack.c.bf16 %v4657_v55, %v4656_v51  ;;  %v4178_v14 = vpack.c.bf16 %v4665_v3, %v4664_v30 }
 0x654   : > { %v4049_v20 = vpop.f32.mrf.mxu0  ;;  %v4081_v1 = vpop.f32.mrf.mxu1 }
 0x655   : > { %v4173_v54 = vpack.c.bf16 %v4049_v20, %v4046_v19  ;;  %v4177_v12 = vpack.c.bf16 %v4081_v1, %v4078_v26 }
 0x656   : > { %v4660_v40 = vpop.f32.mrf.mxu0  ;;  %v4668_v50 = vpop.f32.mrf.mxu1 }
 0x657   : > { %4694 = vmatprep.mubr.msk.bf16.mxu1 %vm541_vm0, %v4173_v54 }
 0x658   : > { %v4062_v15 = vpop.f32.mrf.mxu0  ;;  %v4094_v0 = vpop.f32.mrf.mxu1  ;;  %4695 = vmatmul.mubr.msk.bf16.vlgmr.msra.gmra.mxu1 %vm541_vm0, %v4174_v34 }
 0x65a   : > { %v4661_v8 = vpop.f32.mrf.mxu0  ;;  %v4669_v16 = vpop.f32.mrf.mxu1 }
 0x65b   : > { %v4176_v56 = vpack.c.bf16 %v4661_v8, %v4660_v40  ;;  %v4180_v27 = vpack.c.bf16 %v4669_v16, %v4668_v50 }
 0x65c   : > { %v4065_v25 = vpop.f32.mrf.mxu0  ;;  %v4097_v59 = vpop.f32.mrf.mxu1 }
 0x65d   : > { %v4175_v18 = vpack.c.bf16 %v4065_v25, %v4062_v15  ;;  %v4179_v17 = vpack.c.bf16 %v4097_v59, %v4094_v0 }
 0x65e   : > { %v4672_v22 = vpop.f32.mrf.mxu1 }
 0x65f   : > { %4698 = vmatprep.mubr.msk.bf16.mxu1 %vm541_vm0, %v4175_v18 }
 0x660   : > { %v4110_v21 = vpop.f32.mrf.mxu1  ;;  %4699 = vmatmul.mubr.msk.bf16.gmra.mxu1 %vm541_vm0, %v4176_v56 }
 0x661   : > { %4702 = vmatprep.mubr.msk.bf16.mxu1 %vm541_vm0, %v4177_v12 }
 0x662   : > { %v4673_v33 = vpop.f32.mrf.mxu1 }
 0x663   : > { %v4182_v52 = vpack.c.bf16 %v4673_v33, %v4672_v22 }
 0x664   : > { %v4113_v13 = vpop.f32.mrf.mxu1 }
 0x665   : > { %v4181_v24 = vpack.c.bf16 %v4113_v13, %v4110_v21 }
 0x666   : > { %v4676_v28 = vpop.f32.mrf.mxu1 }
 0x668   : > { %v4126_v35 = vpop.f32.mrf.mxu1  ;;  %4703 = vmatmul.mubr.msk.bf16.gmra.mxu1 %vm541_vm0, %v4178_v14 }
 0x669   : > { %4706 = vmatprep.mubr.msk.bf16.mxu1 %vm541_vm0, %v4179_v17 }
 0x66a   : > { %v4677_v39 = vpop.f32.mrf.mxu1 }
 0x66b   : > { %v4184_v4 = vpack.c.bf16 %v4677_v39, %v4676_v28 }
 0x66c   : > { %v4129_v46 = vpop.f32.mrf.mxu1 }
 0x66d   : > { %v4183_v36 = vpack.c.bf16 %v4129_v46, %v4126_v35 }
 0x66e   : > { %v4680_v41 = vpop.f32.mrf.mxu1 }
 0x670   : > { %v4142_v2 = vpop.f32.mrf.mxu1  ;;  %4707 = vmatmul.mubr.msk.bf16.gmra.mxu1 %vm541_vm0, %v4180_v27 }
 0x671   : > { %4710 = vmatprep.mubr.msk.bf16.mxu1 %vm541_vm0, %v4181_v24 }
 0x672   : > { %v4681_v48 = vpop.f32.mrf.mxu1 }
 0x673   : > { %v4186_v32 = vpack.c.bf16 %v4681_v48, %v4680_v41 }
 0x674   : > { %v4145_v61 = vpop.f32.mrf.mxu1 }
 0x675   : > { %v4185_v31 = vpack.c.bf16 %v4145_v61, %v4142_v2 }
 0x676   : > { %v4684_v37 = vpop.f32.mrf.mxu1 }
 0x678   : > { %4711 = vmatmul.mubr.msk.bf16.gmra.mxu1 %vm541_vm0, %v4182_v52  ;;  %v4158_v11 = vpop.f32.mrf.mxu1 }
 0x679   : > { %4714 = vmatprep.mubr.msk.bf16.mxu1 %vm541_vm0, %v4183_v36 }
 0x67a   : > { %v4685_v9 = vpop.f32.mrf.mxu1 }
 0x67b   : > { %v4188_v63 = vpack.c.bf16 %v4685_v9, %v4684_v37 }
 0x67c   : > { %v4161_v5 = vpop.f32.mrf.mxu1 }
 0x67d   : > { %v4187_v44 = vpack.c.bf16 %v4161_v5, %v4158_v11 }
 0x680   : > { %4715 = vmatmul.mubr.msk.bf16.gmra.mxu1 %vm541_vm0, %v4184_v4 }
 0x681   : > { %4718 = vmatprep.mubr.msk.bf16.mxu1 %vm541_vm0, %v4185_v31 }
 0x688   : > { %4719 = vmatmul.mubr.msk.bf16.gmra.mxu1 %vm541_vm0, %v4186_v32 }
 0x689   : > { %4722 = vmatprep.mubr.msk.bf16.mxu1 %vm541_vm0, %v4187_v44 }
 0x690   : > { %4723 = vmatmul.mubr.msk.bf16.gmra.mxu1 %vm541_vm0, %v4188_v63 }
 0x718   : > { %v4696_v45 = vpop.f32.mrf.mxu1 }
 0x719   : > { %4412 = vst.msk [vmem:[%s7392_s11 + $0x10] sm:$0xff] %vm541_vm0, %v4696_v45 }
 0x71a   : > { %v4283_v38 = vpop.f32.mrf.mxu1 }
 0x71b   : > { %4410 = vst.msk [vmem:[%s7392_s11] sm:$0xff] %vm541_vm0, %v4283_v38 }
 0x71c   : > { %v4697_v60 = vpop.f32.mrf.mxu1 }
 0x71d   : > { %4413 = vst.msk [vmem:[%s7392_s11 + $0x18] sm:$0xff] %vm541_vm0, %v4697_v60 }
 0x71e   : > { %v4286_v7 = vpop.f32.mrf.mxu1 }
 0x71f   : > { %4411 = vst.msk [vmem:[%s7392_s11 + $0x8] sm:$0xff] %vm541_vm0, %v4286_v7 }
 0x720   : > { %v4700_v53 = vpop.f32.mrf.mxu1 }
 0x721   : > { %4416 = vst.msk [vmem:[%s7392_s11 + $0x30] sm:$0xff] %vm541_vm0, %v4700_v53 }
 0x722   : > { %v4299_v47 = vpop.f32.mrf.mxu1 }
 0x723   : > { %4414 = vst.msk [vmem:[%s7392_s11 + $0x20] sm:$0xff] %vm541_vm0, %v4299_v47 }
 0x724   : > { %v4701_v62 = vpop.f32.mrf.mxu1 }
 0x725   : > { %4417 = vst.msk [vmem:[%s7392_s11 + $0x38] sm:$0xff] %vm541_vm0, %v4701_v62 }
 0x726   : > { %v4302_v49 = vpop.f32.mrf.mxu1 }
 0x727   : > { %4415 = vst.msk [vmem:[%s7392_s11 + $0x28] sm:$0xff] %vm541_vm0, %v4302_v49 }
 0x728   : > { %v4704_v57 = vpop.f32.mrf.mxu1 }
 0x729   : > { %4420 = vst.msk [vmem:[%s7392_s11 + $0x50] sm:$0xff] %vm541_vm0, %v4704_v57 }
 0x72a   : > { %v4315_v42 = vpop.f32.mrf.mxu1 }
 0x72b   : > { %4418 = vst.msk [vmem:[%s7392_s11 + $0x40] sm:$0xff] %vm541_vm0, %v4315_v42 }
 0x72c   : > { %v4705_v43 = vpop.f32.mrf.mxu1 }
 0x72d   : > { %4421 = vst.msk [vmem:[%s7392_s11 + $0x58] sm:$0xff] %vm541_vm0, %v4705_v43 }
 0x72e   : > { %v4318_v23 = vpop.f32.mrf.mxu1 }
 0x72f   : > { %4419 = vst.msk [vmem:[%s7392_s11 + $0x48] sm:$0xff] %vm541_vm0, %v4318_v23 }
 0x730   : > { %v4708_v6 = vpop.f32.mrf.mxu1 }
 0x731   : > { %4424 = vst.msk [vmem:[%s7392_s11 + $0x70] sm:$0xff] %vm541_vm0, %v4708_v6 }
 0x732   : > { %v4331_v10 = vpop.f32.mrf.mxu1 }
 0x733   : > { %4422 = vst.msk [vmem:[%s7392_s11 + $0x60] sm:$0xff] %vm541_vm0, %v4331_v10 }
 0x734   : > { %v4709_v58 = vpop.f32.mrf.mxu1 }
 0x735   : > { %4425 = vst.msk [vmem:[%s7392_s11 + $0x78] sm:$0xff] %vm541_vm0, %v4709_v58 }
 0x736   : > { %v4334_v29 = vpop.f32.mrf.mxu1 }
 0x737   : > { %4423 = vst.msk [vmem:[%s7392_s11 + $0x68] sm:$0xff] %vm541_vm0, %v4334_v29 }
 0x738   : > { %v4712_v51 = vpop.f32.mrf.mxu1 }
 0x739   : > { %4428 = vst.msk [vmem:[%s7392_s11 + $0x90] sm:$0xff] %vm541_vm0, %v4712_v51 }
 0x73a   : > { %v4347_v30 = vpop.f32.mrf.mxu1 }
 0x73b   : > { %4426 = vst.msk [vmem:[%s7392_s11 + $0x80] sm:$0xff] %vm541_vm0, %v4347_v30 }
 0x73c   : > { %v4713_v19 = vpop.f32.mrf.mxu1 }
 0x73d   : > { %4429 = vst.msk [vmem:[%s7392_s11 + $0x98] sm:$0xff] %vm541_vm0, %v4713_v19 }
 0x73e   : > { %v4350_v26 = vpop.f32.mrf.mxu1 }
 0x73f   : > { %4427 = vst.msk [vmem:[%s7392_s11 + $0x88] sm:$0xff] %vm541_vm0, %v4350_v26 }
 0x740   : > { %v4716_v55 = vpop.f32.mrf.mxu1 }
 0x741   : > { %4432 = vst.msk [vmem:[%s7392_s11 + $0xb0] sm:$0xff] %vm541_vm0, %v4716_v55 }
 0x742   : > { %v4363_v3 = vpop.f32.mrf.mxu1 }
 0x743   : > { %4430 = vst.msk [vmem:[%s7392_s11 + $0xa0] sm:$0xff] %vm541_vm0, %v4363_v3 }
 0x744   : > { %v4717_v20 = vpop.f32.mrf.mxu1 }
 0x745   : > { %4433 = vst.msk [vmem:[%s7392_s11 + $0xb8] sm:$0xff] %vm541_vm0, %v4717_v20 }
 0x746   : > { %v4366_v1 = vpop.f32.mrf.mxu1 }
 0x747   : > { %4431 = vst.msk [vmem:[%s7392_s11 + $0xa8] sm:$0xff] %vm541_vm0, %v4366_v1 }
 0x748   : > { %v4720_v54 = vpop.f32.mrf.mxu1 }
 0x749   : > { %4436 = vst.msk [vmem:[%s7392_s11 + $0xd0] sm:$0xff] %vm541_vm0, %v4720_v54 }
 0x74a   : > { %v4379_v34 = vpop.f32.mrf.mxu1 }
 0x74b   : > { %4434 = vst.msk [vmem:[%s7392_s11 + $0xc0] sm:$0xff] %vm541_vm0, %v4379_v34 }
 0x74c   : > { %v4721_v40 = vpop.f32.mrf.mxu1 }
 0x74d   : > { %4437 = vst.msk [vmem:[%s7392_s11 + $0xd8] sm:$0xff] %vm541_vm0, %v4721_v40 }
 0x74e   : > { %v4382_v50 = vpop.f32.mrf.mxu1 }
 0x74f   : > { %4435 = vst.msk [vmem:[%s7392_s11 + $0xc8] sm:$0xff] %vm541_vm0, %v4382_v50 }
 0x750   : > { %v4724_v15 = vpop.f32.mrf.mxu1 }
 0x751   : > { %4440 = vst.msk [vmem:[%s7392_s11 + $0xf0] sm:$0xff] %vm541_vm0, %v4724_v15 }
 0x752   : > { %v4395_v0 = vpop.f32.mrf.mxu1 }
 0x753   : > { %4438 = vst.msk [vmem:[%s7392_s11 + $0xe0] sm:$0xff] %vm541_vm0, %v4395_v0 }
 0x754   : > { %v4725_v8 = vpop.f32.mrf.mxu1 }
 0x755   : > { %4441 = vst.msk [vmem:[%s7392_s11 + $0xf8] sm:$0xff] %vm541_vm0, %v4725_v8 }
 0x756   : > { %v4398_v16 = vpop.f32.mrf.mxu1 }
 0x757   : > { %4439 = vst.msk [vmem:[%s7392_s11 + $0xe8] sm:$0xff] %vm541_vm0, %v4398_v16 }
 0x758   : > { %4856 = shalt.err (!%p4853_p3)
}
 0x759   : > { %s4857_s26 = scalar_lea.hbm %s7459_s17, 4096  ;;  %s4861_s9 = scalar_lea.hbm %s7515_s6, 8192 }
 0x75a   : > { %p4858_p4 = scmp.ne.s32.totalorder %s7459_s17, %s4857_s26  ;;  %p4862_p9 = scmp.lt.s32.totalorder %s7459_s17, %s7515_s6 }
 0x75b   : > { %p4863_p10 = scmp.lt.s32.totalorder %s4861_s9, %s4857_s26 }
 0x75c   : > { %p4859_p7 = pnand %p4858_p4, %p4983_p5 }
 0x75d   : > { %p4864_p11 = por %p4863_p10, %p4862_p9 }
 0x75e   : > { %p4860_p8 = pneg %p4859_p7 }
 0x760   : > { %p4865_p12 = pnand %p4864_p11, %p4860_p8 }
 0x762   : > { %4868 = shalt.err (!%p4865_p12)
}
 0x763   : > { %s4908_s12 = smov 128   ;;  %s4909_s14 = smov 8  }
 0x764   : > { %4742 = dma.vmem_to_hbm [thread:$0]  (%p4983_p5), %s7461_s13, 4096, %s7459_s17, %s7469_s25, %s4908_s12, %s4908_s12, %s4909_s14  }
 0x765 PF: > { %p4748_p13 = scmp.ge.s32.totalorder %s4903_s24, 2  ;;  %s4471_s15 = sand.u32 1, %s4891_s21  }
 0x766   : > { %s4472_s18 = scalar_lea.sflag [#allocation5], %s4471_s15 }
 0x767   : > { %p4745_p0 = pnand %p4748_p13, %p4987_p6 }
 0x769   : > { %p4746_p1 = pneg %p4745_p0 }
 0x76b   : > { %4886 = dma.done.wait (%p4746_p1), %s4472_s18, 4096  }
 0x76c   : > { %4888 = vsyncadd (%p4746_p1), %s4472_s18, 4294963200  ;;  %p16_p2 = scmp.ge.s32.totalorder %s4970_s27, 4   ;;  %s7559_s21 = smov %s4895_s22 }
 0x76d   : > { %s7560_s22 = smov %s4899_s23  ;;  %s7561_s23 = smov %s4981_s30 }
 0x76e   : > { %s7562_s24 = smov %s4970_s27  ;;  %18 = sbr.rel (!%p16_p2) target bundleno = 3 (0x3), region = 81 }
 0x773   :  { %4477 = vsyncpa [#allocation5], 1 }
 0x774   :  { %4479 = vsyncpa [#allocation5 + $0x1], 1 }

</bundles_post_ra>
